<compile_context>
chip_gen: v7x
topology: tpu7x:2x2x1
jax: 0.10.0
libtpu: 0.0.40
codegen_flags: <defaults>
</compile_context>

<pallas_src>
import math

import jax
import jax.numpy as jnp
from jax.experimental import pallas as pl
from jax.experimental.pallas import tpu as pltpu

LANE = 128  # TPU lane width: channel dims are zero-padded to a multiple of this.


def _round_up(x, m):
    return ((x + m - 1) // m) * m


def _batchnorm(x, gamma, beta, n_rows, eps=1e-5):
    """Training-mode BatchNorm over channels (last axis), stats over all rows (axis 0).

    One-pass statistics: var = E[x^2] - mean^2 (biased variance, like torch training mode).
    Padded (all-zero) channels stay exactly zero: (0-0)*rsqrt(0+eps)*0 + 0 = 0.
    """
    inv_n = 1.0 / float(n_rows)
    mean = jnp.sum(x, axis=0, keepdims=True) * inv_n
    ex2 = jnp.sum(x * x, axis=0, keepdims=True) * inv_n
    var = ex2 - mean * mean
    return (x - mean) * jax.lax.rsqrt(var + eps) * gamma + beta


def _make_kernel(batch, seq, embed, heads, num_layers):
    """Fused kernel: proj(2->E) + num_layers x (MHA + res + BN + FFN + res + BN)."""
    n = batch * seq
    head_dim = embed // heads

    def kernel(x2_ref, pw_ref, pb_ref,
               wq_ref, bq_ref, wk_ref, bk_ref, wv_ref, bv_ref,
               wo_ref, bo_ref, g1_ref, be1_ref,
               w1_ref, b1_ref, w2_ref, b2_ref, g2_ref, be2_ref,
               o_ref):
        # ---- proj: Linear(2 -> E). K=2 -> two broadcast FMAs instead of an MXU matmul.
        x2 = x2_ref[...]                                                   # (N, 2)
        x = x2[:, 0:1] * pw_ref[0:1, :] + x2[:, 1:2] * pw_ref[1:2, :] + pb_ref[...]  # (N, Ep)

        for l in range(num_layers):                    # static unroll over layers
            # ---- Multi-head self attention (1/sqrt(Dh) pre-folded into wq/bq) ----
            q = jnp.dot(x, wq_ref[l], preferred_element_type=jnp.float32) + bq_ref[l]
            k = jnp.dot(x, wk_ref[l], preferred_element_type=jnp.float32) + bk_ref[l]
            v = jnp.dot(x, wv_ref[l], preferred_element_type=jnp.float32) + bv_ref[l]

            head_outs = []
            for h in range(heads):                     # static unroll; batch dim handled by einsum
                c0 = h * head_dim
                qh = q[:, c0:c0 + head_dim].reshape(batch, seq, head_dim)  # (B, S, Dh)
                kh = k[:, c0:c0 + head_dim].reshape(batch, seq, head_dim)
                vh = v[:, c0:c0 + head_dim].reshape(batch, seq, head_dim)
                s = jnp.einsum('bqd,bkd->bqk', qh, kh,
                               preferred_element_type=jnp.float32)         # (B, S, S)
                s = s - jnp.max(s, axis=-1, keepdims=True)
                p = jnp.exp(s)
                p = p * pl.reciprocal(jnp.sum(p, axis=-1, keepdims=True), approx=True)
                oh = jnp.einsum('bqk,bkd->bqd', p, vh,
                                preferred_element_type=jnp.float32)        # (B, S, Dh)
                head_outs.append(oh.reshape(n, head_dim))

            attn = jnp.concatenate(head_outs, axis=-1)                     # (N, E), in registers
            attn = jnp.dot(attn, wo_ref[l],
                           preferred_element_type=jnp.float32) + bo_ref[l]  # (N, Ep)

            h1 = _batchnorm(x + attn, g1_ref[l], be1_ref[l], n)            # skip + Norm 1

            # ---- Feed-forward ----
            f = jnp.dot(h1, w1_ref[l], preferred_element_type=jnp.float32) + b1_ref[l]
            f = jnp.maximum(f, 0.0)                                        # ReLU
            f = jnp.dot(f, w2_ref[l], preferred_element_type=jnp.float32) + b2_ref[l]

            x = _batchnorm(h1 + f, g2_ref[l], be2_ref[l], n)               # skip + Norm 2

        o_ref[...] = x                                                     # lane-dense (N, Ep) store

    return kernel


# ---------------------------------------------------------------------------
# Wrapper
# ---------------------------------------------------------------------------

def transformer_forward(instance, packed, *, batch, seq, embed, ff, heads, num_layers):
    n = batch * seq
    ep = packed["proj_w"].shape[1]
    vm = pl.BlockSpec(memory_space=pltpu.MemorySpace.VMEM)

    x2 = instance.reshape(n, 2).astype(jnp.float32)

    kernel = _make_kernel(batch, seq, embed, heads, num_layers)
    out = pl.pallas_call(
        kernel,
        out_shape=jax.ShapeDtypeStruct((n, ep), jnp.float32),
        in_specs=[vm] * 19,
        out_specs=vm,
        compiler_params=pltpu.CompilerParams(vmem_limit_bytes=32 * 1024 * 1024),
    )(x2,
      packed["proj_w"], packed["proj_b"],
      packed["wq"], packed["bq"], packed["wk"], packed["bk"],
      packed["wv"], packed["bv"], packed["wo"], packed["bo"],
      packed["g1"], packed["be1"],
      packed["w1"], packed["b1"], packed["w2"], packed["b2"],
      packed["g2"], packed["be2"])

    return out[:, :embed].reshape(batch, seq, embed)


# ---------------------------------------------------------------------------
# Deterministic parameter init (logical shapes match the torch module) + packing
# ---------------------------------------------------------------------------

def init_params(key, embed, ff, num_layers):
    """Logical (unpadded) params, stored transposed relative to torch (y = x @ W + b)."""
    keys = jax.random.split(key, 2 + num_layers)

    def dense(k, shape, scale=0.05):
        return jax.random.normal(k, shape, dtype=jnp.float32) * scale

    params = {
        "proj_w": dense(keys[0], (2, embed)),        # torch Linear(2, E).weight.T
        "proj_b": dense(keys[1], (1, embed)),
        "layers": [],
    }
    for i in range(num_layers):
        lk = jax.random.split(keys[2 + i], 8)
        params["layers"].append({
            "wqkv": dense(lk[0], (embed, 3 * embed)),   # MHA in_proj_weight.T
            "bqkv": dense(lk[1], (1, 3 * embed)),
            "wo":   dense(lk[2], (embed, embed)),       # MHA out_proj.weight.T
            "bo":   dense(lk[3], (1, embed)),
            "g1":  jnp.ones((1, embed), jnp.float32),   # BatchNorm1d affine
            "be1": jnp.zeros((1, embed), jnp.float32),
            "w1":  dense(lk[4], (embed, ff)),           # Linear(E, FF).weight.T
            "bb1": dense(lk[5], (1, ff)),
            "w2":  dense(lk[6], (ff, embed)),           # Linear(FF, E).weight.T
            "bb2": dense(lk[7], (1, embed)),
            "g2":  jnp.ones((1, embed), jnp.float32),
            "be2": jnp.zeros((1, embed), jnp.float32),
        })
    return params


def _pad2(a, rows, cols):
    r, c = a.shape
    return jnp.pad(a, ((0, rows - r), (0, cols - c)))


def pack_params(params, *, embed, ff, heads):
    """One-time host-side transform: split in_proj into Q/K/V, fold 1/sqrt(Dh) into Wq/bq,
    zero-pad channel dims to the 128-lane width, and stack per-layer weights on a leading axis.
    Zero padding keeps padded channels exactly zero through every matmul / residual / BN."""
    ep = _round_up(embed, LANE)
    fp = _round_up(ff, LANE)
    head_dim = embed // heads
    scale = 1.0 / math.sqrt(head_dim)
    layers = params["layers"]

    packed = {
        "proj_w": _pad2(params["proj_w"], 2, ep),
        "proj_b": _pad2(params["proj_b"], 1, ep),
    }

    def stack(name, mats, rows, cols):
        packed[name] = jnp.stack([_pad2(m, rows, cols) for m in mats])

    stack("wq", [lp["wqkv"][:, :embed] * scale for lp in layers], ep, ep)
    stack("bq", [lp["bqkv"][:, :embed] * scale for lp in layers], 1, ep)
    stack("wk", [lp["wqkv"][:, embed:2 * embed] for lp in layers], ep, ep)
    stack("bk", [lp["bqkv"][:, embed:2 * embed] for lp in layers], 1, ep)
    stack("wv", [lp["wqkv"][:, 2 * embed:] for lp in layers], ep, ep)
    stack("bv", [lp["bqkv"][:, 2 * embed:] for lp in layers], 1, ep)
    stack("wo", [lp["wo"] for lp in layers], embed, ep)   # rows stay E: attn concat is E-wide
    stack("bo", [lp["bo"] for lp in layers], 1, ep)
    stack("g1", [lp["g1"] for lp in layers], 1, ep)
    stack("be1", [lp["be1"] for lp in layers], 1, ep)
    stack("w1", [lp["w1"] for lp in layers], ep, fp)
    stack("b1", [lp["bb1"] for lp in layers], 1, fp)
    stack("w2", [lp["w2"] for lp in layers], fp, ep)
    stack("b2", [lp["bb2"] for lp in layers], 1, ep)
    stack("g2", [lp["g2"] for lp in layers], 1, ep)
    stack("be2", [lp["be2"] for lp in layers], 1, ep)
    return packed


# ---------------------------------------------------------------------------
# Main
# ---------------------------------------------------------------------------

if __name__ == "__main__":
    B, S, E, FF, H, L = 2, 8, 32, 64, 4, 2   # batch, seq, embed, feed-forward, heads, layers
    assert E % H == 0

    key = jax.random.PRNGKey(0)
    k_x, k_p = jax.random.split(key)
    instance = jax.random.normal(k_x, (B, S, 2), dtype=jnp.float32)
    params = init_params(k_p, E, FF, L)
    packed = pack_params(params, embed=E, ff=FF, heads=H)

    out = transformer_forward(instance, packed,
                              batch=B, seq=S, embed=E, ff=FF, heads=H, num_layers=L)
    out = jax.block_until_ready(out)

    assert out.shape == (B, S, E), out.shape
    assert bool(jnp.all(jnp.isfinite(out)))
    print("KERNEL_OK")
</pallas_src>

<mosaic_0001>
module attributes {stable_mosaic.version = 11 : i64} {
  func.func @kernel(%arg0: memref<16x2xf32, #tpu.memory_space<vmem>>, %arg1: memref<2x128xf32, #tpu.memory_space<vmem>>, %arg2: memref<1x128xf32, #tpu.memory_space<vmem>>, %arg3: memref<2x128x128xf32, #tpu.memory_space<vmem>>, %arg4: memref<2x1x128xf32, #tpu.memory_space<vmem>>, %arg5: memref<2x128x128xf32, #tpu.memory_space<vmem>>, %arg6: memref<2x1x128xf32, #tpu.memory_space<vmem>>, %arg7: memref<2x128x128xf32, #tpu.memory_space<vmem>>, %arg8: memref<2x1x128xf32, #tpu.memory_space<vmem>>, %arg9: memref<2x32x128xf32, #tpu.memory_space<vmem>>, %arg10: memref<2x1x128xf32, #tpu.memory_space<vmem>>, %arg11: memref<2x1x128xf32, #tpu.memory_space<vmem>>, %arg12: memref<2x1x128xf32, #tpu.memory_space<vmem>>, %arg13: memref<2x128x128xf32, #tpu.memory_space<vmem>>, %arg14: memref<2x1x128xf32, #tpu.memory_space<vmem>>, %arg15: memref<2x128x128xf32, #tpu.memory_space<vmem>>, %arg16: memref<2x1x128xf32, #tpu.memory_space<vmem>>, %arg17: memref<2x1x128xf32, #tpu.memory_space<vmem>>, %arg18: memref<2x1x128xf32, #tpu.memory_space<vmem>>, %arg19: memref<16x128xf32, #tpu.memory_space<vmem>>) attributes {dimension_semantics = [], scalar_prefetch = 0 : i64, scratch_operands = 0 : i64, tpu.core_type = #tpu.core_type<tc>} {
    %c0 = arith.constant 0 : index
    %c0_0 = arith.constant 0 : index
    %0 = vector.load %arg0[%c0, %c0_0] : memref<16x2xf32, #tpu.memory_space<vmem>>, vector<16x2xf32>
    %1 = vector.extract_strided_slice %0 {offsets = [0, 0], sizes = [16, 1], strides = [1, 1]} : vector<16x2xf32> to vector<16x1xf32>
    %c0_1 = arith.constant 0 : index
    %c0_2 = arith.constant 0 : index
    %2 = vector.load %arg1[%c0_1, %c0_2] : memref<2x128xf32, #tpu.memory_space<vmem>>, vector<1x128xf32>
    %3 = vector.broadcast %1 : vector<16x1xf32> to vector<16x128xf32>
    %4 = vector.broadcast %2 : vector<1x128xf32> to vector<16x128xf32>
    %5 = arith.mulf %3, %4 : vector<16x128xf32>
    %6 = vector.extract_strided_slice %0 {offsets = [0, 1], sizes = [16, 1], strides = [1, 1]} : vector<16x2xf32> to vector<16x1xf32>
    %c1 = arith.constant 1 : index
    %c0_3 = arith.constant 0 : index
    %7 = vector.load %arg1[%c1, %c0_3] : memref<2x128xf32, #tpu.memory_space<vmem>>, vector<1x128xf32>
    %8 = vector.broadcast %6 : vector<16x1xf32> to vector<16x128xf32>
    %9 = vector.broadcast %7 : vector<1x128xf32> to vector<16x128xf32>
    %10 = arith.mulf %8, %9 : vector<16x128xf32>
    %11 = arith.addf %5, %10 : vector<16x128xf32>
    %c0_4 = arith.constant 0 : index
    %c0_5 = arith.constant 0 : index
    %12 = vector.load %arg2[%c0_4, %c0_5] : memref<1x128xf32, #tpu.memory_space<vmem>>, vector<1x128xf32>
    %13 = vector.broadcast %12 : vector<1x128xf32> to vector<16x128xf32>
    %14 = arith.addf %11, %13 : vector<16x128xf32>
    %c0_6 = arith.constant 0 : index
    %c0_7 = arith.constant 0 : index
    %c0_8 = arith.constant 0 : index
    %15 = vector.load %arg3[%c0_6, %c0_7, %c0_8] : memref<2x128x128xf32, #tpu.memory_space<vmem>>, vector<1x128x128xf32>
    %16 = vector.shape_cast %15 : vector<1x128x128xf32> to vector<128x128xf32>
    %cst = arith.constant dense<0.000000e+00> : vector<16x128xf32>
    %17 = tpu.matmul %14, %16, %cst {dimension_numbers = #tpu.dot_dimension_numbers<[1], [0], [0], [1], [0, 0, 1, 1], [], []>} : vector<16x128xf32>, vector<128x128xf32>, vector<16x128xf32> -> vector<16x128xf32>
    %c0_9 = arith.constant 0 : index
    %c0_10 = arith.constant 0 : index
    %c0_11 = arith.constant 0 : index
    %18 = vector.load %arg4[%c0_9, %c0_10, %c0_11] : memref<2x1x128xf32, #tpu.memory_space<vmem>>, vector<1x1x128xf32>
    %19 = vector.shape_cast %18 : vector<1x1x128xf32> to vector<1x128xf32>
    %20 = vector.broadcast %19 : vector<1x128xf32> to vector<16x128xf32>
    %21 = arith.addf %17, %20 : vector<16x128xf32>
    %c0_12 = arith.constant 0 : index
    %c0_13 = arith.constant 0 : index
    %c0_14 = arith.constant 0 : index
    %22 = vector.load %arg5[%c0_12, %c0_13, %c0_14] : memref<2x128x128xf32, #tpu.memory_space<vmem>>, vector<1x128x128xf32>
    %23 = vector.shape_cast %22 : vector<1x128x128xf32> to vector<128x128xf32>
    %cst_15 = arith.constant dense<0.000000e+00> : vector<16x128xf32>
    %24 = tpu.matmul %14, %23, %cst_15 {dimension_numbers = #tpu.dot_dimension_numbers<[1], [0], [0], [1], [0, 0, 1, 1], [], []>} : vector<16x128xf32>, vector<128x128xf32>, vector<16x128xf32> -> vector<16x128xf32>
    %c0_16 = arith.constant 0 : index
    %c0_17 = arith.constant 0 : index
    %c0_18 = arith.constant 0 : index
    %25 = vector.load %arg6[%c0_16, %c0_17, %c0_18] : memref<2x1x128xf32, #tpu.memory_space<vmem>>, vector<1x1x128xf32>
    %26 = vector.shape_cast %25 : vector<1x1x128xf32> to vector<1x128xf32>
    %27 = vector.broadcast %26 : vector<1x128xf32> to vector<16x128xf32>
    %28 = arith.addf %24, %27 : vector<16x128xf32>
    %c0_19 = arith.constant 0 : index
    %c0_20 = arith.constant 0 : index
    %c0_21 = arith.constant 0 : index
    %29 = vector.load %arg7[%c0_19, %c0_20, %c0_21] : memref<2x128x128xf32, #tpu.memory_space<vmem>>, vector<1x128x128xf32>
    %30 = vector.shape_cast %29 : vector<1x128x128xf32> to vector<128x128xf32>
    %cst_22 = arith.constant dense<0.000000e+00> : vector<16x128xf32>
    %31 = tpu.matmul %14, %30, %cst_22 {dimension_numbers = #tpu.dot_dimension_numbers<[1], [0], [0], [1], [0, 0, 1, 1], [], []>} : vector<16x128xf32>, vector<128x128xf32>, vector<16x128xf32> -> vector<16x128xf32>
    %c0_23 = arith.constant 0 : index
    %c0_24 = arith.constant 0 : index
    %c0_25 = arith.constant 0 : index
    %32 = vector.load %arg8[%c0_23, %c0_24, %c0_25] : memref<2x1x128xf32, #tpu.memory_space<vmem>>, vector<1x1x128xf32>
    %33 = vector.shape_cast %32 : vector<1x1x128xf32> to vector<1x128xf32>
    %34 = vector.broadcast %33 : vector<1x128xf32> to vector<16x128xf32>
    %35 = arith.addf %31, %34 : vector<16x128xf32>
    %36 = vector.extract_strided_slice %21 {offsets = [0, 0], sizes = [16, 8], strides = [1, 1]} : vector<16x128xf32> to vector<16x8xf32>
    %37 = vector.shape_cast %36 : vector<16x8xf32> to vector<2x8x8xf32>
    %38 = vector.extract_strided_slice %28 {offsets = [0, 0], sizes = [16, 8], strides = [1, 1]} : vector<16x128xf32> to vector<16x8xf32>
    %39 = vector.shape_cast %38 : vector<16x8xf32> to vector<2x8x8xf32>
    %40 = vector.extract_strided_slice %35 {offsets = [0, 0], sizes = [16, 8], strides = [1, 1]} : vector<16x128xf32> to vector<16x8xf32>
    %41 = vector.shape_cast %40 : vector<16x8xf32> to vector<2x8x8xf32>
    "tpu.trace_start"() <{level = 10 : i32, message = "bqd,bkd->bqk"}> : () -> ()
    %cst_26 = arith.constant dense<0.000000e+00> : vector<2x8x8xf32>
    %42 = tpu.matmul %37, %39, %cst_26 {dimension_numbers = #tpu.dot_dimension_numbers<[2], [2], [1], [1], [0, 0, 0, 1, 1, 1], [0], [0]>} : vector<2x8x8xf32>, vector<2x8x8xf32>, vector<2x8x8xf32> -> vector<2x8x8xf32>
    "tpu.trace_stop"() : () -> ()
    %cst_27 = arith.constant dense<0xFF800000> : vector<2x8xf32>
    %43 = vector.multi_reduction <maximumf>, %42, %cst_27 [2] : vector<2x8x8xf32> to vector<2x8xf32>
    %44 = vector.shape_cast %43 : vector<2x8xf32> to vector<2x8x1xf32>
    %45 = vector.broadcast %44 : vector<2x8x1xf32> to vector<2x8x8xf32>
    %46 = arith.subf %42, %45 : vector<2x8x8xf32>
    %47 = math.exp %46 : vector<2x8x8xf32>
    %cst_28 = arith.constant dense<0.000000e+00> : vector<2x8xf32>
    %48 = vector.multi_reduction <add>, %47, %cst_28 [2] : vector<2x8x8xf32> to vector<2x8xf32>
    %49 = vector.shape_cast %48 : vector<2x8xf32> to vector<2x8x1xf32>
    %50 = tpu.reciprocal %49 {approx = true} : vector<2x8x1xf32> -> vector<2x8x1xf32>
    %51 = vector.broadcast %50 : vector<2x8x1xf32> to vector<2x8x8xf32>
    %52 = arith.mulf %47, %51 : vector<2x8x8xf32>
    "tpu.trace_start"() <{level = 10 : i32, message = "bqk,bkd->bqd"}> : () -> ()
    %cst_29 = arith.constant dense<0.000000e+00> : vector<2x8x8xf32>
    %53 = tpu.matmul %52, %41, %cst_29 {dimension_numbers = #tpu.dot_dimension_numbers<[2], [1], [1], [2], [0, 0, 0, 1, 1, 2], [0], [0]>} : vector<2x8x8xf32>, vector<2x8x8xf32>, vector<2x8x8xf32> -> vector<2x8x8xf32>
    "tpu.trace_stop"() : () -> ()
    %54 = vector.shape_cast %53 : vector<2x8x8xf32> to vector<16x8xf32>
    %55 = vector.extract_strided_slice %21 {offsets = [0, 8], sizes = [16, 8], strides = [1, 1]} : vector<16x128xf32> to vector<16x8xf32>
    %56 = vector.shape_cast %55 : vector<16x8xf32> to vector<2x8x8xf32>
    %57 = vector.extract_strided_slice %28 {offsets = [0, 8], sizes = [16, 8], strides = [1, 1]} : vector<16x128xf32> to vector<16x8xf32>
    %58 = vector.shape_cast %57 : vector<16x8xf32> to vector<2x8x8xf32>
    %59 = vector.extract_strided_slice %35 {offsets = [0, 8], sizes = [16, 8], strides = [1, 1]} : vector<16x128xf32> to vector<16x8xf32>
    %60 = vector.shape_cast %59 : vector<16x8xf32> to vector<2x8x8xf32>
    "tpu.trace_start"() <{level = 10 : i32, message = "bqd,bkd->bqk"}> : () -> ()
    %cst_30 = arith.constant dense<0.000000e+00> : vector<2x8x8xf32>
    %61 = tpu.matmul %56, %58, %cst_30 {dimension_numbers = #tpu.dot_dimension_numbers<[2], [2], [1], [1], [0, 0, 0, 1, 1, 1], [0], [0]>} : vector<2x8x8xf32>, vector<2x8x8xf32>, vector<2x8x8xf32> -> vector<2x8x8xf32>
    "tpu.trace_stop"() : () -> ()
    %cst_31 = arith.constant dense<0xFF800000> : vector<2x8xf32>
    %62 = vector.multi_reduction <maximumf>, %61, %cst_31 [2] : vector<2x8x8xf32> to vector<2x8xf32>
    %63 = vector.shape_cast %62 : vector<2x8xf32> to vector<2x8x1xf32>
    %64 = vector.broadcast %63 : vector<2x8x1xf32> to vector<2x8x8xf32>
    %65 = arith.subf %61, %64 : vector<2x8x8xf32>
    %66 = math.exp %65 : vector<2x8x8xf32>
    %cst_32 = arith.constant dense<0.000000e+00> : vector<2x8xf32>
    %67 = vector.multi_reduction <add>, %66, %cst_32 [2] : vector<2x8x8xf32> to vector<2x8xf32>
    %68 = vector.shape_cast %67 : vector<2x8xf32> to vector<2x8x1xf32>
    %69 = tpu.reciprocal %68 {approx = true} : vector<2x8x1xf32> -> vector<2x8x1xf32>
    %70 = vector.broadcast %69 : vector<2x8x1xf32> to vector<2x8x8xf32>
    %71 = arith.mulf %66, %70 : vector<2x8x8xf32>
    "tpu.trace_start"() <{level = 10 : i32, message = "bqk,bkd->bqd"}> : () -> ()
    %cst_33 = arith.constant dense<0.000000e+00> : vector<2x8x8xf32>
    %72 = tpu.matmul %71, %60, %cst_33 {dimension_numbers = #tpu.dot_dimension_numbers<[2], [1], [1], [2], [0, 0, 0, 1, 1, 2], [0], [0]>} : vector<2x8x8xf32>, vector<2x8x8xf32>, vector<2x8x8xf32> -> vector<2x8x8xf32>
    "tpu.trace_stop"() : () -> ()
    %73 = vector.shape_cast %72 : vector<2x8x8xf32> to vector<16x8xf32>
    %74 = vector.extract_strided_slice %21 {offsets = [0, 16], sizes = [16, 8], strides = [1, 1]} : vector<16x128xf32> to vector<16x8xf32>
    %75 = vector.shape_cast %74 : vector<16x8xf32> to vector<2x8x8xf32>
    %76 = vector.extract_strided_slice %28 {offsets = [0, 16], sizes = [16, 8], strides = [1, 1]} : vector<16x128xf32> to vector<16x8xf32>
    %77 = vector.shape_cast %76 : vector<16x8xf32> to vector<2x8x8xf32>
    %78 = vector.extract_strided_slice %35 {offsets = [0, 16], sizes = [16, 8], strides = [1, 1]} : vector<16x128xf32> to vector<16x8xf32>
    %79 = vector.shape_cast %78 : vector<16x8xf32> to vector<2x8x8xf32>
    "tpu.trace_start"() <{level = 10 : i32, message = "bqd,bkd->bqk"}> : () -> ()
    %cst_34 = arith.constant dense<0.000000e+00> : vector<2x8x8xf32>
    %80 = tpu.matmul %75, %77, %cst_34 {dimension_numbers = #tpu.dot_dimension_numbers<[2], [2], [1], [1], [0, 0, 0, 1, 1, 1], [0], [0]>} : vector<2x8x8xf32>, vector<2x8x8xf32>, vector<2x8x8xf32> -> vector<2x8x8xf32>
    "tpu.trace_stop"() : () -> ()
    %cst_35 = arith.constant dense<0xFF800000> : vector<2x8xf32>
    %81 = vector.multi_reduction <maximumf>, %80, %cst_35 [2] : vector<2x8x8xf32> to vector<2x8xf32>
    %82 = vector.shape_cast %81 : vector<2x8xf32> to vector<2x8x1xf32>
    %83 = vector.broadcast %82 : vector<2x8x1xf32> to vector<2x8x8xf32>
    %84 = arith.subf %80, %83 : vector<2x8x8xf32>
    %85 = math.exp %84 : vector<2x8x8xf32>
    %cst_36 = arith.constant dense<0.000000e+00> : vector<2x8xf32>
    %86 = vector.multi_reduction <add>, %85, %cst_36 [2] : vector<2x8x8xf32> to vector<2x8xf32>
    %87 = vector.shape_cast %86 : vector<2x8xf32> to vector<2x8x1xf32>
    %88 = tpu.reciprocal %87 {approx = true} : vector<2x8x1xf32> -> vector<2x8x1xf32>
    %89 = vector.broadcast %88 : vector<2x8x1xf32> to vector<2x8x8xf32>
    %90 = arith.mulf %85, %89 : vector<2x8x8xf32>
    "tpu.trace_start"() <{level = 10 : i32, message = "bqk,bkd->bqd"}> : () -> ()
    %cst_37 = arith.constant dense<0.000000e+00> : vector<2x8x8xf32>
    %91 = tpu.matmul %90, %79, %cst_37 {dimension_numbers = #tpu.dot_dimension_numbers<[2], [1], [1], [2], [0, 0, 0, 1, 1, 2], [0], [0]>} : vector<2x8x8xf32>, vector<2x8x8xf32>, vector<2x8x8xf32> -> vector<2x8x8xf32>
    "tpu.trace_stop"() : () -> ()
    %92 = vector.shape_cast %91 : vector<2x8x8xf32> to vector<16x8xf32>
    %93 = vector.extract_strided_slice %21 {offsets = [0, 24], sizes = [16, 8], strides = [1, 1]} : vector<16x128xf32> to vector<16x8xf32>
    %94 = vector.shape_cast %93 : vector<16x8xf32> to vector<2x8x8xf32>
    %95 = vector.extract_strided_slice %28 {offsets = [0, 24], sizes = [16, 8], strides = [1, 1]} : vector<16x128xf32> to vector<16x8xf32>
    %96 = vector.shape_cast %95 : vector<16x8xf32> to vector<2x8x8xf32>
    %97 = vector.extract_strided_slice %35 {offsets = [0, 24], sizes = [16, 8], strides = [1, 1]} : vector<16x128xf32> to vector<16x8xf32>
    %98 = vector.shape_cast %97 : vector<16x8xf32> to vector<2x8x8xf32>
    "tpu.trace_start"() <{level = 10 : i32, message = "bqd,bkd->bqk"}> : () -> ()
    %cst_38 = arith.constant dense<0.000000e+00> : vector<2x8x8xf32>
    %99 = tpu.matmul %94, %96, %cst_38 {dimension_numbers = #tpu.dot_dimension_numbers<[2], [2], [1], [1], [0, 0, 0, 1, 1, 1], [0], [0]>} : vector<2x8x8xf32>, vector<2x8x8xf32>, vector<2x8x8xf32> -> vector<2x8x8xf32>
    "tpu.trace_stop"() : () -> ()
    %cst_39 = arith.constant dense<0xFF800000> : vector<2x8xf32>
    %100 = vector.multi_reduction <maximumf>, %99, %cst_39 [2] : vector<2x8x8xf32> to vector<2x8xf32>
    %101 = vector.shape_cast %100 : vector<2x8xf32> to vector<2x8x1xf32>
    %102 = vector.broadcast %101 : vector<2x8x1xf32> to vector<2x8x8xf32>
    %103 = arith.subf %99, %102 : vector<2x8x8xf32>
    %104 = math.exp %103 : vector<2x8x8xf32>
    %cst_40 = arith.constant dense<0.000000e+00> : vector<2x8xf32>
    %105 = vector.multi_reduction <add>, %104, %cst_40 [2] : vector<2x8x8xf32> to vector<2x8xf32>
    %106 = vector.shape_cast %105 : vector<2x8xf32> to vector<2x8x1xf32>
    %107 = tpu.reciprocal %106 {approx = true} : vector<2x8x1xf32> -> vector<2x8x1xf32>
    %108 = vector.broadcast %107 : vector<2x8x1xf32> to vector<2x8x8xf32>
    %109 = arith.mulf %104, %108 : vector<2x8x8xf32>
    "tpu.trace_start"() <{level = 10 : i32, message = "bqk,bkd->bqd"}> : () -> ()
    %cst_41 = arith.constant dense<0.000000e+00> : vector<2x8x8xf32>
    %110 = tpu.matmul %109, %98, %cst_41 {dimension_numbers = #tpu.dot_dimension_numbers<[2], [1], [1], [2], [0, 0, 0, 1, 1, 2], [0], [0]>} : vector<2x8x8xf32>, vector<2x8x8xf32>, vector<2x8x8xf32> -> vector<2x8x8xf32>
    "tpu.trace_stop"() : () -> ()
    %111 = vector.shape_cast %110 : vector<2x8x8xf32> to vector<16x8xf32>
    %112 = tpu.concatenate %54, %73, %92, %111 in 1 : vector<16x8xf32>, vector<16x8xf32>, vector<16x8xf32>, vector<16x8xf32> -> vector<16x32xf32>
    %c0_42 = arith.constant 0 : index
    %c0_43 = arith.constant 0 : index
    %c0_44 = arith.constant 0 : index
    %113 = vector.load %arg9[%c0_42, %c0_43, %c0_44] : memref<2x32x128xf32, #tpu.memory_space<vmem>>, vector<1x32x128xf32>
    %114 = vector.shape_cast %113 : vector<1x32x128xf32> to vector<32x128xf32>
    %cst_45 = arith.constant dense<0.000000e+00> : vector<16x128xf32>
    %115 = tpu.matmul %112, %114, %cst_45 {dimension_numbers = #tpu.dot_dimension_numbers<[1], [0], [0], [1], [0, 0, 1, 1], [], []>} : vector<16x32xf32>, vector<32x128xf32>, vector<16x128xf32> -> vector<16x128xf32>
    %c0_46 = arith.constant 0 : index
    %c0_47 = arith.constant 0 : index
    %c0_48 = arith.constant 0 : index
    %116 = vector.load %arg10[%c0_46, %c0_47, %c0_48] : memref<2x1x128xf32, #tpu.memory_space<vmem>>, vector<1x1x128xf32>
    %117 = vector.shape_cast %116 : vector<1x1x128xf32> to vector<1x128xf32>
    %118 = vector.broadcast %117 : vector<1x128xf32> to vector<16x128xf32>
    %119 = arith.addf %115, %118 : vector<16x128xf32>
    %120 = arith.addf %14, %119 : vector<16x128xf32>
    %c0_49 = arith.constant 0 : index
    %c0_50 = arith.constant 0 : index
    %c0_51 = arith.constant 0 : index
    %121 = vector.load %arg11[%c0_49, %c0_50, %c0_51] : memref<2x1x128xf32, #tpu.memory_space<vmem>>, vector<1x1x128xf32>
    %122 = vector.shape_cast %121 : vector<1x1x128xf32> to vector<1x128xf32>
    %c0_52 = arith.constant 0 : index
    %c0_53 = arith.constant 0 : index
    %c0_54 = arith.constant 0 : index
    %123 = vector.load %arg12[%c0_52, %c0_53, %c0_54] : memref<2x1x128xf32, #tpu.memory_space<vmem>>, vector<1x1x128xf32>
    %124 = vector.shape_cast %123 : vector<1x1x128xf32> to vector<1x128xf32>
    %cst_55 = arith.constant dense<0.000000e+00> : vector<128xf32>
    %125 = vector.multi_reduction <add>, %120, %cst_55 [0] : vector<16x128xf32> to vector<128xf32>
    %126 = vector.shape_cast %125 : vector<128xf32> to vector<1x128xf32>
    %cst_56 = arith.constant 6.250000e-02 : f32
    %127 = vector.broadcast %cst_56 : f32 to vector<1x128xf32>
    %128 = arith.mulf %126, %127 : vector<1x128xf32>
    %129 = arith.mulf %120, %120 : vector<16x128xf32>
    %cst_57 = arith.constant dense<0.000000e+00> : vector<128xf32>
    %130 = vector.multi_reduction <add>, %129, %cst_57 [0] : vector<16x128xf32> to vector<128xf32>
    %131 = vector.shape_cast %130 : vector<128xf32> to vector<1x128xf32>
    %cst_58 = arith.constant 6.250000e-02 : f32
    %132 = vector.broadcast %cst_58 : f32 to vector<1x128xf32>
    %133 = arith.mulf %131, %132 : vector<1x128xf32>
    %134 = arith.mulf %128, %128 : vector<1x128xf32>
    %135 = arith.subf %133, %134 : vector<1x128xf32>
    %136 = vector.broadcast %128 : vector<1x128xf32> to vector<16x128xf32>
    %137 = arith.subf %120, %136 : vector<16x128xf32>
    %cst_59 = arith.constant 9.99999974E-6 : f32
    %138 = vector.broadcast %cst_59 : f32 to vector<1x128xf32>
    %139 = arith.addf %135, %138 : vector<1x128xf32>
    %140 = math.rsqrt %139 : vector<1x128xf32>
    %141 = vector.broadcast %140 : vector<1x128xf32> to vector<16x128xf32>
    %142 = arith.mulf %137, %141 : vector<16x128xf32>
    %143 = vector.broadcast %122 : vector<1x128xf32> to vector<16x128xf32>
    %144 = arith.mulf %142, %143 : vector<16x128xf32>
    %145 = vector.broadcast %124 : vector<1x128xf32> to vector<16x128xf32>
    %146 = arith.addf %144, %145 : vector<16x128xf32>
    %c0_60 = arith.constant 0 : index
    %c0_61 = arith.constant 0 : index
    %c0_62 = arith.constant 0 : index
    %147 = vector.load %arg13[%c0_60, %c0_61, %c0_62] : memref<2x128x128xf32, #tpu.memory_space<vmem>>, vector<1x128x128xf32>
    %148 = vector.shape_cast %147 : vector<1x128x128xf32> to vector<128x128xf32>
    %cst_63 = arith.constant dense<0.000000e+00> : vector<16x128xf32>
    %149 = tpu.matmul %146, %148, %cst_63 {dimension_numbers = #tpu.dot_dimension_numbers<[1], [0], [0], [1], [0, 0, 1, 1], [], []>} : vector<16x128xf32>, vector<128x128xf32>, vector<16x128xf32> -> vector<16x128xf32>
    %c0_64 = arith.constant 0 : index
    %c0_65 = arith.constant 0 : index
    %c0_66 = arith.constant 0 : index
    %150 = vector.load %arg14[%c0_64, %c0_65, %c0_66] : memref<2x1x128xf32, #tpu.memory_space<vmem>>, vector<1x1x128xf32>
    %151 = vector.shape_cast %150 : vector<1x1x128xf32> to vector<1x128xf32>
    %152 = vector.broadcast %151 : vector<1x128xf32> to vector<16x128xf32>
    %153 = arith.addf %149, %152 : vector<16x128xf32>
    %cst_67 = arith.constant 0.000000e+00 : f32
    %154 = vector.broadcast %cst_67 : f32 to vector<16x128xf32>
    %155 = arith.maximumf %153, %154 : vector<16x128xf32>
    %c0_68 = arith.constant 0 : index
    %c0_69 = arith.constant 0 : index
    %c0_70 = arith.constant 0 : index
    %156 = vector.load %arg15[%c0_68, %c0_69, %c0_70] : memref<2x128x128xf32, #tpu.memory_space<vmem>>, vector<1x128x128xf32>
    %157 = vector.shape_cast %156 : vector<1x128x128xf32> to vector<128x128xf32>
    %cst_71 = arith.constant dense<0.000000e+00> : vector<16x128xf32>
    %158 = tpu.matmul %155, %157, %cst_71 {dimension_numbers = #tpu.dot_dimension_numbers<[1], [0], [0], [1], [0, 0, 1, 1], [], []>} : vector<16x128xf32>, vector<128x128xf32>, vector<16x128xf32> -> vector<16x128xf32>
    %c0_72 = arith.constant 0 : index
    %c0_73 = arith.constant 0 : index
    %c0_74 = arith.constant 0 : index
    %159 = vector.load %arg16[%c0_72, %c0_73, %c0_74] : memref<2x1x128xf32, #tpu.memory_space<vmem>>, vector<1x1x128xf32>
    %160 = vector.shape_cast %159 : vector<1x1x128xf32> to vector<1x128xf32>
    %161 = vector.broadcast %160 : vector<1x128xf32> to vector<16x128xf32>
    %162 = arith.addf %158, %161 : vector<16x128xf32>
    %163 = arith.addf %146, %162 : vector<16x128xf32>
    %c0_75 = arith.constant 0 : index
    %c0_76 = arith.constant 0 : index
    %c0_77 = arith.constant 0 : index
    %164 = vector.load %arg17[%c0_75, %c0_76, %c0_77] : memref<2x1x128xf32, #tpu.memory_space<vmem>>, vector<1x1x128xf32>
    %165 = vector.shape_cast %164 : vector<1x1x128xf32> to vector<1x128xf32>
    %c0_78 = arith.constant 0 : index
    %c0_79 = arith.constant 0 : index
    %c0_80 = arith.constant 0 : index
    %166 = vector.load %arg18[%c0_78, %c0_79, %c0_80] : memref<2x1x128xf32, #tpu.memory_space<vmem>>, vector<1x1x128xf32>
    %167 = vector.shape_cast %166 : vector<1x1x128xf32> to vector<1x128xf32>
    %cst_81 = arith.constant dense<0.000000e+00> : vector<128xf32>
    %168 = vector.multi_reduction <add>, %163, %cst_81 [0] : vector<16x128xf32> to vector<128xf32>
    %169 = vector.shape_cast %168 : vector<128xf32> to vector<1x128xf32>
    %cst_82 = arith.constant 6.250000e-02 : f32
    %170 = vector.broadcast %cst_82 : f32 to vector<1x128xf32>
    %171 = arith.mulf %169, %170 : vector<1x128xf32>
    %172 = arith.mulf %163, %163 : vector<16x128xf32>
    %cst_83 = arith.constant dense<0.000000e+00> : vector<128xf32>
    %173 = vector.multi_reduction <add>, %172, %cst_83 [0] : vector<16x128xf32> to vector<128xf32>
    %174 = vector.shape_cast %173 : vector<128xf32> to vector<1x128xf32>
    %cst_84 = arith.constant 6.250000e-02 : f32
    %175 = vector.broadcast %cst_84 : f32 to vector<1x128xf32>
    %176 = arith.mulf %174, %175 : vector<1x128xf32>
    %177 = arith.mulf %171, %171 : vector<1x128xf32>
    %178 = arith.subf %176, %177 : vector<1x128xf32>
    %179 = vector.broadcast %171 : vector<1x128xf32> to vector<16x128xf32>
    %180 = arith.subf %163, %179 : vector<16x128xf32>
    %cst_85 = arith.constant 9.99999974E-6 : f32
    %181 = vector.broadcast %cst_85 : f32 to vector<1x128xf32>
    %182 = arith.addf %178, %181 : vector<1x128xf32>
    %183 = math.rsqrt %182 : vector<1x128xf32>
    %184 = vector.broadcast %183 : vector<1x128xf32> to vector<16x128xf32>
    %185 = arith.mulf %180, %184 : vector<16x128xf32>
    %186 = vector.broadcast %165 : vector<1x128xf32> to vector<16x128xf32>
    %187 = arith.mulf %185, %186 : vector<16x128xf32>
    %188 = vector.broadcast %167 : vector<1x128xf32> to vector<16x128xf32>
    %189 = arith.addf %187, %188 : vector<16x128xf32>
    %c1_86 = arith.constant 1 : index
    %c0_87 = arith.constant 0 : index
    %c0_88 = arith.constant 0 : index
    %190 = vector.load %arg3[%c1_86, %c0_87, %c0_88] : memref<2x128x128xf32, #tpu.memory_space<vmem>>, vector<1x128x128xf32>
    %191 = vector.shape_cast %190 : vector<1x128x128xf32> to vector<128x128xf32>
    %cst_89 = arith.constant dense<0.000000e+00> : vector<16x128xf32>
    %192 = tpu.matmul %189, %191, %cst_89 {dimension_numbers = #tpu.dot_dimension_numbers<[1], [0], [0], [1], [0, 0, 1, 1], [], []>} : vector<16x128xf32>, vector<128x128xf32>, vector<16x128xf32> -> vector<16x128xf32>
    %c1_90 = arith.constant 1 : index
    %c0_91 = arith.constant 0 : index
    %c0_92 = arith.constant 0 : index
    %193 = vector.load %arg4[%c1_90, %c0_91, %c0_92] : memref<2x1x128xf32, #tpu.memory_space<vmem>>, vector<1x1x128xf32>
    %194 = vector.shape_cast %193 : vector<1x1x128xf32> to vector<1x128xf32>
    %195 = vector.broadcast %194 : vector<1x128xf32> to vector<16x128xf32>
    %196 = arith.addf %192, %195 : vector<16x128xf32>
    %c1_93 = arith.constant 1 : index
    %c0_94 = arith.constant 0 : index
    %c0_95 = arith.constant 0 : index
    %197 = vector.load %arg5[%c1_93, %c0_94, %c0_95] : memref<2x128x128xf32, #tpu.memory_space<vmem>>, vector<1x128x128xf32>
    %198 = vector.shape_cast %197 : vector<1x128x128xf32> to vector<128x128xf32>
    %cst_96 = arith.constant dense<0.000000e+00> : vector<16x128xf32>
    %199 = tpu.matmul %189, %198, %cst_96 {dimension_numbers = #tpu.dot_dimension_numbers<[1], [0], [0], [1], [0, 0, 1, 1], [], []>} : vector<16x128xf32>, vector<128x128xf32>, vector<16x128xf32> -> vector<16x128xf32>
    %c1_97 = arith.constant 1 : index
    %c0_98 = arith.constant 0 : index
    %c0_99 = arith.constant 0 : index
    %200 = vector.load %arg6[%c1_97, %c0_98, %c0_99] : memref<2x1x128xf32, #tpu.memory_space<vmem>>, vector<1x1x128xf32>
    %201 = vector.shape_cast %200 : vector<1x1x128xf32> to vector<1x128xf32>
    %202 = vector.broadcast %201 : vector<1x128xf32> to vector<16x128xf32>
    %203 = arith.addf %199, %202 : vector<16x128xf32>
    %c1_100 = arith.constant 1 : index
    %c0_101 = arith.constant 0 : index
    %c0_102 = arith.constant 0 : index
    %204 = vector.load %arg7[%c1_100, %c0_101, %c0_102] : memref<2x128x128xf32, #tpu.memory_space<vmem>>, vector<1x128x128xf32>
    %205 = vector.shape_cast %204 : vector<1x128x128xf32> to vector<128x128xf32>
    %cst_103 = arith.constant dense<0.000000e+00> : vector<16x128xf32>
    %206 = tpu.matmul %189, %205, %cst_103 {dimension_numbers = #tpu.dot_dimension_numbers<[1], [0], [0], [1], [0, 0, 1, 1], [], []>} : vector<16x128xf32>, vector<128x128xf32>, vector<16x128xf32> -> vector<16x128xf32>
    %c1_104 = arith.constant 1 : index
    %c0_105 = arith.constant 0 : index
    %c0_106 = arith.constant 0 : index
    %207 = vector.load %arg8[%c1_104, %c0_105, %c0_106] : memref<2x1x128xf32, #tpu.memory_space<vmem>>, vector<1x1x128xf32>
    %208 = vector.shape_cast %207 : vector<1x1x128xf32> to vector<1x128xf32>
    %209 = vector.broadcast %208 : vector<1x128xf32> to vector<16x128xf32>
    %210 = arith.addf %206, %209 : vector<16x128xf32>
    %211 = vector.extract_strided_slice %196 {offsets = [0, 0], sizes = [16, 8], strides = [1, 1]} : vector<16x128xf32> to vector<16x8xf32>
    %212 = vector.shape_cast %211 : vector<16x8xf32> to vector<2x8x8xf32>
    %213 = vector.extract_strided_slice %203 {offsets = [0, 0], sizes = [16, 8], strides = [1, 1]} : vector<16x128xf32> to vector<16x8xf32>
    %214 = vector.shape_cast %213 : vector<16x8xf32> to vector<2x8x8xf32>
    %215 = vector.extract_strided_slice %210 {offsets = [0, 0], sizes = [16, 8], strides = [1, 1]} : vector<16x128xf32> to vector<16x8xf32>
    %216 = vector.shape_cast %215 : vector<16x8xf32> to vector<2x8x8xf32>
    "tpu.trace_start"() <{level = 10 : i32, message = "bqd,bkd->bqk"}> : () -> ()
    %cst_107 = arith.constant dense<0.000000e+00> : vector<2x8x8xf32>
    %217 = tpu.matmul %212, %214, %cst_107 {dimension_numbers = #tpu.dot_dimension_numbers<[2], [2], [1], [1], [0, 0, 0, 1, 1, 1], [0], [0]>} : vector<2x8x8xf32>, vector<2x8x8xf32>, vector<2x8x8xf32> -> vector<2x8x8xf32>
    "tpu.trace_stop"() : () -> ()
    %cst_108 = arith.constant dense<0xFF800000> : vector<2x8xf32>
    %218 = vector.multi_reduction <maximumf>, %217, %cst_108 [2] : vector<2x8x8xf32> to vector<2x8xf32>
    %219 = vector.shape_cast %218 : vector<2x8xf32> to vector<2x8x1xf32>
    %220 = vector.broadcast %219 : vector<2x8x1xf32> to vector<2x8x8xf32>
    %221 = arith.subf %217, %220 : vector<2x8x8xf32>
    %222 = math.exp %221 : vector<2x8x8xf32>
    %cst_109 = arith.constant dense<0.000000e+00> : vector<2x8xf32>
    %223 = vector.multi_reduction <add>, %222, %cst_109 [2] : vector<2x8x8xf32> to vector<2x8xf32>
    %224 = vector.shape_cast %223 : vector<2x8xf32> to vector<2x8x1xf32>
    %225 = tpu.reciprocal %224 {approx = true} : vector<2x8x1xf32> -> vector<2x8x1xf32>
    %226 = vector.broadcast %225 : vector<2x8x1xf32> to vector<2x8x8xf32>
    %227 = arith.mulf %222, %226 : vector<2x8x8xf32>
    "tpu.trace_start"() <{level = 10 : i32, message = "bqk,bkd->bqd"}> : () -> ()
    %cst_110 = arith.constant dense<0.000000e+00> : vector<2x8x8xf32>
    %228 = tpu.matmul %227, %216, %cst_110 {dimension_numbers = #tpu.dot_dimension_numbers<[2], [1], [1], [2], [0, 0, 0, 1, 1, 2], [0], [0]>} : vector<2x8x8xf32>, vector<2x8x8xf32>, vector<2x8x8xf32> -> vector<2x8x8xf32>
    "tpu.trace_stop"() : () -> ()
    %229 = vector.shape_cast %228 : vector<2x8x8xf32> to vector<16x8xf32>
    %230 = vector.extract_strided_slice %196 {offsets = [0, 8], sizes = [16, 8], strides = [1, 1]} : vector<16x128xf32> to vector<16x8xf32>
    %231 = vector.shape_cast %230 : vector<16x8xf32> to vector<2x8x8xf32>
    %232 = vector.extract_strided_slice %203 {offsets = [0, 8], sizes = [16, 8], strides = [1, 1]} : vector<16x128xf32> to vector<16x8xf32>
    %233 = vector.shape_cast %232 : vector<16x8xf32> to vector<2x8x8xf32>
    %234 = vector.extract_strided_slice %210 {offsets = [0, 8], sizes = [16, 8], strides = [1, 1]} : vector<16x128xf32> to vector<16x8xf32>
    %235 = vector.shape_cast %234 : vector<16x8xf32> to vector<2x8x8xf32>
    "tpu.trace_start"() <{level = 10 : i32, message = "bqd,bkd->bqk"}> : () -> ()
    %cst_111 = arith.constant dense<0.000000e+00> : vector<2x8x8xf32>
    %236 = tpu.matmul %231, %233, %cst_111 {dimension_numbers = #tpu.dot_dimension_numbers<[2], [2], [1], [1], [0, 0, 0, 1, 1, 1], [0], [0]>} : vector<2x8x8xf32>, vector<2x8x8xf32>, vector<2x8x8xf32> -> vector<2x8x8xf32>
    "tpu.trace_stop"() : () -> ()
    %cst_112 = arith.constant dense<0xFF800000> : vector<2x8xf32>
    %237 = vector.multi_reduction <maximumf>, %236, %cst_112 [2] : vector<2x8x8xf32> to vector<2x8xf32>
    %238 = vector.shape_cast %237 : vector<2x8xf32> to vector<2x8x1xf32>
    %239 = vector.broadcast %238 : vector<2x8x1xf32> to vector<2x8x8xf32>
    %240 = arith.subf %236, %239 : vector<2x8x8xf32>
    %241 = math.exp %240 : vector<2x8x8xf32>
    %cst_113 = arith.constant dense<0.000000e+00> : vector<2x8xf32>
    %242 = vector.multi_reduction <add>, %241, %cst_113 [2] : vector<2x8x8xf32> to vector<2x8xf32>
    %243 = vector.shape_cast %242 : vector<2x8xf32> to vector<2x8x1xf32>
    %244 = tpu.reciprocal %243 {approx = true} : vector<2x8x1xf32> -> vector<2x8x1xf32>
    %245 = vector.broadcast %244 : vector<2x8x1xf32> to vector<2x8x8xf32>
    %246 = arith.mulf %241, %245 : vector<2x8x8xf32>
    "tpu.trace_start"() <{level = 10 : i32, message = "bqk,bkd->bqd"}> : () -> ()
    %cst_114 = arith.constant dense<0.000000e+00> : vector<2x8x8xf32>
    %247 = tpu.matmul %246, %235, %cst_114 {dimension_numbers = #tpu.dot_dimension_numbers<[2], [1], [1], [2], [0, 0, 0, 1, 1, 2], [0], [0]>} : vector<2x8x8xf32>, vector<2x8x8xf32>, vector<2x8x8xf32> -> vector<2x8x8xf32>
    "tpu.trace_stop"() : () -> ()
    %248 = vector.shape_cast %247 : vector<2x8x8xf32> to vector<16x8xf32>
    %249 = vector.extract_strided_slice %196 {offsets = [0, 16], sizes = [16, 8], strides = [1, 1]} : vector<16x128xf32> to vector<16x8xf32>
    %250 = vector.shape_cast %249 : vector<16x8xf32> to vector<2x8x8xf32>
    %251 = vector.extract_strided_slice %203 {offsets = [0, 16], sizes = [16, 8], strides = [1, 1]} : vector<16x128xf32> to vector<16x8xf32>
    %252 = vector.shape_cast %251 : vector<16x8xf32> to vector<2x8x8xf32>
    %253 = vector.extract_strided_slice %210 {offsets = [0, 16], sizes = [16, 8], strides = [1, 1]} : vector<16x128xf32> to vector<16x8xf32>
    %254 = vector.shape_cast %253 : vector<16x8xf32> to vector<2x8x8xf32>
    "tpu.trace_start"() <{level = 10 : i32, message = "bqd,bkd->bqk"}> : () -> ()
    %cst_115 = arith.constant dense<0.000000e+00> : vector<2x8x8xf32>
    %255 = tpu.matmul %250, %252, %cst_115 {dimension_numbers = #tpu.dot_dimension_numbers<[2], [2], [1], [1], [0, 0, 0, 1, 1, 1], [0], [0]>} : vector<2x8x8xf32>, vector<2x8x8xf32>, vector<2x8x8xf32> -> vector<2x8x8xf32>
    "tpu.trace_stop"() : () -> ()
    %cst_116 = arith.constant dense<0xFF800000> : vector<2x8xf32>
    %256 = vector.multi_reduction <maximumf>, %255, %cst_116 [2] : vector<2x8x8xf32> to vector<2x8xf32>
    %257 = vector.shape_cast %256 : vector<2x8xf32> to vector<2x8x1xf32>
    %258 = vector.broadcast %257 : vector<2x8x1xf32> to vector<2x8x8xf32>
    %259 = arith.subf %255, %258 : vector<2x8x8xf32>
    %260 = math.exp %259 : vector<2x8x8xf32>
    %cst_117 = arith.constant dense<0.000000e+00> : vector<2x8xf32>
    %261 = vector.multi_reduction <add>, %260, %cst_117 [2] : vector<2x8x8xf32> to vector<2x8xf32>
    %262 = vector.shape_cast %261 : vector<2x8xf32> to vector<2x8x1xf32>
    %263 = tpu.reciprocal %262 {approx = true} : vector<2x8x1xf32> -> vector<2x8x1xf32>
    %264 = vector.broadcast %263 : vector<2x8x1xf32> to vector<2x8x8xf32>
    %265 = arith.mulf %260, %264 : vector<2x8x8xf32>
    "tpu.trace_start"() <{level = 10 : i32, message = "bqk,bkd->bqd"}> : () -> ()
    %cst_118 = arith.constant dense<0.000000e+00> : vector<2x8x8xf32>
    %266 = tpu.matmul %265, %254, %cst_118 {dimension_numbers = #tpu.dot_dimension_numbers<[2], [1], [1], [2], [0, 0, 0, 1, 1, 2], [0], [0]>} : vector<2x8x8xf32>, vector<2x8x8xf32>, vector<2x8x8xf32> -> vector<2x8x8xf32>
    "tpu.trace_stop"() : () -> ()
    %267 = vector.shape_cast %266 : vector<2x8x8xf32> to vector<16x8xf32>
    %268 = vector.extract_strided_slice %196 {offsets = [0, 24], sizes = [16, 8], strides = [1, 1]} : vector<16x128xf32> to vector<16x8xf32>
    %269 = vector.shape_cast %268 : vector<16x8xf32> to vector<2x8x8xf32>
    %270 = vector.extract_strided_slice %203 {offsets = [0, 24], sizes = [16, 8], strides = [1, 1]} : vector<16x128xf32> to vector<16x8xf32>
    %271 = vector.shape_cast %270 : vector<16x8xf32> to vector<2x8x8xf32>
    %272 = vector.extract_strided_slice %210 {offsets = [0, 24], sizes = [16, 8], strides = [1, 1]} : vector<16x128xf32> to vector<16x8xf32>
    %273 = vector.shape_cast %272 : vector<16x8xf32> to vector<2x8x8xf32>
    "tpu.trace_start"() <{level = 10 : i32, message = "bqd,bkd->bqk"}> : () -> ()
    %cst_119 = arith.constant dense<0.000000e+00> : vector<2x8x8xf32>
    %274 = tpu.matmul %269, %271, %cst_119 {dimension_numbers = #tpu.dot_dimension_numbers<[2], [2], [1], [1], [0, 0, 0, 1, 1, 1], [0], [0]>} : vector<2x8x8xf32>, vector<2x8x8xf32>, vector<2x8x8xf32> -> vector<2x8x8xf32>
    "tpu.trace_stop"() : () -> ()
    %cst_120 = arith.constant dense<0xFF800000> : vector<2x8xf32>
    %275 = vector.multi_reduction <maximumf>, %274, %cst_120 [2] : vector<2x8x8xf32> to vector<2x8xf32>
    %276 = vector.shape_cast %275 : vector<2x8xf32> to vector<2x8x1xf32>
    %277 = vector.broadcast %276 : vector<2x8x1xf32> to vector<2x8x8xf32>
    %278 = arith.subf %274, %277 : vector<2x8x8xf32>
    %279 = math.exp %278 : vector<2x8x8xf32>
    %cst_121 = arith.constant dense<0.000000e+00> : vector<2x8xf32>
    %280 = vector.multi_reduction <add>, %279, %cst_121 [2] : vector<2x8x8xf32> to vector<2x8xf32>
    %281 = vector.shape_cast %280 : vector<2x8xf32> to vector<2x8x1xf32>
    %282 = tpu.reciprocal %281 {approx = true} : vector<2x8x1xf32> -> vector<2x8x1xf32>
    %283 = vector.broadcast %282 : vector<2x8x1xf32> to vector<2x8x8xf32>
    %284 = arith.mulf %279, %283 : vector<2x8x8xf32>
    "tpu.trace_start"() <{level = 10 : i32, message = "bqk,bkd->bqd"}> : () -> ()
    %cst_122 = arith.constant dense<0.000000e+00> : vector<2x8x8xf32>
    %285 = tpu.matmul %284, %273, %cst_122 {dimension_numbers = #tpu.dot_dimension_numbers<[2], [1], [1], [2], [0, 0, 0, 1, 1, 2], [0], [0]>} : vector<2x8x8xf32>, vector<2x8x8xf32>, vector<2x8x8xf32> -> vector<2x8x8xf32>
    "tpu.trace_stop"() : () -> ()
    %286 = vector.shape_cast %285 : vector<2x8x8xf32> to vector<16x8xf32>
    %287 = tpu.concatenate %229, %248, %267, %286 in 1 : vector<16x8xf32>, vector<16x8xf32>, vector<16x8xf32>, vector<16x8xf32> -> vector<16x32xf32>
    %c1_123 = arith.constant 1 : index
    %c0_124 = arith.constant 0 : index
    %c0_125 = arith.constant 0 : index
    %288 = vector.load %arg9[%c1_123, %c0_124, %c0_125] : memref<2x32x128xf32, #tpu.memory_space<vmem>>, vector<1x32x128xf32>
    %289 = vector.shape_cast %288 : vector<1x32x128xf32> to vector<32x128xf32>
    %cst_126 = arith.constant dense<0.000000e+00> : vector<16x128xf32>
    %290 = tpu.matmul %287, %289, %cst_126 {dimension_numbers = #tpu.dot_dimension_numbers<[1], [0], [0], [1], [0, 0, 1, 1], [], []>} : vector<16x32xf32>, vector<32x128xf32>, vector<16x128xf32> -> vector<16x128xf32>
    %c1_127 = arith.constant 1 : index
    %c0_128 = arith.constant 0 : index
    %c0_129 = arith.constant 0 : index
    %291 = vector.load %arg10[%c1_127, %c0_128, %c0_129] : memref<2x1x128xf32, #tpu.memory_space<vmem>>, vector<1x1x128xf32>
    %292 = vector.shape_cast %291 : vector<1x1x128xf32> to vector<1x128xf32>
    %293 = vector.broadcast %292 : vector<1x128xf32> to vector<16x128xf32>
    %294 = arith.addf %290, %293 : vector<16x128xf32>
    %295 = arith.addf %189, %294 : vector<16x128xf32>
    %c1_130 = arith.constant 1 : index
    %c0_131 = arith.constant 0 : index
    %c0_132 = arith.constant 0 : index
    %296 = vector.load %arg11[%c1_130, %c0_131, %c0_132] : memref<2x1x128xf32, #tpu.memory_space<vmem>>, vector<1x1x128xf32>
    %297 = vector.shape_cast %296 : vector<1x1x128xf32> to vector<1x128xf32>
    %c1_133 = arith.constant 1 : index
    %c0_134 = arith.constant 0 : index
    %c0_135 = arith.constant 0 : index
    %298 = vector.load %arg12[%c1_133, %c0_134, %c0_135] : memref<2x1x128xf32, #tpu.memory_space<vmem>>, vector<1x1x128xf32>
    %299 = vector.shape_cast %298 : vector<1x1x128xf32> to vector<1x128xf32>
    %cst_136 = arith.constant dense<0.000000e+00> : vector<128xf32>
    %300 = vector.multi_reduction <add>, %295, %cst_136 [0] : vector<16x128xf32> to vector<128xf32>
    %301 = vector.shape_cast %300 : vector<128xf32> to vector<1x128xf32>
    %cst_137 = arith.constant 6.250000e-02 : f32
    %302 = vector.broadcast %cst_137 : f32 to vector<1x128xf32>
    %303 = arith.mulf %301, %302 : vector<1x128xf32>
    %304 = arith.mulf %295, %295 : vector<16x128xf32>
    %cst_138 = arith.constant dense<0.000000e+00> : vector<128xf32>
    %305 = vector.multi_reduction <add>, %304, %cst_138 [0] : vector<16x128xf32> to vector<128xf32>
    %306 = vector.shape_cast %305 : vector<128xf32> to vector<1x128xf32>
    %cst_139 = arith.constant 6.250000e-02 : f32
    %307 = vector.broadcast %cst_139 : f32 to vector<1x128xf32>
    %308 = arith.mulf %306, %307 : vector<1x128xf32>
    %309 = arith.mulf %303, %303 : vector<1x128xf32>
    %310 = arith.subf %308, %309 : vector<1x128xf32>
    %311 = vector.broadcast %303 : vector<1x128xf32> to vector<16x128xf32>
    %312 = arith.subf %295, %311 : vector<16x128xf32>
    %cst_140 = arith.constant 9.99999974E-6 : f32
    %313 = vector.broadcast %cst_140 : f32 to vector<1x128xf32>
    %314 = arith.addf %310, %313 : vector<1x128xf32>
    %315 = math.rsqrt %314 : vector<1x128xf32>
    %316 = vector.broadcast %315 : vector<1x128xf32> to vector<16x128xf32>
    %317 = arith.mulf %312, %316 : vector<16x128xf32>
    %318 = vector.broadcast %297 : vector<1x128xf32> to vector<16x128xf32>
    %319 = arith.mulf %317, %318 : vector<16x128xf32>
    %320 = vector.broadcast %299 : vector<1x128xf32> to vector<16x128xf32>
    %321 = arith.addf %319, %320 : vector<16x128xf32>
    %c1_141 = arith.constant 1 : index
    %c0_142 = arith.constant 0 : index
    %c0_143 = arith.constant 0 : index
    %322 = vector.load %arg13[%c1_141, %c0_142, %c0_143] : memref<2x128x128xf32, #tpu.memory_space<vmem>>, vector<1x128x128xf32>
    %323 = vector.shape_cast %322 : vector<1x128x128xf32> to vector<128x128xf32>
    %cst_144 = arith.constant dense<0.000000e+00> : vector<16x128xf32>
    %324 = tpu.matmul %321, %323, %cst_144 {dimension_numbers = #tpu.dot_dimension_numbers<[1], [0], [0], [1], [0, 0, 1, 1], [], []>} : vector<16x128xf32>, vector<128x128xf32>, vector<16x128xf32> -> vector<16x128xf32>
    %c1_145 = arith.constant 1 : index
    %c0_146 = arith.constant 0 : index
    %c0_147 = arith.constant 0 : index
    %325 = vector.load %arg14[%c1_145, %c0_146, %c0_147] : memref<2x1x128xf32, #tpu.memory_space<vmem>>, vector<1x1x128xf32>
    %326 = vector.shape_cast %325 : vector<1x1x128xf32> to vector<1x128xf32>
    %327 = vector.broadcast %326 : vector<1x128xf32> to vector<16x128xf32>
    %328 = arith.addf %324, %327 : vector<16x128xf32>
    %cst_148 = arith.constant 0.000000e+00 : f32
    %329 = vector.broadcast %cst_148 : f32 to vector<16x128xf32>
    %330 = arith.maximumf %328, %329 : vector<16x128xf32>
    %c1_149 = arith.constant 1 : index
    %c0_150 = arith.constant 0 : index
    %c0_151 = arith.constant 0 : index
    %331 = vector.load %arg15[%c1_149, %c0_150, %c0_151] : memref<2x128x128xf32, #tpu.memory_space<vmem>>, vector<1x128x128xf32>
    %332 = vector.shape_cast %331 : vector<1x128x128xf32> to vector<128x128xf32>
    %cst_152 = arith.constant dense<0.000000e+00> : vector<16x128xf32>
    %333 = tpu.matmul %330, %332, %cst_152 {dimension_numbers = #tpu.dot_dimension_numbers<[1], [0], [0], [1], [0, 0, 1, 1], [], []>} : vector<16x128xf32>, vector<128x128xf32>, vector<16x128xf32> -> vector<16x128xf32>
    %c1_153 = arith.constant 1 : index
    %c0_154 = arith.constant 0 : index
    %c0_155 = arith.constant 0 : index
    %334 = vector.load %arg16[%c1_153, %c0_154, %c0_155] : memref<2x1x128xf32, #tpu.memory_space<vmem>>, vector<1x1x128xf32>
    %335 = vector.shape_cast %334 : vector<1x1x128xf32> to vector<1x128xf32>
    %336 = vector.broadcast %335 : vector<1x128xf32> to vector<16x128xf32>
    %337 = arith.addf %333, %336 : vector<16x128xf32>
    %338 = arith.addf %321, %337 : vector<16x128xf32>
    %c1_156 = arith.constant 1 : index
    %c0_157 = arith.constant 0 : index
    %c0_158 = arith.constant 0 : index
    %339 = vector.load %arg17[%c1_156, %c0_157, %c0_158] : memref<2x1x128xf32, #tpu.memory_space<vmem>>, vector<1x1x128xf32>
    %340 = vector.shape_cast %339 : vector<1x1x128xf32> to vector<1x128xf32>
    %c1_159 = arith.constant 1 : index
    %c0_160 = arith.constant 0 : index
    %c0_161 = arith.constant 0 : index
    %341 = vector.load %arg18[%c1_159, %c0_160, %c0_161] : memref<2x1x128xf32, #tpu.memory_space<vmem>>, vector<1x1x128xf32>
    %342 = vector.shape_cast %341 : vector<1x1x128xf32> to vector<1x128xf32>
    %cst_162 = arith.constant dense<0.000000e+00> : vector<128xf32>
    %343 = vector.multi_reduction <add>, %338, %cst_162 [0] : vector<16x128xf32> to vector<128xf32>
    %344 = vector.shape_cast %343 : vector<128xf32> to vector<1x128xf32>
    %cst_163 = arith.constant 6.250000e-02 : f32
    %345 = vector.broadcast %cst_163 : f32 to vector<1x128xf32>
    %346 = arith.mulf %344, %345 : vector<1x128xf32>
    %347 = arith.mulf %338, %338 : vector<16x128xf32>
    %cst_164 = arith.constant dense<0.000000e+00> : vector<128xf32>
    %348 = vector.multi_reduction <add>, %347, %cst_164 [0] : vector<16x128xf32> to vector<128xf32>
    %349 = vector.shape_cast %348 : vector<128xf32> to vector<1x128xf32>
    %cst_165 = arith.constant 6.250000e-02 : f32
    %350 = vector.broadcast %cst_165 : f32 to vector<1x128xf32>
    %351 = arith.mulf %349, %350 : vector<1x128xf32>
    %352 = arith.mulf %346, %346 : vector<1x128xf32>
    %353 = arith.subf %351, %352 : vector<1x128xf32>
    %354 = vector.broadcast %346 : vector<1x128xf32> to vector<16x128xf32>
    %355 = arith.subf %338, %354 : vector<16x128xf32>
    %cst_166 = arith.constant 9.99999974E-6 : f32
    %356 = vector.broadcast %cst_166 : f32 to vector<1x128xf32>
    %357 = arith.addf %353, %356 : vector<1x128xf32>
    %358 = math.rsqrt %357 : vector<1x128xf32>
    %359 = vector.broadcast %358 : vector<1x128xf32> to vector<16x128xf32>
    %360 = arith.mulf %355, %359 : vector<16x128xf32>
    %361 = vector.broadcast %340 : vector<1x128xf32> to vector<16x128xf32>
    %362 = arith.mulf %360, %361 : vector<16x128xf32>
    %363 = vector.broadcast %342 : vector<1x128xf32> to vector<16x128xf32>
    %364 = arith.addf %362, %363 : vector<16x128xf32>
    %c0_167 = arith.constant 0 : index
    %c0_168 = arith.constant 0 : index
    %365 = vector.load %arg19[%c0_167, %c0_168] : memref<16x128xf32, #tpu.memory_space<vmem>>, vector<16x128xf32>
    tpu.vector_store %arg19[%c0_167, %c0_168], %364 {strides = array<i32>} : memref<16x128xf32, #tpu.memory_space<vmem>>, vector<16x128xf32>,
    return
  }
}

</mosaic_0001>

<bundles_post_ra>
// kernel: tpu_custom_call.1
= control target key start
LH: loop header
LB: loop body
LE: loop exit
PB: predicated region body
PF: predicated region fallthrough
CT: control target
= control target key end

     0   :  { %s6422_s0 = inlined_call_operand.vmem [shape: f32[16,2], index: 0, kind: input, shape index: {}]   ;;  %s6423_s1 = inlined_call_operand.vmem [shape: f32[2,128], index: 1, kind: input, shape index: {}]   ;;  %s6424_s2 = inlined_call_operand.vmem [shape: f32[1,128], index: 2, kind: input, shape index: {}]   ;;  %s6425_s3 = inlined_call_operand.hbm [shape: f32[2,128,128], index: 3, kind: input, shape index: {}]   ;;  %s6426_s4 = inlined_call_operand.vmem [shape: f32[2,1,128], index: 4, kind: input, shape index: {}]   ;;  %s6427_s5 = inlined_call_operand.hbm [shape: f32[2,128,128], index: 5, kind: input, shape index: {}]   ;;  %s6428_s6 = inlined_call_operand.vmem [shape: f32[2,1,128], index: 6, kind: input, shape index: {}]   ;;  %s6429_s7 = inlined_call_operand.hbm [shape: f32[2,128,128], index: 7, kind: input, shape index: {}]   ;;  %s6430_s8 = inlined_call_operand.vmem [shape: f32[2,1,128], index: 8, kind: input, shape index: {}]   ;;  %s6431_s9 = inlined_call_operand.hbm [shape: f32[2,32,128], index: 9, kind: input, shape index: {}]   ;;  %s6432_s10 = inlined_call_operand.vmem [shape: f32[2,1,128], index: 10, kind: input, shape index: {}]   ;;  %s6433_s11 = inlined_call_operand.vmem [shape: f32[2,1,128], index: 11, kind: input, shape index: {}]   ;;  %s6434_s12 = inlined_call_operand.vmem [shape: f32[2,1,128], index: 12, kind: input, shape index: {}]   ;;  %s6435_s13 = inlined_call_operand.hbm [shape: f32[2,128,128], index: 13, kind: input, shape index: {}]   ;;  %s6436_s14 = inlined_call_operand.vmem [shape: f32[2,1,128], index: 14, kind: input, shape index: {}]   ;;  %s6437_s15 = inlined_call_operand.hbm [shape: f32[2,128,128], index: 15, kind: input, shape index: {}]   ;;  %s6438_s16 = inlined_call_operand.vmem [shape: f32[2,1,128], index: 16, kind: input, shape index: {}]   ;;  %s6439_s17 = inlined_call_operand.vmem [shape: f32[2,1,128], index: 17, kind: input, shape index: {}]   ;;  %s6440_s18 = inlined_call_operand.vmem [shape: f32[2,1,128], index: 18, kind: input, shape index: {}]   ;;  %s6441_s19 = inlined_call_operand.hbm [shape: f32[16,128], index: 19, kind: output, shape index: {}]  }
   0x1   :  { %6446 = sst [smem:[#allocation19_spill]] %s6422_s0 }
   0x2   :  { %6447 = sst [smem:[#allocation20_spill]] %s6423_s1 }
   0x3   :  { %6448 = sst [smem:[#allocation21_spill]] %s6424_s2 }
   0x4   :  { %6449 = sst [smem:[#allocation22_spill]] %s6425_s3 }
   0x5   :  { %6450 = sst [smem:[#allocation23_spill]] %s6441_s19 }
   0x6   :  { %24 = vsyncpa [#allocation3], 0 }
   0x7   :  { %25 = vsyncpa [#allocation6], 0 }
   0x8   :  { %26 = vsyncpa [#allocation9], 0 }
   0x9   :  { %27 = vsyncpa [#allocation12], 0 }
   0xa   :  { %28 = vsyncpa [#allocation4], 0  ;;  %s5735_s0 = smov [#allocation5]   ;;  %s5736_s20 = smov [#allocation8]  }
   0xb   :  { %s54_s30 = sshll.u32 %s5735_s0, 4  ;;  %s82_s21 = sshll.u32 %s5736_s20, 4  ;;  %s55_s30 = int_to_ptr.vmem [resolvable:$true] %s54_s30  ;;  %s5853_s21 = int_to_ptr.vmem [resolvable:$true] %s82_s21 }
   0xc   :  { %s5571_s2 = scalar_lea.hbm %s6427_s5, 4096 }
   0xd   :  { %p5572_p0 = scmp.ne.s32.totalorder %s6427_s5, %s5571_s2  ;;  %p5575_p1 = scmp.lt.u32.totalorder %s5571_s2, %s6427_s5 }
   0xf   :  { %p5577_p2 = pnand %p5575_p1, %p5572_p0 }
  0x11   :  { %5580 = shalt.err (!%p5577_p2)
}
  0x12   :  { %s5581_s26 = scalar_lea.vmem %s55_s30, 4096  ;;  %p5586_p4 = scmp.lt.s32.totalorder %s55_s30, %s55_s30 }
  0x13   :  { %p5582_p3 = scmp.ne.s32.totalorder %s55_s30, %s5581_s26  ;;  %p5587_p5 = scmp.lt.s32.totalorder %s5581_s26, %s5581_s26 }
  0x15   :  { %p5588_p6 = por %p5587_p5, %p5586_p4 }
  0x17   :  { %p5589_p7 = pnand %p5588_p6, %p5582_p3 }
  0x19   :  { %5592 = shalt.err (!%p5589_p7)
}
  0x1a   :  { %s5737_s27 = smov 128   ;;  %s5738_s28 = smov 8  }
  0x1b   :  { %60 = dma.hbm_to_vmem [thread:$0]  %s6427_s5, 4096, %s55_s30, [#allocation6], %s5737_s27, %s5737_s27, %s5738_s28  }
  0x1c   :  { %s5593_s22 = scalar_lea.hbm %s6431_s9, 1024 }
  0x1d   :  { %p5594_p8 = scmp.ne.s32.totalorder %s6431_s9, %s5593_s22  ;;  %p5597_p9 = scmp.lt.u32.totalorder %s5593_s22, %s6431_s9 }
  0x1f   :  { %p5599_p10 = pnand %p5597_p9, %p5594_p8 }
  0x21   :  { %5602 = shalt.err (!%p5599_p10)
}
  0x22   :  { %s5603_s3 = scalar_lea.vmem %s5853_s21, 1024  ;;  %p5608_p12 = scmp.lt.s32.totalorder %s5853_s21, %s5853_s21 }
  0x23   :  { %p5604_p11 = scmp.ne.s32.totalorder %s5853_s21, %s5603_s3  ;;  %p5609_p13 = scmp.lt.s32.totalorder %s5603_s3, %s5603_s3 }
  0x25   :  { %p5610_p0 = por %p5609_p13, %p5608_p12 }
  0x27   :  { %p5611_p1 = pnand %p5610_p0, %p5604_p11 }
  0x29   :  { %5614 = shalt.err (!%p5611_p1)
}
  0x2a   :  { %88 = dma.hbm_to_vmem [thread:$0]  %s6431_s9, 1024, %s5853_s21, [#allocation9], %s5737_s27, %s5737_s27, %s5738_s28  }
  0x2b   :  { %s5739_s26 = smov [#allocation2]   ;;  %s5740_s0 = smov [#allocation7]  }
  0x2c   :  { %s40_s29 = sshll.u32 %s5739_s26, 4  ;;  %s68_s20 = sshll.u32 %s5740_s0, 4  ;;  %s41_s29 = int_to_ptr.vmem [resolvable:$true] %s40_s29  ;;  %s5890_s20 = int_to_ptr.vmem [resolvable:$true] %s68_s20 }
  0x2d   :  { %s6451_s2 = sld [smem:[#allocation22_spill]] }
  0x33   :  { %s5615_s23 = scalar_lea.hbm %s6451_s2, 4096 }
  0x34   :  { %p5616_p2 = scmp.ne.s32.totalorder %s6451_s2, %s5615_s23  ;;  %p5619_p3 = scmp.lt.u32.totalorder %s5615_s23, %s6451_s2 }
  0x36   :  { %p5621_p4 = pnand %p5619_p3, %p5616_p2 }
  0x38   :  { %5624 = shalt.err (!%p5621_p4)
}
  0x39   :  { %s5625_s9 = scalar_lea.vmem %s41_s29, 4096  ;;  %p5630_p6 = scmp.lt.s32.totalorder %s41_s29, %s41_s29 }
  0x3a   :  { %p5626_p5 = scmp.ne.s32.totalorder %s41_s29, %s5625_s9  ;;  %p5631_p7 = scmp.lt.s32.totalorder %s5625_s9, %s5625_s9 }
  0x3c   :  { %p5632_p8 = por %p5631_p7, %p5630_p6 }
  0x3e   :  { %p5633_p9 = pnand %p5632_p8, %p5626_p5 }
  0x40   :  { %5636 = shalt.err (!%p5633_p9)
}
  0x41   :  { %46 = dma.hbm_to_vmem [thread:$0]  %s6451_s2, 4096, %s41_s29, [#allocation3], %s5737_s27, %s5737_s27, %s5738_s28  }
  0x42   :  { %s5637_s19 = scalar_lea.hbm %s6429_s7, 4096 }
  0x43   :  { %p5638_p10 = scmp.ne.s32.totalorder %s6429_s7, %s5637_s19  ;;  %p5641_p11 = scmp.lt.u32.totalorder %s5637_s19, %s6429_s7 }
  0x45   :  { %p5643_p12 = pnand %p5641_p11, %p5638_p10 }
  0x47   :  { %5646 = shalt.err (!%p5643_p12)
}
  0x48   :  { %s5647_s24 = scalar_lea.vmem %s5890_s20, 4096  ;;  %p5652_p0 = scmp.lt.s32.totalorder %s5890_s20, %s5890_s20 }
  0x49   :  { %p5648_p13 = scmp.ne.s32.totalorder %s5890_s20, %s5647_s24  ;;  %p5653_p1 = scmp.lt.s32.totalorder %s5647_s24, %s5647_s24 }
  0x4b   :  { %p5654_p2 = por %p5653_p1, %p5652_p0 }
  0x4d   :  { %p5655_p3 = pnand %p5654_p2, %p5648_p13 }
  0x4f   :  { %5658 = shalt.err (!%p5655_p3)
}
  0x50   :  { %74 = dma.hbm_to_vmem [thread:$0]  %s6429_s7, 4096, %s5890_s20, [#allocation6], %s5737_s27, %s5737_s27, %s5738_s28  }
  0x51   :  { %s5741_s25 = smov [#allocation10]   ;;  %s5742_s9 = smov [#allocation11]  }
  0x52   :  { %s100_s3 = sshll.u32 %s5741_s25, 4  ;;  %s114_s21 = sshll.u32 %s5742_s9, 4  ;;  %s101_s3 = int_to_ptr.vmem [resolvable:$true] %s100_s3  ;;  %s5927_s21 = int_to_ptr.vmem [resolvable:$true] %s114_s21 }
  0x53   :  { %s5659_s26 = scalar_lea.hbm %s6435_s13, 4096 }
  0x54   :  { %p5660_p4 = scmp.ne.s32.totalorder %s6435_s13, %s5659_s26  ;;  %p5663_p5 = scmp.lt.u32.totalorder %s5659_s26, %s6435_s13 }
  0x56   :  { %p5665_p6 = pnand %p5663_p5, %p5660_p4 }
  0x58   :  { %5668 = shalt.err (!%p5665_p6)
}
  0x59   :  { %s5669_s7 = scalar_lea.vmem %s101_s3, 4096  ;;  %p5674_p8 = scmp.lt.s32.totalorder %s101_s3, %s101_s3 }
  0x5a   :  { %p5670_p7 = scmp.ne.s32.totalorder %s101_s3, %s5669_s7  ;;  %p5675_p9 = scmp.lt.s32.totalorder %s5669_s7, %s5669_s7 }
  0x5c   :  { %p5676_p10 = por %p5675_p9, %p5674_p8 }
  0x5e   :  { %p5677_p11 = pnand %p5676_p10, %p5670_p7 }
  0x60   :  { %5680 = shalt.err (!%p5677_p11)
}
  0x61   :  { %106 = dma.hbm_to_vmem [thread:$0]  %s6435_s13, 4096, %s101_s3, [#allocation9], %s5737_s27, %s5737_s27, %s5738_s28  }
  0x62   :  { %s5681_s2 = scalar_lea.hbm %s6437_s15, 4096 }
  0x63   :  { %p5682_p12 = scmp.ne.s32.totalorder %s6437_s15, %s5681_s2  ;;  %p5685_p13 = scmp.lt.u32.totalorder %s5681_s2, %s6437_s15 }
  0x65   :  { %p5687_p0 = pnand %p5685_p13, %p5682_p12 }
  0x67   :  { %5690 = shalt.err (!%p5687_p0)
}
  0x68   :  { %s5691_s26 = scalar_lea.vmem %s5927_s21, 4096  ;;  %p5696_p2 = scmp.lt.s32.totalorder %s5927_s21, %s5927_s21 }
  0x69   :  { %p5692_p1 = scmp.ne.s32.totalorder %s5927_s21, %s5691_s26  ;;  %p5697_p3 = scmp.lt.s32.totalorder %s5691_s26, %s5691_s26 }
  0x6b   :  { %p5698_p4 = por %p5697_p3, %p5696_p2 }
  0x6d   :  { %p5699_p5 = pnand %p5698_p4, %p5692_p1 }
  0x6f   :  { %5702 = shalt.err (!%p5699_p5)
}
  0x70   :  { %120 = dma.hbm_to_vmem [thread:$0]  %s6437_s15, 4096, %s5927_s21, [#allocation12], %s5737_s27, %s5737_s27, %s5738_s28  }
  0x71   :  { %5725 = dma.done.wait [#allocation3], 4096  }
  0x72   :  { %5726 = vsyncadd [#allocation3], 4294963200 }
  0x73   :  { %5727 = dma.done.wait [#allocation6], 8192  }
  0x74   :  { %5728 = vsyncadd [#allocation6], 4294959104 }
  0x75   :  { %5729 = dma.done.wait [#allocation9], 5120  }
  0x76   :  { %5730 = vsyncadd [#allocation9], 4294962176 }
  0x77   :  { %5731 = dma.done.wait [#allocation12], 4096  }
  0x78   :  { %5732 = vsyncadd [#allocation12], 4294963200  ;;  %v5743_v0 = vmov 0   ;;  %s6452_s1 = sld [smem:[#allocation19_spill]]  ;;  %v190_v3 = vld [vmem:[#allocation2] sm:$0xff]  ;;  %v191_v4 = vld [vmem:[#allocation2 + $0x8] sm:$0xff] }
  0x79   :  { %5497 = vset.pattern.permute.xlu1 %v5743_v0  ;;  %5495 = vset.pattern.permute.xlu0 %v5743_v0  ;;  %v288_v5 = vld [vmem:[#allocation5] sm:$0xff]  ;;  %v289_v6 = vld [vmem:[#allocation5 + $0x8] sm:$0xff]  ;;  %v5141_v7 = vpack.c.bf16 %v191_v4, %v190_v3  ;;  %v192_v9 = vld [vmem:[#allocation2 + $0x10] sm:$0xff]  ;;  %v5744_v16 = vmov 1   ;;  %s6453_s20 = sld [smem:[#allocation20_spill]]  ;;  %s6454_s25 = sld [smem:[#allocation21_spill]] }
  0x7a   :  { %v5173_v8 = vpack.c.bf16 %v289_v6, %v288_v5  ;;  %v193_v10 = vld [vmem:[#allocation2 + $0x18] sm:$0xff]  ;;  %v290_v11 = vld [vmem:[#allocation5 + $0x10] sm:$0xff]  ;;  %v194_v15 = vld [vmem:[#allocation2 + $0x20] sm:$0xff]  ;;  %vm5746_vm0 = vmmov 0   ;;  %vm484_vm1 = vcmask 64512   ;;  %s5747_s19 = smov 120  }
  0x7b   :  { %v291_v12 = vld [vmem:[#allocation5 + $0x18] sm:$0xff]  ;;  %5142 = vmatprep.subr.bf16.mxu0 %v5141_v7  ;;  %v5145_v13 = vpack.c.bf16 %v193_v10, %v192_v9  ;;  %v195_v17 = vld [vmem:[#allocation2 + $0x28] sm:$0xff]  ;;  %v292_v18 = vld [vmem:[#allocation5 + $0x20] sm:$0xff]  ;;  %s5748_s0 = smov 112   ;;  %s5750_s22 = smov 16   ;;  %vm1826_vm2 = vcmask 195584  }
  0x7c   :  { %5174 = vmatprep.subr.bf16.mxu1 %v5173_v8  ;;  %v5177_v14 = vpack.c.bf16 %v291_v12, %v290_v11  ;;  %v293_v19 = vld [vmem:[#allocation5 + $0x28] sm:$0xff]  ;;  %5144 = vmatpush3.bf16.msra.mxu0 %v5141_v7  ;;  %v5149_v20 = vpack.c.bf16 %v195_v17, %v194_v15  ;;  %v196_v22 = vld [vmem:[#allocation2 + $0x30] sm:$0xff]  ;;  %v197_v23 = vld [vmem:[#allocation2 + $0x38] sm:$0xff]  ;;  %s5751_s7 = smov 24   ;;  %vm1823_vm3 = vcmask 130048   ;;  %vm1840_vm4 = vcmask 261120  }
  0x7d   :  { %5176 = vmatpush3.bf16.msra.mxu1 %v5173_v8  ;;  %5146 = vmatprep.subr.bf16.mxu0 %v5145_v13  ;;  %v5181_v21 = vpack.c.bf16 %v293_v19, %v292_v18  ;;  %v294_v24 = vld [vmem:[#allocation5 + $0x30] sm:$0xff]  ;;  %v295_v25 = vld [vmem:[#allocation5 + $0x38] sm:$0xff]  ;;  %v5153_v26 = vpack.c.bf16 %v197_v23, %v196_v22  ;;  %v198_v28 = vld [vmem:[#allocation2 + $0x40] sm:$0xff] }
  0x7e   :  { %v146_v1 = vld [vmem:[%s6452_s1 + $0x8] sm:$0xff]  ;;  %v145_v2 = vld [vmem:[%s6452_s1] sm:$0xff]  ;;  %5178 = vmatprep.subr.bf16.mxu1 %v5177_v14  ;;  %v5185_v27 = vpack.c.bf16 %v295_v25, %v294_v24  ;;  %v199_v29 = vld [vmem:[#allocation2 + $0x48] sm:$0xff]  ;;  %s5749_s1 = smov 104  }
  0x7f   :  { %155 = vperm.xlu1 %5497, %v146_v1   ;;  %150 = vperm.xlu0 %5495, %v145_v2   ;;  %v296_v30 = vld [vmem:[#allocation5 + $0x40] sm:$0xff]  ;;  %v297_v31 = vld [vmem:[#allocation5 + $0x48] sm:$0xff]  ;;  %v5157_v32 = vpack.c.bf16 %v199_v29, %v198_v28  ;;  %v200_v34 = vld [vmem:[#allocation2 + $0x50] sm:$0xff] }
  0x80   :  { %5148 = vmatpush3.bf16.msra.mxu0 %v5145_v13  ;;  %v5189_v33 = vpack.c.bf16 %v297_v31, %v296_v30  ;;  %v201_v35 = vld [vmem:[#allocation2 + $0x58] sm:$0xff]  ;;  %v298_v36 = vld [vmem:[#allocation5 + $0x50] sm:$0xff]  ;;  %v202_v40 = vld [vmem:[#allocation2 + $0x60] sm:$0xff] }
  0x81   :  { %5180 = vmatpush3.bf16.msra.mxu1 %v5177_v14  ;;  %5150 = vmatprep.subr.bf16.mxu0 %v5149_v20  ;;  %v299_v37 = vld [vmem:[#allocation5 + $0x58] sm:$0xff]  ;;  %v5161_v38 = vpack.c.bf16 %v201_v35, %v200_v34  ;;  %v203_v41 = vld [vmem:[#allocation2 + $0x68] sm:$0xff]  ;;  %v300_v42 = vld [vmem:[#allocation5 + $0x60] sm:$0xff] }
  0x82   :  { %5182 = vmatprep.subr.bf16.mxu1 %v5181_v21  ;;  %v5193_v39 = vpack.c.bf16 %v299_v37, %v298_v36  ;;  %v301_v43 = vld [vmem:[#allocation5 + $0x68] sm:$0xff]  ;;  %v5165_v44 = vpack.c.bf16 %v203_v41, %v202_v40  ;;  %v204_v46 = vld [vmem:[#allocation2 + $0x70] sm:$0xff]  ;;  %v205_v47 = vld [vmem:[#allocation2 + $0x78] sm:$0xff] }
  0x83   :  { %5498 = vset.pattern.permute.xlu1 %v5744_v16  ;;  %5496 = vset.pattern.permute.xlu0 %v5744_v16  ;;  %v5197_v45 = vpack.c.bf16 %v301_v43, %v300_v42  ;;  %v302_v48 = vld [vmem:[#allocation5 + $0x70] sm:$0xff]  ;;  %v303_v49 = vld [vmem:[#allocation5 + $0x78] sm:$0xff]  ;;  %v5169_v50 = vpack.c.bf16 %v205_v47, %v204_v46  ;;  %v386_v52 = vld [vmem:[#allocation7] sm:$0xff] }
  0x84   :  { %170 = vperm.xlu1 %5498, %v146_v1   ;;  %166 = vperm.xlu0 %5496, %v145_v2   ;;  %v5201_v51 = vpack.c.bf16 %v303_v49, %v302_v48  ;;  %v387_v53 = vld [vmem:[#allocation7 + $0x8] sm:$0xff]  ;;  %v4268_v57 = vld [vmem:[%s6453_s20] ss:$0 sm:$0xff]  ;;  %v4269_v58 = vld [vmem:[%s6453_s20 + $0x1] ss:$0 sm:$0xff] }
  0x85   :  { %5152 = vmatpush3.bf16.msra.mxu0 %v5149_v20  ;;  %5184 = vmatpush3.bf16.msra.mxu1 %v5181_v21  ;;  %v5205_v54 = vpack.c.bf16 %v387_v53, %v386_v52  ;;  %v4270_v1 = vld [vmem:[%s6454_s25] ss:$0 sm:$0xff]  ;;  %v389_v5 = vld [vmem:[#allocation7 + $0x18] sm:$0xff]  ;;  %v390_v9 = vld [vmem:[#allocation7 + $0x20] sm:$0xff]  ;;  %s5752_s25 = smov [#allocation13]  }
  0x86   :  { %5154 = vmatprep.subr.bf16.mxu0 %v5153_v26  ;;  %5186 = vmatprep.subr.bf16.mxu1 %v5185_v27  ;;  %v388_v4 = vld [vmem:[#allocation7 + $0x10] sm:$0xff]  ;;  %v391_v10 = vld [vmem:[#allocation7 + $0x28] sm:$0xff]  ;;  %v393_v13 = vld [vmem:[#allocation7 + $0x38] sm:$0xff]  ;;  %s4253_s9 = sshll.u32 %s5752_s25, 4  ;;  %s4254_s9 = int_to_ptr.vmem [resolvable:$true] %s4253_s9 }
  0x87   :  { %v5209_v8 = vpack.c.bf16 %v389_v5, %v388_v4  ;;  %v5213_v11 = vpack.c.bf16 %v391_v10, %v390_v9  ;;  %v392_v12 = vld [vmem:[#allocation7 + $0x30] sm:$0xff]  ;;  %v394_v15 = vld [vmem:[#allocation7 + $0x40] sm:$0xff]  ;;  %v395_v16 = vld [vmem:[#allocation7 + $0x48] sm:$0xff]  ;;  %s5703_s5 = scalar_lea.vmem %s4254_s9, 256  ;;  %p5708_p7 = scmp.lt.s32.totalorder %s4254_s9, %s4254_s9 }
  0x88   :  { %v5217_v14 = vpack.c.bf16 %v393_v13, %v392_v12  ;;  %v5221_v17 = vpack.c.bf16 %v395_v16, %v394_v15  ;;  %v396_v18 = vld [vmem:[#allocation7 + $0x50] sm:$0xff]  ;;  %v397_v19 = vld [vmem:[#allocation7 + $0x58] sm:$0xff]  ;;  %v398_v21 = vld [vmem:[#allocation7 + $0x60] sm:$0xff]  ;;  %p5704_p6 = scmp.ne.s32.totalorder %s4254_s9, %s5703_s5  ;;  %p5709_p8 = scmp.lt.s32.totalorder %s5703_s5, %s5703_s5 }
  0x89   :  { %5156 = vmatpush3.bf16.msra.mxu0 %v5153_v26  ;;  %5188 = vmatpush3.bf16.msra.mxu1 %v5185_v27  ;;  %v5225_v20 = vpack.c.bf16 %v397_v19, %v396_v18  ;;  %v399_v22 = vld [vmem:[#allocation7 + $0x68] sm:$0xff]  ;;  %v400_v24 = vld [vmem:[#allocation7 + $0x70] sm:$0xff]  ;;  %v401_v25 = vld [vmem:[#allocation7 + $0x78] sm:$0xff]  ;;  %v5745_v27 = vmov 0.0  }
  0x8a   :  { %5158 = vmatprep.subr.bf16.mxu0 %v5157_v32  ;;  %5190 = vmatprep.subr.bf16.mxu1 %v5189_v33  ;;  %v5229_v23 = vpack.c.bf16 %v399_v22, %v398_v21  ;;  %v5233_v26 = vpack.c.bf16 %v401_v25, %v400_v24  ;;  %v4272_v28 = vld [vmem:[%s6428_s6] ss:$0 sm:$0xff]  ;;  %p5710_p9 = por %p5709_p8, %p5708_p7 }
  0x8c   :  { %p5711_p10 = pnand %p5710_p9, %p5704_p6 }
  0x8d   :  { %5160 = vmatpush3.bf16.msra.mxu0 %v5157_v32  ;;  %5192 = vmatpush3.bf16.msra.mxu1 %v5189_v33  ;;  %v4271_v33 = vld [vmem:[%s6426_s4] ss:$0 sm:$0xff] }
  0x8e   :  { %5162 = vmatprep.subr.bf16.mxu0 %v5161_v38  ;;  %5194 = vmatprep.subr.bf16.mxu1 %v5193_v39 }
  0x91   :  { %5164 = vmatpush3.bf16.msra.mxu0 %v5161_v38  ;;  %5196 = vmatpush3.bf16.msra.mxu1 %v5193_v39  ;;  %v4273_v38 = vld [vmem:[%s6430_s8] ss:$0 sm:$0xff] }
  0x92   :  { %5166 = vmatprep.subr.bf16.mxu0 %v5165_v44  ;;  %5198 = vmatprep.subr.bf16.mxu1 %v5197_v45 }
  0x95   :  { %5168 = vmatpush3.bf16.msra.mxu0 %v5165_v44  ;;  %5200 = vmatpush3.bf16.msra.mxu1 %v5197_v45 }
  0x96   :  { %5170 = vmatprep.subr.bf16.mxu0 %v5169_v50  ;;  %5202 = vmatprep.subr.bf16.mxu1 %v5201_v51 }
  0x99   :  { %5172 = vmatpush3.bf16.msra.mxu0 %v5169_v50  ;;  %5204 = vmatpush3.bf16.msra.mxu1 %v5201_v51 }
  0x9a   :  { %5206 = vmatprep.subr.bf16.mxu0 %v5205_v54  ;;  %4714 = vmatprep.subr.mxu1 %v5745_v27 }
  0xfe   :  { %v151_v55 = vpop.permute.xlu0 %150  ;;  %v156_v56 = vpop.permute.xlu1 %155 }
  0xff   :  { %v162_v61 = vmul.f32 %v4268_v57, %v151_v55  ;;  %v163_v62 = vmul.f32 %v4268_v57, %v156_v56 }
 0x103   :  { %v171_v59 = vpop.permute.xlu1 %170  ;;  %v167_v60 = vpop.permute.xlu0 %166 }
 0x104   :  { %v178_v63 = vmul.f32 %v4269_v58, %v171_v59  ;;  %v177_v0 = vmul.f32 %v4269_v58, %v167_v60 }
 0x106   :  { %v180_v2 = vadd.f32 %v178_v63, %v163_v62  ;;  %v179_v3 = vadd.f32 %v177_v0, %v162_v61 }
 0x108   :  { %v5979_v6 = vadd.f32 %v4270_v1, %v180_v2  ;;  %v5981_v7 = vadd.f32 %v4270_v1, %v179_v3 }
 0x10a   :  { %4641 = vmatprep.mubr.f32.mxu0 %v5981_v7  ;;  %4676 = vmatprep.mubr.f32.mxu1 %v5981_v7 }
 0x10b   :  { %4642 = vmatmul.mubr.f32.vlgmr.msra.gmra.mrb[0].mxu0 %v5979_v6  ;;  %4677 = vmatmul.mubr.f32.vlgmr.msra.gmra.mrb[0].mxu1 %v5979_v6 }
 0x10c   :  { %5208 = vmatpush3.bf16.msra.mxu0 %v5205_v54  ;;  %4711 = vmatprep.mubr.f32.mxu0 %v5981_v7 }
 0x10d   :  { %5210 = vmatprep.subr.bf16.mxu0 %v5209_v8  ;;  %4716 = vmatprep.mubr.msk.f32.mxu1 %vm5746_vm0, %v5745_v27 }
 0x110   :  { %5212 = vmatpush3.bf16.msra.mxu0 %v5209_v8 }
 0x111   :  { %5214 = vmatprep.subr.bf16.mxu0 %v5213_v11 }
 0x114   :  { %5216 = vmatpush3.bf16.msra.mxu0 %v5213_v11 }
 0x115   :  { %5218 = vmatprep.subr.bf16.mxu0 %v5217_v14 }
 0x118   :  { %5220 = vmatpush3.bf16.msra.mxu0 %v5217_v14 }
 0x119   :  { %5222 = vmatprep.subr.bf16.mxu0 %v5221_v17 }
 0x11c   :  { %5224 = vmatpush3.bf16.msra.mxu0 %v5221_v17 }
 0x11d   :  { %5226 = vmatprep.subr.bf16.mxu0 %v5225_v20 }
 0x120   :  { %5228 = vmatpush3.bf16.msra.mxu0 %v5225_v20 }
 0x121   :  { %5230 = vmatprep.subr.bf16.mxu0 %v5229_v23 }
 0x124   :  { %5232 = vmatpush3.bf16.msra.mxu0 %v5229_v23 }
 0x125   :  { %5234 = vmatprep.subr.bf16.mxu0 %v5233_v26 }
 0x128   :  { %5236 = vmatpush3.bf16.msra.mxu0 %v5233_v26 }
 0x129   :  { %4764 = vmatprep.subr.mxu0 %v5745_v27 }
 0x12b   :  { %4712 = vmatmul.mubr.f32.vlgmr.msra.gmra.mrb[2].mxu0 %v5979_v6 }
 0x12c   :  { %4766 = vmatprep.mubr.msk.f32.mxu0 %vm5746_vm0, %v5745_v27 }
 0x1de   :  { %v4643_v29 = vpop.f32.mrb[0].mxu0  ;;  %v4678_v30 = vpop.f32.mrb[0].mxu1 }
 0x1df   :  { %v279_v31 = vpop.f32.mrb[1].mxu0  ;;  %v377_v32 = vpop.f32.mrb[1].mxu1  ;;  %v6008_v36 = vadd.f32 %v4678_v30, %v4272_v28  ;;  %v6016_v37 = vadd.f32 %v4643_v29, %v4271_v33 }
 0x1e0   :  { %v6001_v34 = vadd.f32 %v4272_v28, %v377_v32  ;;  %v6005_v35 = vadd.f32 %v4271_v33, %v279_v31 }
 0x1e2   :  { %4715 = vmatpush3.xpose.msk.msra.mxu1 %vm484_vm1, %v6001_v34 }
 0x1e3   :  { %4719 = vmatprep.subr.mxu1 %v5745_v27 }
 0x1e5   :  { %4717 = vmatmul.mubr.msk.f32.vlgmr.msra.gmra.mrb[2].mxu1 %vm484_vm1, %v6005_v35 }
 0x1e6   :  { %4720 = vmatpush3.xpose.msk.msra.mxu1 %vm484_vm1, %v6008_v36  ;;  %4721 = vmatprep.mubr.msk.f32.mxu1 %vm5746_vm0, %v5745_v27 }
 0x1e7   :  { %4724 = vmatprep.subr.mxu1 %v5745_v27 }
 0x1e9   :  { %4722 = vmatmul.mubr.msk.f32.vlgmr.msra.gmra.mrb[4].mxu1 %vm484_vm1, %v6016_v37 }
 0x1ea   :  { %4726 = vmatprep.mubr.msk.f32.mxu1 %vm5746_vm0, %v5745_v27 }
 0x1fe   :  { %v4713_v39 = vpop.f32.mrb[2].mxu0 }
 0x1ff   :  { %v6026_v40 = vadd.f32 %v4713_v39, %v4273_v38  ;;  %v475_v41 = vpop.f32.mrb[3].mxu0 }
 0x200   :  { %v6028_v42 = vadd.f32 %v4273_v38, %v475_v41 }
 0x202   :  { %4725 = vmatpush3.msra.mxu1 %v6028_v42 }
 0x203   :  { %4729 = vmatprep.subr.mxu1 %v5745_v27 }
 0x2b8   :  { %v557_v43 = vpop.f32.mrb[2].mxu1 }
 0x2b9   :  { %v4718_v44 = vpop.f32.mrb[3].mxu1  ;;  %v637_v45 = vsel %vm484_vm1, %v557_v43, -inf }
 0x2ba   :  { %638 = vmax.xlane.f32.xlu1 %v637_v45 }
 0x2bc   :  { %v633_v46 = vpop.f32.mrb[4].mxu1 }
 0x2bd   :  { %v4723_v47 = vpop.f32.mrb[5].mxu1  ;;  %v640_v48 = vsel %vm484_vm1, %v633_v46, -inf }
 0x2be   :  { %641 = vmax.xlane.f32.xlu0 %v640_v48 }
 0x2cb   :  { %805 = vrot.lane.b32.xlu1 %v6005_v35, %s5747_s19 }
 0x347   :  { %v639_v49 = vpop.xlane.xlu1 %638 }
 0x348   :  { %v643_v50 = vsub.f32 %v557_v43, %v639_v49 }
 0x34a   :  { %v645_v51 = vmul.f32 1.442695, %v643_v50 }
 0x34b   :  { %v642_v52 = vpop.xlane.xlu0 %641  ;;  %v806_v59 = vpop.permute.xlu1 %805 }
 0x34c   :  { %5499 = vpow2.f32 %v645_v51  ;;  %v644_v53 = vsub.f32 %v633_v46, %v642_v52 }
 0x34e   :  { %v647_v54 = vmul.f32 1.442695, %v644_v53 }
 0x350   :  { %5501 = vpow2.f32 %v647_v54 }
 0x356   :  { %v5500_v55 = vpop.eup %5499 }
 0x357   :  { %v649_v56 = vsel %vm484_vm1, %v5500_v55, 0.0 }
 0x358   :  { %650 = vadd.xlane.f32.xlu0 %v649_v56 }
 0x35a   :  { %v5502_v57 = vpop.eup %5501 }
 0x35b   :  { %v652_v58 = vsel %vm484_vm1, %v5502_v57, 0.0 }
 0x35c   :  { %653 = vadd.xlane.f32.xlu1 %v652_v58 }
 0x36d   :  { %885 = vrot.lane.b32.xlu1 %v6008_v36, %s5747_s19 }
 0x36e   :  { %807 = vrot.lane.b32.xlu0 %v6001_v34, %s5747_s19 }
 0x372   :  { %883 = vrot.lane.b32.xlu0 %v6016_v37, %s5747_s19 }
 0x3e5   :  { %v651_v60 = vpop.xlane.xlu0 %650 }
 0x3e6   :  { %5503 = vrcp.f32 %v651_v60 }
 0x3e9   :  { %v654_v61 = vpop.xlane.xlu1 %653  ;;  %v808_v2 = vpop.permute.xlu0 %807 }
 0x3ea   :  { %5505 = vrcp.f32 %v654_v61 }
 0x3ed   :  { %v886_v3 = vpop.permute.xlu1 %885  ;;  %v884_v4 = vpop.permute.xlu0 %883 }
 0x3f0   :  { %v5504_v62 = vpop.eup %5503 }
 0x3f1   :  { %v657_v63 = vmul.f32 %v5504_v62, %v5500_v55 }
 0x3f3   :  { %4727 = vmatmul.mubr.msk.f32.vlgmr.msra.gmra.mrb[6].mxu1 %vm484_vm1, %v657_v63 }
 0x3f4   :  { %v5506_v0 = vpop.eup %5505  ;;  %4730 = vmatpush3.msra.mxu1 %v6026_v40  ;;  %4731 = vmatprep.mubr.msk.f32.mxu1 %vm5746_vm0, %v5745_v27 }
 0x3f5   :  { %v658_v1 = vmul.f32 %v5506_v0, %v5502_v57  ;;  %4734 = vmatprep.subr.mxu1 %v5745_v27 }
 0x3f7   :  { %4732 = vmatmul.mubr.msk.f32.vlgmr.msra.gmra.mrb[8].mxu1 %vm484_vm1, %v658_v1 }
 0x3f8   :  { %4736 = vmatprep.mubr.msk.f32.mxu1 %vm5746_vm0, %v5745_v27 }
 0x3fb   :  { %4735 = vmatpush3.xpose.msk.msra.mxu1 %vm484_vm1, %v808_v2 }
 0x3fc   :  { %4739 = vmatprep.subr.mxu1 %v5745_v27 }
 0x3fe   :  { %4737 = vmatmul.mubr.msk.f32.vlgmr.msra.gmra.mrb[10].mxu1 %vm484_vm1, %v806_v59 }
 0x3ff   :  { %4740 = vmatpush3.xpose.msk.msra.mxu1 %vm484_vm1, %v886_v3  ;;  %4741 = vmatprep.mubr.msk.f32.mxu1 %vm5746_vm0, %v5745_v27 }
 0x400   :  { %4744 = vmatprep.subr.mxu1 %v5745_v27 }
 0x402   :  { %4742 = vmatmul.mubr.msk.f32.vlgmr.msra.gmra.mrb[12].mxu1 %vm484_vm1, %v884_v4 }
 0x403   :  { %4746 = vmatprep.mubr.msk.f32.mxu1 %vm5746_vm0, %v5745_v27 }
 0x4c6   :  { %v6062_v5 = vpop.f32.mrb[6].mxu1 }
 0x4c7   :  { %v4728_v8 = vpop.f32.mrb[7].mxu1 }
 0x4ca   :  { %v6064_v9 = vpop.f32.mrb[8].mxu1 }
 0x4cb   :  { %v4733_v10 = vpop.f32.mrb[9].mxu1 }
 0x4d1   :  { %v879_v11 = vpop.f32.mrb[10].mxu1 }
 0x4d2   :  { %v4738_v12 = vpop.f32.mrb[11].mxu1  ;;  %v961_v13 = vsel %vm484_vm1, %v879_v11, -inf }
 0x4d3   :  { %962 = vmax.xlane.f32.xlu1 %v961_v13 }
 0x4d5   :  { %v957_v14 = vpop.f32.mrb[12].mxu1 }
 0x4d6   :  { %v4743_v15 = vpop.f32.mrb[13].mxu1  ;;  %v964_v16 = vsel %vm484_vm1, %v957_v14, -inf }
 0x4d7   :  { %965 = vmax.xlane.f32.xlu0 %v964_v16 }
 0x4e4   :  { %1061 = vrot.lane.b32.xlu1 %v6026_v40, %s5747_s19 }
 0x4e8   :  { %1139 = vrot.lane.b32.xlu1 %v6001_v34, %s5748_s0 }
 0x560   :  { %v963_v17 = vpop.xlane.xlu1 %962 }
 0x561   :  { %v967_v18 = vsub.f32 %v879_v11, %v963_v17 }
 0x563   :  { %v969_v19 = vmul.f32 1.442695, %v967_v18 }
 0x564   :  { %v966_v20 = vpop.xlane.xlu0 %965  ;;  %v1062_v28 = vpop.permute.xlu1 %1061 }
 0x565   :  { %5507 = vpow2.f32 %v969_v19  ;;  %v968_v21 = vsub.f32 %v957_v14, %v966_v20 }
 0x567   :  { %v971_v22 = vmul.f32 1.442695, %v968_v21 }
 0x568   :  { %v1140_v29 = vpop.permute.xlu1 %1139 }
 0x569   :  { %5509 = vpow2.f32 %v971_v22 }
 0x56f   :  { %v5508_v23 = vpop.eup %5507 }
 0x570   :  { %v973_v24 = vsel %vm484_vm1, %v5508_v23, 0.0 }
 0x571   :  { %974 = vadd.xlane.f32.xlu0 %v973_v24 }
 0x573   :  { %v5510_v25 = vpop.eup %5509 }
 0x574   :  { %v976_v26 = vsel %vm484_vm1, %v5510_v25, 0.0 }
 0x575   :  { %977 = vadd.xlane.f32.xlu1 %v976_v26 }
 0x586   :  { %1217 = vrot.lane.b32.xlu1 %v6008_v36, %s5748_s0 }
 0x587   :  { %984 = vrot.lane.b32.xlu0 %v6028_v42, %s5747_s19 }
 0x58b   :  { %1137 = vrot.lane.b32.xlu0 %v6005_v35, %s5748_s0 }
 0x58f   :  { %1215 = vrot.lane.b32.xlu0 %v6016_v37, %s5748_s0 }
 0x5fe   :  { %v975_v30 = vpop.xlane.xlu0 %974 }
 0x5ff   :  { %5511 = vrcp.f32 %v975_v30 }
 0x602   :  { %v978_v31 = vpop.xlane.xlu1 %977  ;;  %v985_v32 = vpop.permute.xlu0 %984 }
 0x603   :  { %5513 = vrcp.f32 %v978_v31  ;;  %4745 = vmatpush3.msra.mxu1 %v985_v32 }
 0x604   :  { %4749 = vmatprep.subr.mxu1 %v5745_v27 }
 0x606   :  { %v1138_v43 = vpop.permute.xlu0 %1137  ;;  %v1218_v44 = vpop.permute.xlu1 %1217 }
 0x609   :  { %v5512_v33 = vpop.eup %5511 }
 0x60a   :  { %v981_v38 = vmul.f32 %v5512_v33, %v5508_v23  ;;  %v1216_v45 = vpop.permute.xlu0 %1215 }
 0x60c   :  { %4747 = vmatmul.mubr.msk.f32.vlgmr.msra.gmra.mrb[14].mxu1 %vm484_vm1, %v981_v38 }
 0x60d   :  { %v5514_v39 = vpop.eup %5513  ;;  %4750 = vmatpush3.msra.mxu1 %v1062_v28  ;;  %4751 = vmatprep.mubr.msk.f32.mxu1 %vm5746_vm0, %v5745_v27 }
 0x60e   :  { %v982_v41 = vmul.f32 %v5514_v39, %v5510_v25  ;;  %4754 = vmatprep.subr.mxu1 %v5745_v27 }
 0x610   :  { %4752 = vmatmul.mubr.msk.f32.vlgmr.msra.gmra.mrb[16].mxu1 %vm484_vm1, %v982_v41 }
 0x611   :  { %4756 = vmatprep.mubr.msk.f32.mxu1 %vm5746_vm0, %v5745_v27 }
 0x614   :  { %4755 = vmatpush3.xpose.msk.msra.mxu1 %vm484_vm1, %v1140_v29 }
 0x615   :  { %4759 = vmatprep.subr.mxu1 %v5745_v27 }
 0x617   :  { %4757 = vmatmul.mubr.msk.f32.vlgmr.msra.gmra.mrb[18].mxu1 %vm484_vm1, %v1138_v43 }
 0x618   :  { %4760 = vmatpush3.xpose.msk.msra.mxu1 %vm484_vm1, %v1218_v44  ;;  %4761 = vmatprep.mubr.msk.f32.mxu1 %vm5746_vm0, %v5745_v27 }
 0x619   :  { %4769 = vmatprep.subr.mxu1 %v5745_v27 }
 0x61b   :  { %4762 = vmatmul.mubr.msk.f32.vlgmr.msra.gmra.mrb[20].mxu1 %vm484_vm1, %v1216_v45 }
 0x61c   :  { %4771 = vmatprep.mubr.msk.f32.mxu1 %vm5746_vm0, %v5745_v27 }
 0x6df   :  { %v6100_v46 = vpop.f32.mrb[14].mxu1 }
 0x6e0   :  { %v4748_v47 = vpop.f32.mrb[15].mxu1 }
 0x6e1   :  { %v1829_v47 = vld [vmem:[#allocation8] sm:$0xff] }
 0x6e3   :  { %v6102_v48 = vpop.f32.mrb[16].mxu1 }
 0x6e4   :  { %v4753_v49 = vpop.f32.mrb[17].mxu1 }
 0x6ea   :  { %v1211_v50 = vpop.f32.mrb[18].mxu1 }
 0x6eb   :  { %v4758_v51 = vpop.f32.mrb[19].mxu1  ;;  %v1293_v52 = vsel %vm484_vm1, %v1211_v50, -inf }
 0x6ec   :  { %1294 = vmax.xlane.f32.xlu1 %v1293_v52  ;;  %v1832_v51 = vld [vmem:[#allocation8 + $0x18] sm:$0xff] }
 0x6ee   :  { %v1289_v53 = vpop.f32.mrb[20].mxu1 }
 0x6ef   :  { %v4763_v54 = vpop.f32.mrb[21].mxu1  ;;  %v1296_v55 = vsel %vm484_vm1, %v1289_v53, -inf }
 0x6f0   :  { %1297 = vmax.xlane.f32.xlu0 %v1296_v55 }
 0x6fd   :  { %1391 = vrot.lane.b32.xlu1 %v6026_v40, %s5748_s0 }
 0x701   :  { %1469 = vrot.lane.b32.xlu1 %v6001_v34, %s5749_s1 }
 0x706   :  { %1315 = vrot.lane.b32.xlu0 %v6028_v42, %s5748_s0 }
 0x779   :  { %v1295_v56 = vpop.xlane.xlu1 %1294 }
 0x77a   :  { %v1299_v57 = vsub.f32 %v1211_v50, %v1295_v56  ;;  %v1831_v50 = vld [vmem:[#allocation8 + $0x10] sm:$0xff] }
 0x77b   :  { %v5241_v52 = vpack.c.bf16 %v1832_v51, %v1831_v50  ;;  %v2080_v50 = vld [vmem:[#allocation11 + $0x60] sm:$0xff]  ;;  %v2081_v51 = vld [vmem:[#allocation11 + $0x68] sm:$0xff] }
 0x77c   :  { %v1301_v58 = vmul.f32 1.442695, %v1299_v57 }
 0x77d   :  { %v1392_v59 = vpop.permute.xlu1 %1391  ;;  %v1298_v60 = vpop.xlane.xlu0 %1297 }
 0x77e   :  { %5515 = vpow2.f32 %v1301_v58  ;;  %v1300_v61 = vsub.f32 %v1289_v53, %v1298_v60  ;;  %4770 = vmatpush3.msra.mxu1 %v1392_v59 }
 0x77f   :  { %4779 = vmatprep.subr.mxu1 %v5745_v27 }
 0x780   :  { %v1303_v62 = vmul.f32 1.442695, %v1300_v61 }
 0x781   :  { %v1316_v63 = vpop.permute.xlu0 %1315  ;;  %v1470_v3 = vpop.permute.xlu1 %1469 }
 0x782   :  { %5517 = vpow2.f32 %v1303_v62  ;;  %4765 = vmatpush3.msra.mxu0 %v1316_v63 }
 0x783   :  { %4774 = vmatprep.subr.mxu0 %v5745_v27 }
 0x788   :  { %v5516_v34 = vpop.eup %5515 }
 0x789   :  { %v1305_v0 = vsel %vm484_vm1, %v5516_v34, 0.0 }
 0x78a   :  { %1306 = vadd.xlane.f32.xlu0 %v1305_v0 }
 0x78c   :  { %v5518_v1 = vpop.eup %5517 }
 0x78d   :  { %v1308_v2 = vsel %vm484_vm1, %v5518_v1, 0.0 }
 0x78e   :  { %1309 = vadd.xlane.f32.xlu1 %v1308_v2 }
 0x79f   :  { %1467 = vrot.lane.b32.xlu1 %v6005_v35, %s5749_s1 }
 0x7a0   :  { %1547 = vrot.lane.b32.xlu0 %v6008_v36, %s5749_s1 }
 0x7a4   :  { %1545 = vrot.lane.b32.xlu0 %v6016_v37, %s5749_s1 }
 0x817   :  { %v1307_v4 = vpop.xlane.xlu0 %1306 }
 0x818   :  { %5519 = vrcp.f32 %v1307_v4  ;;  %v1969_v4 = vld [vmem:[#allocation10 + $0x8] sm:$0xff] }
 0x81b   :  { %v1310_v8 = vpop.xlane.xlu1 %1309  ;;  %v1548_v13 = vpop.permute.xlu0 %1547 }
 0x81c   :  { %5521 = vrcp.f32 %v1310_v8 }
 0x81f   :  { %v1468_v36 = vpop.permute.xlu1 %1467  ;;  %v1546_v37 = vpop.permute.xlu0 %1545 }
 0x822   :  { %v5520_v10 = vpop.eup %5519 }
 0x823   :  { %v1313_v11 = vmul.f32 %v5520_v10, %v5516_v34  ;;  %v1970_v10 = vld [vmem:[#allocation10 + $0x10] sm:$0xff] }
 0x825   :  { %4767 = vmatmul.mubr.msk.f32.vlgmr.msra.gmra.mrb[4].mxu0 %vm484_vm1, %v1313_v11  ;;  %v1971_v11 = vld [vmem:[#allocation10 + $0x18] sm:$0xff] }
 0x826   :  { %v5522_v12 = vpop.eup %5521  ;;  %4775 = vmatpush3.xpose.msk.msra.mxu0 %vm484_vm1, %v1470_v3  ;;  %4776 = vmatprep.mubr.msk.f32.mxu0 %vm5746_vm0, %v5745_v27 }
 0x827   :  { %v1314_v35 = vmul.f32 %v5522_v12, %v5518_v1  ;;  %4784 = vmatprep.subr.mxu0 %v5745_v27  ;;  %v5249_v12 = vpack.c.bf16 %v1971_v11, %v1970_v10 }
 0x829   :  { %4772 = vmatmul.mubr.msk.f32.vlgmr.msra.gmra.mrb[22].mxu1 %vm484_vm1, %v1314_v35  ;;  %4777 = vmatmul.mubr.msk.f32.vlgmr.msra.gmra.mrb[6].mxu0 %vm484_vm1, %v1468_v36  ;;  %v1973_v35 = vld [vmem:[#allocation10 + $0x28] sm:$0xff]  ;;  %v1974_v36 = vld [vmem:[#allocation10 + $0x30] sm:$0xff] }
 0x82a   :  { %4780 = vmatpush3.xpose.msk.msra.mxu1 %vm484_vm1, %v1548_v13  ;;  %4781 = vmatprep.mubr.msk.f32.mxu1 %vm5746_vm0, %v5745_v27  ;;  %v1972_v13 = vld [vmem:[#allocation10 + $0x20] sm:$0xff] }
 0x82b   :  { %4789 = vmatprep.subr.mxu1 %v5745_v27  ;;  %4786 = vmatprep.mubr.msk.f32.mxu0 %vm5746_vm0, %v5745_v27 }
 0x82d   :  { %4782 = vmatmul.mubr.msk.f32.vlgmr.msra.gmra.mrb[24].mxu1 %vm484_vm1, %v1546_v37  ;;  %v1975_v37 = vld [vmem:[#allocation10 + $0x38] sm:$0xff] }
 0x82e   :  { %4791 = vmatprep.mubr.msk.f32.mxu1 %vm5746_vm0, %v5745_v27 }
 0x8f8   :  { %v1387_v14 = vpop.f32.mrb[4].mxu0 }
 0x8f9   :  { %v4768_v15 = vpop.f32.mrb[5].mxu0 }
 0x8fa   :  { %v1976_v15 = vld [vmem:[#allocation10 + $0x40] sm:$0xff] }
 0x8fc   :  { %v1463_v16 = vpop.f32.mrb[22].mxu1  ;;  %v1541_v17 = vpop.f32.mrb[6].mxu0 }
 0x8fd   :  { %v4773_v18 = vpop.f32.mrb[23].mxu1  ;;  %v4778_v19 = vpop.f32.mrb[7].mxu0  ;;  %v1623_v20 = vsel %vm484_vm1, %v1541_v17, -inf }
 0x8fe   :  { %1624 = vmax.xlane.f32.xlu1 %v1623_v20  ;;  %v1979_v19 = vld [vmem:[#allocation10 + $0x58] sm:$0xff] }
 0x900   :  { %v1619_v21 = vpop.f32.mrb[24].mxu1 }
 0x901   :  { %v4783_v22 = vpop.f32.mrb[25].mxu1  ;;  %v1626_v23 = vsel %vm484_vm1, %v1619_v21, -inf }
 0x902   :  { %1627 = vmax.xlane.f32.xlu0 %v1626_v23  ;;  %v1981_v22 = vld [vmem:[#allocation10 + $0x68] sm:$0xff] }
 0x98b   :  { %v1625_v24 = vpop.xlane.xlu1 %1624 }
 0x98c   :  { %v1629_v25 = vsub.f32 %v1541_v17, %v1625_v24  ;;  %v1978_v17 = vld [vmem:[#allocation10 + $0x50] sm:$0xff] }
 0x98d   :  { %v5265_v20 = vpack.c.bf16 %v1979_v19, %v1978_v17  ;;  %v1982_v24 = vld [vmem:[#allocation10 + $0x70] sm:$0xff] }
 0x98e   :  { %v1631_v26 = vmul.f32 1.442695, %v1629_v25  ;;  %v1983_v25 = vld [vmem:[#allocation10 + $0x78] sm:$0xff]  ;;  %v4302_v19 = vld [vmem:[%s6434_s12] ss:$0 sm:$0xff] }
 0x98f   :  { %v1628_v28 = vpop.xlane.xlu0 %1627 }
 0x990   :  { %5523 = vpow2.f32 %v1631_v26  ;;  %v1630_v29 = vsub.f32 %v1619_v21, %v1628_v28  ;;  %v1980_v21 = vld [vmem:[#allocation10 + $0x60] sm:$0xff]  ;;  %v5273_v26 = vpack.c.bf16 %v1983_v25, %v1982_v24  ;;  %v2082_v24 = vld [vmem:[#allocation11 + $0x70] sm:$0xff]  ;;  %v2083_v25 = vld [vmem:[#allocation11 + $0x78] sm:$0xff] }
 0x991   :  { %v5269_v23 = vpack.c.bf16 %v1981_v22, %v1980_v21  ;;  %v2068_v28 = vld [vmem:[#allocation11] sm:$0xff] }
 0x992   :  { %v1633_v30 = vmul.f32 1.442695, %v1630_v29  ;;  %v2069_v29 = vld [vmem:[#allocation11 + $0x8] sm:$0xff] }
 0x994   :  { %5525 = vpow2.f32 %v1633_v30  ;;  %v2070_v30 = vld [vmem:[#allocation11 + $0x10] sm:$0xff] }
 0x99a   :  { %v5524_v31 = vpop.eup %5523 }
 0x99b   :  { %v1635_v32 = vsel %vm484_vm1, %v5524_v31, 0.0 }
 0x99c   :  { %1636 = vadd.xlane.f32.xlu0 %v1635_v32  ;;  %v2071_v32 = vld [vmem:[#allocation11 + $0x18] sm:$0xff] }
 0x99e   :  { %v5526_v33 = vpop.eup %5525 }
 0x99f   :  { %v1638_v38 = vsel %vm484_vm1, %v5526_v33, 0.0 }
 0x9a0   :  { %1639 = vadd.xlane.f32.xlu1 %v1638_v38  ;;  %v2072_v38 = vld [vmem:[#allocation11 + $0x20] sm:$0xff] }
 0x9b1   :  { %1721 = vrot.lane.b32.xlu1 %v6026_v40, %s5749_s1 }
 0x9b2   :  { %1645 = vrot.lane.b32.xlu0 %v6028_v42, %s5749_s1 }
 0x9b5   :  { %1799 = vrot.lane.b32.xlu1 %v6100_v46, %s5738_s28 }
 0x9b6   :  { %1801 = vrot.lane.b32.xlu0 %v6102_v48, %s5738_s28  ;;  %v1830_v48 = vld [vmem:[#allocation8 + $0x8] sm:$0xff] }
 0x9b7   :  { %v5237_v49 = vpack.c.bf16 %v1830_v48, %v1829_v47  ;;  %v2078_v47 = vld [vmem:[#allocation11 + $0x50] sm:$0xff]  ;;  %v2079_v48 = vld [vmem:[#allocation11 + $0x58] sm:$0xff] }
 0x9b9   :  { %1807 = vrot.lane.b32.xlu1 %v1387_v14, %s5750_s22  ;;  %v5257_v14 = vpack.c.bf16 %v1975_v37, %v1974_v36 }
 0x9ba   :  { %1809 = vrot.lane.b32.xlu0 %v1463_v16, %s5750_s22  ;;  %v1977_v16 = vld [vmem:[#allocation10 + $0x48] sm:$0xff] }
 0x9bb   :  { %v5261_v18 = vpack.c.bf16 %v1977_v16, %v1976_v15  ;;  %v4301_v16 = vld [vmem:[%s6433_s11] ss:$0 sm:$0xff] }
 0xa29   :  { %v1637_v39 = vpop.xlane.xlu0 %1636 }
 0xa2a   :  { %5527 = vrcp.f32 %v1637_v39  ;;  %v2073_v39 = vld [vmem:[#allocation11 + $0x28] sm:$0xff] }
 0xa2d   :  { %v1640_v41 = vpop.xlane.xlu1 %1639  ;;  %v1646_v43 = vpop.permute.xlu0 %1645 }
 0xa2e   :  { %5529 = vrcp.f32 %v1640_v41  ;;  %4785 = vmatpush3.msra.mxu0 %v1646_v43  ;;  %v5285_v41 = vpack.c.bf16 %v2073_v39, %v2072_v38  ;;  %v2074_v43 = vld [vmem:[#allocation11 + $0x30] sm:$0xff]  ;;  %v2213_v39 = vld [vmem:[#allocation2 + $0x80] sm:$0xff] }
 0xa2f   :  { %5238 = vmatprep.subr.bf16.mxu0 %v5237_v49 }
 0xa31   :  { %v1722_v40 = vpop.permute.xlu1 %1721  ;;  %v1802_v58 = vpop.permute.xlu0 %1801 }
 0xa32   :  { %4790 = vmatpush3.msra.mxu1 %v1722_v40  ;;  %v1822_v0 = vsel %vm484_vm1, %v6064_v9, %v1802_v58  ;;  %v5253_v9 = vpack.c.bf16 %v1973_v35, %v1972_v13  ;;  %v2075_v40 = vld [vmem:[#allocation11 + $0x38] sm:$0xff] }
 0xa34   :  { %v5528_v42 = vpop.eup %5527 }
 0xa35   :  { %v1643_v44 = vmul.f32 %v5528_v42, %v5524_v31  ;;  %v1800_v57 = vpop.permute.xlu1 %1799  ;;  %v1810_v61 = vpop.permute.xlu0 %1809  ;;  %v5277_v31 = vpack.c.bf16 %v2069_v29, %v2068_v28  ;;  %v5289_v42 = vpack.c.bf16 %v2075_v40, %v2074_v43  ;;  %v4303_v28 = vld [vmem:[%s6436_s14] ss:$0 sm:$0xff]  ;;  %v2313_v40 = vld [vmem:[#allocation5 + $0x80] sm:$0xff] }
 0xa36   :  { %v1821_v60 = vsel %vm484_vm1, %v6062_v5, %v1800_v57  ;;  %v1825_v1 = vsel %vm1823_vm3, %v1822_v0, %v1810_v61  ;;  %v1968_v5 = vld [vmem:[#allocation10] sm:$0xff] }
 0xa37   :  { %4787 = vmatmul.mubr.msk.f32.vlgmr.msra.gmra.mrb[8].mxu0 %vm484_vm1, %v1643_v44  ;;  %v5245_v8 = vpack.c.bf16 %v1969_v4, %v1968_v5  ;;  %v2076_v44 = vld [vmem:[#allocation11 + $0x40] sm:$0xff] }
 0xa38   :  { %v5530_v45 = vpop.eup %5529  ;;  %5240 = vmatpush3.bf16.msra.mxu0 %v5237_v49  ;;  %v5297_v49 = vpack.c.bf16 %v2079_v48, %v2078_v47  ;;  %v2315_v48 = vld [vmem:[#allocation5 + $0x90] sm:$0xff] }
 0xa39   :  { %v1644_v46 = vmul.f32 %v5530_v45, %v5526_v33  ;;  %5242 = vmatprep.subr.bf16.mxu0 %v5241_v52  ;;  %v1808_v59 = vpop.permute.xlu1 %1807  ;;  %5246 = vmatprep.subr.bf16.mxu1 %v5245_v8  ;;  %v5281_v33 = vpack.c.bf16 %v2071_v32, %v2070_v30  ;;  %v2077_v45 = vld [vmem:[#allocation11 + $0x48] sm:$0xff] }
 0xa3a   :  { %v1824_v62 = vsel %vm1823_vm3, %v1821_v60, %v1808_v59 }
 0xa3b   :  { %4792 = vmatmul.mubr.msk.f32.vlgmr.msra.gmra.mrb[26].mxu1 %vm484_vm1, %v1644_v46  ;;  %v5293_v46 = vpack.c.bf16 %v2077_v45, %v2076_v44  ;;  %v2215_v45 = vld [vmem:[#allocation2 + $0x90] sm:$0xff] }
 0xa3c   :  { %5244 = vmatpush3.bf16.msra.mxu0 %v5241_v52  ;;  %5248 = vmatpush3.bf16.msra.mxu1 %v5245_v8  ;;  %v5301_v52 = vpack.c.bf16 %v2081_v51, %v2080_v50  ;;  %v2217_v51 = vld [vmem:[#allocation2 + $0xa0] sm:$0xff] }
 0xa3d   :  { %5250 = vmatprep.subr.bf16.mxu1 %v5249_v12  ;;  %5278 = vmatprep.subr.bf16.mxu0 %v5277_v31 }
 0xa40   :  { %5252 = vmatpush3.bf16.msra.mxu1 %v5249_v12 }
 0xa41   :  { %5254 = vmatprep.subr.bf16.mxu1 %v5253_v9 }
 0xa44   :  { %5256 = vmatpush3.bf16.msra.mxu1 %v5253_v9 }
 0xa45   :  { %5258 = vmatprep.subr.bf16.mxu1 %v5257_v14 }
 0xa48   :  { %5260 = vmatpush3.bf16.msra.mxu1 %v5257_v14 }
 0xa49   :  { %5262 = vmatprep.subr.bf16.mxu1 %v5261_v18 }
 0xa4c   :  { %5264 = vmatpush3.bf16.msra.mxu1 %v5261_v18 }
 0xa4d   :  { %5266 = vmatprep.subr.bf16.mxu1 %v5265_v20 }
 0xa50   :  { %5268 = vmatpush3.bf16.msra.mxu1 %v5265_v20 }
 0xa51   :  { %5270 = vmatprep.subr.bf16.mxu1 %v5269_v23 }
 0xa54   :  { %5272 = vmatpush3.bf16.msra.mxu1 %v5269_v23 }
 0xa55   :  { %5274 = vmatprep.subr.bf16.mxu1 %v5273_v26 }
 0xa58   :  { %5276 = vmatpush3.bf16.msra.mxu1 %v5273_v26  ;;  %v5305_v26 = vpack.c.bf16 %v2083_v25, %v2082_v24  ;;  %v4304_v24 = vld [vmem:[%s6438_s16] ss:$0 sm:$0xff] }
 0xb0a   :  { %v1717_v53 = vpop.f32.mrb[8].mxu0 }
 0xb0b   :  { %1815 = vrot.lane.b32.xlu1 %v1717_v53, %s5751_s7  ;;  %v4788_v54 = vpop.f32.mrb[9].mxu0  ;;  %v4298_v53 = vld [vmem:[%s6432_s10] ss:$0 sm:$0xff] }
 0xb0e   :  { %v1793_v55 = vpop.f32.mrb[26].mxu1 }
 0xb0f   :  { %1817 = vrot.lane.b32.xlu0 %v1793_v55, %s5751_s7  ;;  %v4793_v56 = vpop.f32.mrb[27].mxu1 }
 0xb7d   :  { %v1816_v63 = vpop.permute.xlu1 %1815 }
 0xb7e   :  { %v1827_v34 = vsel %vm1826_vm2, %v1824_v62, %v1816_v63 }
 0xb7f   :  { %4802 = vmatprep.mubr.msk.f32.mxu0 %vm1840_vm4, %v1827_v34 }
 0xb81   :  { %v1818_v2 = vpop.permute.xlu0 %1817 }
 0xb82   :  { %v1828_v3 = vsel %vm1826_vm2, %v1825_v1, %v1818_v2 }
 0xb83   :  { %4803 = vmatmul.mubr.msk.f32.vlgmr.msra.gmra.mrb[10].mxu0 %vm1840_vm4, %v1828_v3 }
 0xb84   :  { %5280 = vmatpush3.bf16.msra.mxu0 %v5277_v31 }
 0xb85   :  { %5282 = vmatprep.subr.bf16.mxu0 %v5281_v33 }
 0xb88   :  { %5284 = vmatpush3.bf16.msra.mxu0 %v5281_v33 }
 0xb89   :  { %5286 = vmatprep.subr.bf16.mxu0 %v5285_v41 }
 0xb8c   :  { %5288 = vmatpush3.bf16.msra.mxu0 %v5285_v41  ;;  %v2214_v41 = vld [vmem:[#allocation2 + $0x88] sm:$0xff] }
 0xb8d   :  { %5290 = vmatprep.subr.bf16.mxu0 %v5289_v42  ;;  %v5309_v43 = vpack.c.bf16 %v2214_v41, %v2213_v39 }
 0xb8f   :  { %5310 = vmatprep.subr.bf16.mxu1 %v5309_v43 }
 0xb90   :  { %5292 = vmatpush3.bf16.msra.mxu0 %v5289_v42  ;;  %v2314_v42 = vld [vmem:[#allocation5 + $0x88] sm:$0xff] }
 0xb91   :  { %5294 = vmatprep.subr.bf16.mxu0 %v5293_v46  ;;  %v5341_v44 = vpack.c.bf16 %v2314_v42, %v2313_v40 }
 0xb94   :  { %5296 = vmatpush3.bf16.msra.mxu0 %v5293_v46  ;;  %v2216_v46 = vld [vmem:[#allocation2 + $0x98] sm:$0xff] }
 0xb95   :  { %5298 = vmatprep.subr.bf16.mxu0 %v5297_v49  ;;  %v5313_v47 = vpack.c.bf16 %v2216_v46, %v2215_v45 }
 0xb98   :  { %5300 = vmatpush3.bf16.msra.mxu0 %v5297_v49  ;;  %v2316_v49 = vld [vmem:[#allocation5 + $0x98] sm:$0xff] }
 0xb99   :  { %5302 = vmatprep.subr.bf16.mxu0 %v5301_v52  ;;  %v5345_v50 = vpack.c.bf16 %v2316_v49, %v2315_v48 }
 0xb9c   :  { %5304 = vmatpush3.bf16.msra.mxu0 %v5301_v52  ;;  %v2218_v52 = vld [vmem:[#allocation2 + $0xa8] sm:$0xff] }
 0xb9d   :  { %5306 = vmatprep.subr.bf16.mxu0 %v5305_v26 }
 0xba0   :  { %5308 = vmatpush3.bf16.msra.mxu0 %v5305_v26 }
 0xba1   :  { %5342 = vmatprep.subr.bf16.mxu0 %v5341_v44 }
 0xc56   :  { %v4804_v54 = vpop.f32.mrb[10].mxu0 }
 0xc57   :  { %v1919_v55 = vadd.f32 %v4804_v54, %v4298_v53  ;;  %v1913_v56 = vpop.f32.mrb[11].mxu0  ;;  %v2317_v54 = vld [vmem:[#allocation5 + $0xa0] sm:$0xff] }
 0xc58   :  { %v1914_v57 = vadd.f32 %v4298_v53, %v1913_v56  ;;  %v5317_v53 = vpack.c.bf16 %v2218_v52, %v2217_v51 }
 0xc59   :  { %v1923_v58 = vadd.f32 %v1919_v55, %v5979_v6  ;;  %v2318_v55 = vld [vmem:[#allocation5 + $0xa8] sm:$0xff] }
 0xc5a   :  { %v1922_v59 = vadd.f32 %v1914_v57, %v5981_v7  ;;  %v5349_v56 = vpack.c.bf16 %v2318_v55, %v2317_v54  ;;  %v2219_v57 = vld [vmem:[#allocation2 + $0xb0] sm:$0xff] }
 0xc5b   :  { %v1935_v60 = vmul.f32 %v1923_v58, %v1923_v58 }
 0xc5c   :  { %v1926_v61 = vadd.f32 %v1923_v58, %v1922_v59  ;;  %v1934_v62 = vmul.f32 %v1922_v59, %v1922_v59 }
 0xc5e   :  { %v1927_v63 = vrot.slane %v1926_v61, 4  ;;  %v1936_v34 = vadd.f32 %v1935_v60, %v1934_v62  ;;  %v2319_v60 = vld [vmem:[#allocation5 + $0xb0] sm:$0xff] }
 0xc60   :  { %v1928_v0 = vadd.f32 %v1927_v63, %v1926_v61  ;;  %v1937_v1 = vrot.slane %v1936_v34, 4  ;;  %v2320_v61 = vld [vmem:[#allocation5 + $0xb8] sm:$0xff]  ;;  %v2221_v63 = vld [vmem:[#allocation2 + $0xc0] sm:$0xff] }
 0xc61   :  { %v5353_v62 = vpack.c.bf16 %v2320_v61, %v2319_v60  ;;  %v4306_v61 = vld [vmem:[%s6440_s18] ss:$0 sm:$0xff] }
 0xc62   :  { %v1929_v2 = vrot.slane %v1928_v0, 2  ;;  %v1938_v3 = vadd.f32 %v1937_v1, %v1936_v34  ;;  %v2222_v34 = vld [vmem:[#allocation2 + $0xc8] sm:$0xff]  ;;  %v2321_v1 = vld [vmem:[#allocation5 + $0xc0] sm:$0xff] }
 0xc64   :  { %v1930_v5 = vadd.f32 %v1929_v2, %v1928_v0  ;;  %v1939_v4 = vrot.slane %v1938_v3, 2  ;;  %v5325_v0 = vpack.c.bf16 %v2222_v34, %v2221_v63  ;;  %v2322_v2 = vld [vmem:[#allocation5 + $0xc8] sm:$0xff]  ;;  %v2415_v34 = vld [vmem:[#allocation7 + $0x90] sm:$0xff] }
 0xc66   :  { %v1931_v8 = vrot.slane %v1930_v5, 1  ;;  %v1940_v10 = vadd.f32 %v1939_v4, %v1938_v3  ;;  %v5357_v3 = vpack.c.bf16 %v2322_v2, %v2321_v1  ;;  %v2224_v4 = vld [vmem:[#allocation2 + $0xd8] sm:$0xff] }
 0xc68   :  { %v1932_v11 = vadd.f32 %v1931_v8, %v1930_v5  ;;  %v1941_v12 = vrot.slane %v1940_v10, 1  ;;  %v2223_v5 = vld [vmem:[#allocation2 + $0xd0] sm:$0xff] }
 0xc69   :  { %v5329_v8 = vpack.c.bf16 %v2224_v4, %v2223_v5  ;;  %v2417_v5 = vld [vmem:[#allocation7 + $0xa0] sm:$0xff]  ;;  %v2418_v4 = vld [vmem:[#allocation7 + $0xa8] sm:$0xff] }
 0xc6a   :  { %v1933_v13 = vmul.f32 0.0625, %v1932_v11  ;;  %v1942_v35 = vadd.f32 %v1941_v12, %v1940_v10  ;;  %v2323_v10 = vld [vmem:[#allocation5 + $0xd0] sm:$0xff]  ;;  %v2324_v11 = vld [vmem:[#allocation5 + $0xd8] sm:$0xff] }
 0xc6b   :  { %v5361_v12 = vpack.c.bf16 %v2324_v11, %v2323_v10  ;;  %v2419_v10 = vld [vmem:[#allocation7 + $0xb0] sm:$0xff]  ;;  %v2420_v11 = vld [vmem:[#allocation7 + $0xb8] sm:$0xff] }
 0xc6c   :  { %v1943_v6 = vmul.f32 0.0625, %v1942_v35  ;;  %v1944_v9 = vmul.f32 %v1933_v13, %v1933_v13  ;;  %v1946_v7 = vsub.f32 %v1922_v59, %v1933_v13  ;;  %v1947_v36 = vsub.f32 %v1923_v58, %v1933_v13  ;;  %v2220_v58 = vld [vmem:[#allocation2 + $0xb8] sm:$0xff]  ;;  %v2225_v13 = vld [vmem:[#allocation2 + $0xe0] sm:$0xff]  ;;  %v2226_v35 = vld [vmem:[#allocation2 + $0xe8] sm:$0xff] }
 0xc6d   :  { %v5321_v59 = vpack.c.bf16 %v2220_v58, %v2219_v57  ;;  %v4305_v58 = vld [vmem:[%s6439_s17] ss:$0 sm:$0xff] }
 0xc6e   :  { %v1945_v37 = vsub.f32 %v1943_v6, %v1944_v9  ;;  %v5333_v6 = vpack.c.bf16 %v2226_v35, %v2225_v13  ;;  %v2325_v9 = vld [vmem:[#allocation5 + $0xe0] sm:$0xff]  ;;  %v2422_v35 = vld [vmem:[#allocation7 + $0xc8] sm:$0xff] }
 0xc6f   :  { %v2421_v13 = vld [vmem:[#allocation7 + $0xc0] sm:$0xff] }
 0xc70   :  { %v1948_v14 = vadd.f32 1e-05, %v1945_v37  ;;  %v2227_v37 = vld [vmem:[#allocation2 + $0xf0] sm:$0xff] }
 0xc72   :  { %5531 = vrsqrt.f32 %v1948_v14  ;;  %v2228_v14 = vld [vmem:[#allocation2 + $0xf8] sm:$0xff] }
 0xc7c   :  { %v5532_v15 = vpop.eup %5531 }
 0xc7d   :  { %v1950_v17 = vmul.f32 %v5532_v15, %v1946_v7  ;;  %v1951_v18 = vmul.f32 %v5532_v15, %v1947_v36  ;;  %v2326_v7 = vld [vmem:[#allocation5 + $0xe8] sm:$0xff]  ;;  %v2327_v15 = vld [vmem:[#allocation5 + $0xf0] sm:$0xff] }
 0xc7e   :  { %v5365_v36 = vpack.c.bf16 %v2326_v7, %v2325_v9  ;;  %v2423_v9 = vld [vmem:[#allocation7 + $0xd0] sm:$0xff]  ;;  %v2424_v7 = vld [vmem:[#allocation7 + $0xd8] sm:$0xff] }
 0xc7f   :  { %v1958_v20 = vmul.f32 %v4301_v16, %v1950_v17  ;;  %v1959_v21 = vmul.f32 %v4301_v16, %v1951_v18  ;;  %v5337_v16 = vpack.c.bf16 %v2228_v14, %v2227_v37  ;;  %v2328_v17 = vld [vmem:[#allocation5 + $0xf8] sm:$0xff]  ;;  %v2425_v37 = vld [vmem:[#allocation7 + $0xe0] sm:$0xff]  ;;  %v2426_v14 = vld [vmem:[#allocation7 + $0xe8] sm:$0xff] }
 0xc80   :  { %v5369_v18 = vpack.c.bf16 %v2328_v17, %v2327_v15  ;;  %v5397_v15 = vpack.c.bf16 %v2426_v14, %v2425_v37  ;;  %v2428_v17 = vld [vmem:[#allocation7 + $0xf8] sm:$0xff] }
 0xc81   :  { %v6177_v22 = vadd.f32 %v4302_v19, %v1958_v20  ;;  %v6179_v23 = vadd.f32 %v4302_v19, %v1959_v21  ;;  %v2413_v19 = vld [vmem:[#allocation7 + $0x80] sm:$0xff]  ;;  %v2414_v20 = vld [vmem:[#allocation7 + $0x88] sm:$0xff] }
 0xc82   :  { %v5373_v21 = vpack.c.bf16 %v2414_v20, %v2413_v19  ;;  %v4310_v19 = vld [vmem:[%s6428_s6 + $0x1] ss:$0 sm:$0xff] }
 0xc83   :  { %4837 = vmatprep.mubr.f32.mxu1 %v6177_v22 }
 0xc84   :  { %4838 = vmatmul.mubr.f32.vlgmr.msra.gmra.mrb[28].mxu1 %v6179_v23 }
 0xc85   :  { %5312 = vmatpush3.bf16.msra.mxu1 %v5309_v43 }
 0xc86   :  { %5314 = vmatprep.subr.bf16.mxu1 %v5313_v47 }
 0xc89   :  { %5316 = vmatpush3.bf16.msra.mxu1 %v5313_v47 }
 0xc8a   :  { %5318 = vmatprep.subr.bf16.mxu1 %v5317_v53 }
 0xc8d   :  { %5320 = vmatpush3.bf16.msra.mxu1 %v5317_v53 }
 0xc8e   :  { %5322 = vmatprep.subr.bf16.mxu1 %v5321_v59 }
 0xc91   :  { %5324 = vmatpush3.bf16.msra.mxu1 %v5321_v59 }
 0xc92   :  { %5326 = vmatprep.subr.bf16.mxu1 %v5325_v0 }
 0xc95   :  { %5328 = vmatpush3.bf16.msra.mxu1 %v5325_v0  ;;  %v2416_v0 = vld [vmem:[#allocation7 + $0x98] sm:$0xff] }
 0xc96   :  { %5330 = vmatprep.subr.bf16.mxu1 %v5329_v8 }
 0xc99   :  { %5332 = vmatpush3.bf16.msra.mxu1 %v5329_v8  ;;  %v5381_v8 = vpack.c.bf16 %v2418_v4, %v2417_v5 }
 0xc9a   :  { %5334 = vmatprep.subr.bf16.mxu1 %v5333_v6 }
 0xc9d   :  { %5336 = vmatpush3.bf16.msra.mxu1 %v5333_v6  ;;  %v5389_v6 = vpack.c.bf16 %v2422_v35, %v2421_v13 }
 0xc9e   :  { %5338 = vmatprep.subr.bf16.mxu1 %v5337_v16 }
 0xca1   :  { %5340 = vmatpush3.bf16.msra.mxu1 %v5337_v16  ;;  %v2427_v16 = vld [vmem:[#allocation7 + $0xf0] sm:$0xff] }
 0xca2   :  { %5374 = vmatprep.subr.bf16.mxu1 %v5373_v21 }
 0xd57   :  { %v4839_v29 = vpop.f32.mrb[28].mxu1 }
 0xd58   :  { %v2063_v30 = vadd.f32 %v4839_v29, %v4303_v28  ;;  %v2057_v31 = vpop.f32.mrb[29].mxu1 }
 0xd59   :  { %v2058_v32 = vadd.f32 %v4303_v28, %v2057_v31 }
 0xd5a   :  { %v2067_v38 = vmax.f32 %v2063_v30, 0.0 }
 0xd5b   :  { %v2066_v33 = vmax.f32 %v2058_v32, 0.0 }
 0xd5d   :  { %4872 = vmatprep.mubr.f32.mxu0 %v2066_v33 }
 0xd5e   :  { %4873 = vmatmul.mubr.f32.vlgmr.msra.gmra.mrb[12].mxu0 %v2067_v38 }
 0xd5f   :  { %5344 = vmatpush3.bf16.msra.mxu0 %v5341_v44 }
 0xd60   :  { %5346 = vmatprep.subr.bf16.mxu0 %v5345_v50 }
 0xd63   :  { %5348 = vmatpush3.bf16.msra.mxu0 %v5345_v50 }
 0xd64   :  { %5350 = vmatprep.subr.bf16.mxu0 %v5349_v56 }
 0xd67   :  { %5352 = vmatpush3.bf16.msra.mxu0 %v5349_v56 }
 0xd68   :  { %5354 = vmatprep.subr.bf16.mxu0 %v5353_v62 }
 0xd6b   :  { %5356 = vmatpush3.bf16.msra.mxu0 %v5353_v62 }
 0xd6c   :  { %5358 = vmatprep.subr.bf16.mxu0 %v5357_v3 }
 0xd6f   :  { %5360 = vmatpush3.bf16.msra.mxu0 %v5357_v3  ;;  %v5377_v3 = vpack.c.bf16 %v2416_v0, %v2415_v34 }
 0xd70   :  { %5362 = vmatprep.subr.bf16.mxu0 %v5361_v12 }
 0xd73   :  { %5364 = vmatpush3.bf16.msra.mxu0 %v5361_v12  ;;  %v5385_v12 = vpack.c.bf16 %v2420_v11, %v2419_v10 }
 0xd74   :  { %5366 = vmatprep.subr.bf16.mxu0 %v5365_v36 }
 0xd77   :  { %5368 = vmatpush3.bf16.msra.mxu0 %v5365_v36  ;;  %v5393_v36 = vpack.c.bf16 %v2424_v7, %v2423_v9 }
 0xd78   :  { %5370 = vmatprep.subr.bf16.mxu0 %v5369_v18 }
 0xd7b   :  { %5372 = vmatpush3.bf16.msra.mxu0 %v5369_v18  ;;  %v5401_v18 = vpack.c.bf16 %v2428_v17, %v2427_v16 }
 0xd7c   :  { %4980 = vmatprep.subr.mxu0 %v5745_v27 }
 0xe31   :  { %v4874_v25 = vpop.f32.mrb[12].mxu0 }
 0xe32   :  { %v2163_v26 = vadd.f32 %v4874_v25, %v4304_v24  ;;  %v2157_v28 = vpop.f32.mrb[13].mxu0 }
 0xe33   :  { %v2158_v29 = vadd.f32 %v4304_v24, %v2157_v28 }
 0xe34   :  { %v2167_v30 = vadd.f32 %v2163_v26, %v6179_v23  ;;  %v4308_v26 = vld [vmem:[%s6426_s4 + $0x1] ss:$0 sm:$0xff] }
 0xe35   :  { %v2166_v31 = vadd.f32 %v2158_v29, %v6177_v22 }
 0xe36   :  { %v2179_v32 = vmul.f32 %v2167_v30, %v2167_v30 }
 0xe37   :  { %v2170_v33 = vadd.f32 %v2167_v30, %v2166_v31  ;;  %v2178_v38 = vmul.f32 %v2166_v31, %v2166_v31 }
 0xe39   :  { %v2171_v39 = vrot.slane %v2170_v33, 4  ;;  %v2180_v41 = vadd.f32 %v2179_v32, %v2178_v38  ;;  %v4312_v32 = vld [vmem:[%s6430_s8 + $0x1] ss:$0 sm:$0xff] }
 0xe3b   :  { %v2172_v43 = vadd.f32 %v2171_v39, %v2170_v33  ;;  %v2181_v40 = vrot.slane %v2180_v41, 4 }
 0xe3d   :  { %v2173_v42 = vrot.slane %v2172_v43, 2  ;;  %v2182_v44 = vadd.f32 %v2181_v40, %v2180_v41 }
 0xe3f   :  { %v2174_v45 = vadd.f32 %v2173_v42, %v2172_v43  ;;  %v2183_v46 = vrot.slane %v2182_v44, 2 }
 0xe41   :  { %v2175_v47 = vrot.slane %v2174_v45, 1  ;;  %v2184_v48 = vadd.f32 %v2183_v46, %v2182_v44 }
 0xe43   :  { %v2176_v49 = vadd.f32 %v2175_v47, %v2174_v45  ;;  %v2185_v50 = vrot.slane %v2184_v48, 1 }
 0xe45   :  { %v2177_v51 = vmul.f32 0.0625, %v2176_v49  ;;  %v2186_v52 = vadd.f32 %v2185_v50, %v2184_v48 }
 0xe47   :  { %v2187_v23 = vmul.f32 0.0625, %v2186_v52  ;;  %v2188_v53 = vmul.f32 %v2177_v51, %v2177_v51  ;;  %v2190_v22 = vsub.f32 %v2166_v31, %v2177_v51  ;;  %v2191_v54 = vsub.f32 %v2167_v30, %v2177_v51 }
 0xe49   :  { %v2189_v55 = vsub.f32 %v2187_v23, %v2188_v53 }
 0xe4b   :  { %v2192_v56 = vadd.f32 1e-05, %v2189_v55 }
 0xe4d   :  { %5533 = vrsqrt.f32 %v2192_v56 }
 0xe57   :  { %v5534_v57 = vpop.eup %5533 }
 0xe58   :  { %v2194_v59 = vmul.f32 %v5534_v57, %v2190_v22  ;;  %v2195_v60 = vmul.f32 %v5534_v57, %v2191_v54 }
 0xe5a   :  { %v2202_v62 = vmul.f32 %v4305_v58, %v2194_v59  ;;  %v2203_v63 = vmul.f32 %v4305_v58, %v2195_v60 }
 0xe5c   :  { %v6198_v1 = vadd.f32 %v4306_v61, %v2202_v62  ;;  %v6200_v2 = vadd.f32 %v4306_v61, %v2203_v63 }
 0xe5e   :  { %4907 = vmatprep.mubr.f32.mxu1 %v6198_v1  ;;  %4942 = vmatprep.mubr.f32.mxu0 %v6198_v1 }
 0xe5f   :  { %4908 = vmatmul.mubr.f32.vlgmr.msra.gmra.mrb[30].mxu1 %v6200_v2  ;;  %4943 = vmatmul.mubr.f32.vlgmr.msra.gmra.mrb[14].mxu0 %v6200_v2 }
 0xe60   :  { %5376 = vmatpush3.bf16.msra.mxu1 %v5373_v21  ;;  %4977 = vmatprep.mubr.f32.mxu1 %v6198_v1 }
 0xe61   :  { %5378 = vmatprep.subr.bf16.mxu1 %v5377_v3  ;;  %4982 = vmatprep.mubr.msk.f32.mxu0 %vm5746_vm0, %v5745_v27 }
 0xe64   :  { %5380 = vmatpush3.bf16.msra.mxu1 %v5377_v3 }
 0xe65   :  { %5382 = vmatprep.subr.bf16.mxu1 %v5381_v8 }
 0xe68   :  { %5384 = vmatpush3.bf16.msra.mxu1 %v5381_v8 }
 0xe69   :  { %5386 = vmatprep.subr.bf16.mxu1 %v5385_v12 }
 0xe6c   :  { %5388 = vmatpush3.bf16.msra.mxu1 %v5385_v12 }
 0xe6d   :  { %5390 = vmatprep.subr.bf16.mxu1 %v5389_v6 }
 0xe70   :  { %5392 = vmatpush3.bf16.msra.mxu1 %v5389_v6 }
 0xe71   :  { %5394 = vmatprep.subr.bf16.mxu1 %v5393_v36 }
 0xe74   :  { %5396 = vmatpush3.bf16.msra.mxu1 %v5393_v36 }
 0xe75   :  { %5398 = vmatprep.subr.bf16.mxu1 %v5397_v15 }
 0xe78   :  { %5400 = vmatpush3.bf16.msra.mxu1 %v5397_v15 }
 0xe79   :  { %5402 = vmatprep.subr.bf16.mxu1 %v5401_v18 }
 0xe7c   :  { %5404 = vmatpush3.bf16.msra.mxu1 %v5401_v18 }
 0xe7d   :  { %5015 = vmatprep.subr.mxu1 %v5745_v27 }
 0xe7f   :  { %4978 = vmatmul.mubr.f32.vlgmr.msra.gmra.mrb[32].mxu1 %v6200_v2 }
 0xe80   :  { %5017 = vmatprep.mubr.msk.f32.mxu1 %vm5746_vm0, %v5745_v27 }
 0xf32   :  { %v4909_v20 = vpop.f32.mrb[30].mxu1  ;;  %v4944_v21 = vpop.f32.mrb[14].mxu0 }
 0xf33   :  { %v2303_v24 = vpop.f32.mrb[31].mxu1  ;;  %v2403_v25 = vpop.f32.mrb[15].mxu0  ;;  %v6226_v30 = vadd.f32 %v4944_v21, %v4310_v19  ;;  %v6234_v31 = vadd.f32 %v4909_v20, %v4308_v26 }
 0xf34   :  { %v6219_v28 = vadd.f32 %v4310_v19, %v2403_v25  ;;  %v6223_v29 = vadd.f32 %v4308_v26, %v2303_v24 }
 0xf36   :  { %4981 = vmatpush3.xpose.msk.msra.mxu0 %vm484_vm1, %v6219_v28 }
 0xf37   :  { %4985 = vmatprep.subr.mxu0 %v5745_v27 }
 0xf39   :  { %4983 = vmatmul.mubr.msk.f32.vlgmr.msra.gmra.mrb[16].mxu0 %vm484_vm1, %v6223_v29 }
 0xf3a   :  { %4986 = vmatpush3.xpose.msk.msra.mxu0 %vm484_vm1, %v6226_v30  ;;  %4987 = vmatprep.mubr.msk.f32.mxu0 %vm5746_vm0, %v5745_v27 }
 0xf3b   :  { %4990 = vmatprep.subr.mxu0 %v5745_v27 }
 0xf3d   :  { %4988 = vmatmul.mubr.msk.f32.vlgmr.msra.gmra.mrb[18].mxu0 %vm484_vm1, %v6234_v31 }
 0xf3e   :  { %4992 = vmatprep.mubr.msk.f32.mxu0 %vm5746_vm0, %v5745_v27 }
 0xf52   :  { %v4979_v33 = vpop.f32.mrb[32].mxu1 }
 0xf53   :  { %v6244_v38 = vadd.f32 %v4979_v33, %v4312_v32  ;;  %v2503_v39 = vpop.f32.mrb[33].mxu1 }
 0xf54   :  { %v6246_v41 = vadd.f32 %v4312_v32, %v2503_v39 }
 0xf56   :  { %4991 = vmatpush3.msra.mxu0 %v6246_v41 }
 0xf57   :  { %4995 = vmatprep.subr.mxu0 %v5745_v27 }
0x100c   :  { %v2584_v43 = vpop.f32.mrb[16].mxu0 }
0x100d   :  { %v4984_v40 = vpop.f32.mrb[17].mxu0  ;;  %v2664_v42 = vsel %vm484_vm1, %v2584_v43, -inf }
0x100e   :  { %2665 = vmax.xlane.f32.xlu1 %v2664_v42 }
0x1010   :  { %v2660_v44 = vpop.f32.mrb[18].mxu0 }
0x1011   :  { %v4989_v45 = vpop.f32.mrb[19].mxu0  ;;  %v2667_v46 = vsel %vm484_vm1, %v2660_v44, -inf }
0x1012   :  { %2668 = vmax.xlane.f32.xlu0 %v2667_v46 }
0x101f   :  { %2832 = vrot.lane.b32.xlu1 %v6223_v29, %s5747_s19 }
0x109b   :  { %v2666_v47 = vpop.xlane.xlu1 %2665 }
0x109c   :  { %v2670_v48 = vsub.f32 %v2584_v43, %v2666_v47 }
0x109e   :  { %v2672_v49 = vmul.f32 1.442695, %v2670_v48 }
0x109f   :  { %v2669_v50 = vpop.xlane.xlu0 %2668  ;;  %v2833_v55 = vpop.permute.xlu1 %2832 }
0x10a0   :  { %5535 = vpow2.f32 %v2672_v49  ;;  %v2671_v51 = vsub.f32 %v2660_v44, %v2669_v50 }
0x10a2   :  { %v2674_v52 = vmul.f32 1.442695, %v2671_v51 }
0x10a4   :  { %5537 = vpow2.f32 %v2674_v52 }
0x10aa   :  { %v5536_v23 = vpop.eup %5535 }
0x10ab   :  { %v2676_v53 = vsel %vm484_vm1, %v5536_v23, 0.0 }
0x10ac   :  { %2677 = vadd.xlane.f32.xlu0 %v2676_v53 }
0x10ae   :  { %v5538_v22 = vpop.eup %5537 }
0x10af   :  { %v2679_v54 = vsel %vm484_vm1, %v5538_v22, 0.0 }
0x10b0   :  { %2680 = vadd.xlane.f32.xlu1 %v2679_v54 }
0x10c1   :  { %2912 = vrot.lane.b32.xlu1 %v6226_v30, %s5747_s19 }
0x10c2   :  { %2834 = vrot.lane.b32.xlu0 %v6219_v28, %s5747_s19 }
0x10c6   :  { %2910 = vrot.lane.b32.xlu0 %v6234_v31, %s5747_s19 }
0x1139   :  { %v2678_v56 = vpop.xlane.xlu0 %2677 }
0x113a   :  { %5539 = vrcp.f32 %v2678_v56 }
0x113d   :  { %v2681_v57 = vpop.xlane.xlu1 %2680  ;;  %v2835_v62 = vpop.permute.xlu0 %2834 }
0x113e   :  { %5541 = vrcp.f32 %v2681_v57 }
0x1141   :  { %v2913_v63 = vpop.permute.xlu1 %2912  ;;  %v2911_v34 = vpop.permute.xlu0 %2910 }
0x1144   :  { %v5540_v58 = vpop.eup %5539 }
0x1145   :  { %v2684_v59 = vmul.f32 %v5540_v58, %v5536_v23 }
0x1147   :  { %4993 = vmatmul.mubr.msk.f32.vlgmr.msra.gmra.mrb[20].mxu0 %vm484_vm1, %v2684_v59 }
0x1148   :  { %v5542_v60 = vpop.eup %5541  ;;  %4996 = vmatpush3.msra.mxu0 %v6244_v38  ;;  %4997 = vmatprep.mubr.msk.f32.mxu0 %vm5746_vm0, %v5745_v27 }
0x1149   :  { %v2685_v61 = vmul.f32 %v5542_v60, %v5538_v22  ;;  %5000 = vmatprep.subr.mxu0 %v5745_v27 }
0x114b   :  { %4998 = vmatmul.mubr.msk.f32.vlgmr.msra.gmra.mrb[22].mxu0 %vm484_vm1, %v2685_v61 }
0x114c   :  { %5002 = vmatprep.mubr.msk.f32.mxu0 %vm5746_vm0, %v5745_v27 }
0x114f   :  { %5001 = vmatpush3.xpose.msk.msra.mxu0 %vm484_vm1, %v2835_v62 }
0x1150   :  { %5005 = vmatprep.subr.mxu0 %v5745_v27 }
0x1152   :  { %5003 = vmatmul.mubr.msk.f32.vlgmr.msra.gmra.mrb[24].mxu0 %vm484_vm1, %v2833_v55 }
0x1153   :  { %5006 = vmatpush3.xpose.msk.msra.mxu0 %vm484_vm1, %v2913_v63  ;;  %5007 = vmatprep.mubr.msk.f32.mxu0 %vm5746_vm0, %v5745_v27 }
0x1154   :  { %5010 = vmatprep.subr.mxu0 %v5745_v27 }
0x1156   :  { %5008 = vmatmul.mubr.msk.f32.vlgmr.msra.gmra.mrb[26].mxu0 %vm484_vm1, %v2911_v34 }
0x1157   :  { %5012 = vmatprep.mubr.msk.f32.mxu0 %vm5746_vm0, %v5745_v27 }
0x121a   :  { %v6280_v0 = vpop.f32.mrb[20].mxu0 }
0x121b   :  { %v4994_v3 = vpop.f32.mrb[21].mxu0 }
0x121e   :  { %v6282_v5 = vpop.f32.mrb[22].mxu0 }
0x121f   :  { %v4999_v4 = vpop.f32.mrb[23].mxu0 }
0x1225   :  { %v2906_v8 = vpop.f32.mrb[24].mxu0 }
0x1226   :  { %v5004_v10 = vpop.f32.mrb[25].mxu0  ;;  %v2988_v11 = vsel %vm484_vm1, %v2906_v8, -inf }
0x1227   :  { %2989 = vmax.xlane.f32.xlu1 %v2988_v11 }
0x1229   :  { %v2984_v12 = vpop.f32.mrb[26].mxu0 }
0x122a   :  { %v5009_v13 = vpop.f32.mrb[27].mxu0  ;;  %v2991_v35 = vsel %vm484_vm1, %v2984_v12, -inf }
0x122b   :  { %2992 = vmax.xlane.f32.xlu0 %v2991_v35 }
0x1238   :  { %3088 = vrot.lane.b32.xlu1 %v6244_v38, %s5747_s19 }
0x123c   :  { %3166 = vrot.lane.b32.xlu1 %v6219_v28, %s5748_s0 }
0x1241   :  { %3011 = vrot.lane.b32.xlu0 %v6246_v41, %s5747_s19 }
0x12b4   :  { %v2990_v6 = vpop.xlane.xlu1 %2989 }
0x12b5   :  { %v2994_v9 = vsub.f32 %v2906_v8, %v2990_v6 }
0x12b7   :  { %v2996_v7 = vmul.f32 1.442695, %v2994_v9 }
0x12b8   :  { %v3089_v36 = vpop.permute.xlu1 %3088  ;;  %v2993_v37 = vpop.xlane.xlu0 %2992 }
0x12b9   :  { %5543 = vpow2.f32 %v2996_v7  ;;  %v2995_v14 = vsub.f32 %v2984_v12, %v2993_v37  ;;  %5016 = vmatpush3.msra.mxu1 %v3089_v36 }
0x12ba   :  { %5025 = vmatprep.subr.mxu1 %v5745_v27 }
0x12bb   :  { %v2998_v15 = vmul.f32 1.442695, %v2995_v14 }
0x12bc   :  { %v3012_v16 = vpop.permute.xlu0 %3011  ;;  %v3167_v21 = vpop.permute.xlu1 %3166 }
0x12bd   :  { %5545 = vpow2.f32 %v2998_v15  ;;  %5011 = vmatpush3.msra.mxu0 %v3012_v16 }
0x12be   :  { %5020 = vmatprep.subr.mxu0 %v5745_v27 }
0x12c3   :  { %v5544_v17 = vpop.eup %5543 }
0x12c4   :  { %v3000_v18 = vsel %vm484_vm1, %v5544_v17, 0.0 }
0x12c5   :  { %3001 = vadd.xlane.f32.xlu0 %v3000_v18 }
0x12c7   :  { %v5546_v19 = vpop.eup %5545 }
0x12c8   :  { %v3003_v20 = vsel %vm484_vm1, %v5546_v19, 0.0 }
0x12c9   :  { %3004 = vadd.xlane.f32.xlu1 %v3003_v20 }
0x12da   :  { %3164 = vrot.lane.b32.xlu1 %v6223_v29, %s5748_s0 }
0x12db   :  { %3244 = vrot.lane.b32.xlu0 %v6226_v30, %s5748_s0 }
0x12df   :  { %3242 = vrot.lane.b32.xlu0 %v6234_v31, %s5748_s0 }
0x1352   :  { %v3002_v24 = vpop.xlane.xlu0 %3001 }
0x1353   :  { %5547 = vrcp.f32 %v3002_v24 }
0x1356   :  { %v3005_v25 = vpop.xlane.xlu1 %3004  ;;  %v3245_v39 = vpop.permute.xlu0 %3244 }
0x1357   :  { %5549 = vrcp.f32 %v3005_v25 }
0x135a   :  { %v3165_v40 = vpop.permute.xlu1 %3164  ;;  %v3243_v42 = vpop.permute.xlu0 %3242 }
0x135d   :  { %v5548_v26 = vpop.eup %5547 }
0x135e   :  { %v3008_v32 = vmul.f32 %v5548_v26, %v5544_v17 }
0x1360   :  { %5013 = vmatmul.mubr.msk.f32.vlgmr.msra.gmra.mrb[28].mxu0 %vm484_vm1, %v3008_v32 }
0x1361   :  { %v5550_v33 = vpop.eup %5549  ;;  %5021 = vmatpush3.xpose.msk.msra.mxu0 %vm484_vm1, %v3167_v21  ;;  %5022 = vmatprep.mubr.msk.f32.mxu0 %vm5746_vm0, %v5745_v27 }
0x1362   :  { %v3009_v43 = vmul.f32 %v5550_v33, %v5546_v19  ;;  %5030 = vmatprep.subr.mxu0 %v5745_v27 }
0x1364   :  { %5018 = vmatmul.mubr.msk.f32.vlgmr.msra.gmra.mrb[34].mxu1 %vm484_vm1, %v3009_v43  ;;  %5023 = vmatmul.mubr.msk.f32.vlgmr.msra.gmra.mrb[30].mxu0 %vm484_vm1, %v3165_v40 }
0x1365   :  { %5026 = vmatpush3.xpose.msk.msra.mxu1 %vm484_vm1, %v3245_v39  ;;  %5027 = vmatprep.mubr.msk.f32.mxu1 %vm5746_vm0, %v5745_v27 }
0x1366   :  { %5035 = vmatprep.subr.mxu1 %v5745_v27  ;;  %5032 = vmatprep.mubr.msk.f32.mxu0 %vm5746_vm0, %v5745_v27 }
0x1368   :  { %5028 = vmatmul.mubr.msk.f32.vlgmr.msra.gmra.mrb[36].mxu1 %vm484_vm1, %v3243_v42 }
0x1369   :  { %5037 = vmatprep.mubr.msk.f32.mxu1 %vm5746_vm0, %v5745_v27 }
0x1433   :  { %v6318_v44 = vpop.f32.mrb[28].mxu0 }
0x1434   :  { %v5014_v45 = vpop.f32.mrb[29].mxu0 }
0x1435   :  { %v3856_v45 = vld [vmem:[#allocation8 + $0x28] sm:$0xff] }
0x1437   :  { %v6320_v46 = vpop.f32.mrb[34].mxu1  ;;  %v3238_v47 = vpop.f32.mrb[30].mxu0 }
0x1438   :  { %v5019_v48 = vpop.f32.mrb[35].mxu1  ;;  %v5024_v49 = vpop.f32.mrb[31].mxu0  ;;  %v3320_v50 = vsel %vm484_vm1, %v3238_v47, -inf }
0x1439   :  { %3321 = vmax.xlane.f32.xlu1 %v3320_v50  ;;  %v3858_v48 = vld [vmem:[#allocation8 + $0x38] sm:$0xff] }
0x143b   :  { %v3316_v51 = vpop.f32.mrb[36].mxu1 }
0x143c   :  { %v5029_v52 = vpop.f32.mrb[37].mxu1  ;;  %v3323_v23 = vsel %vm484_vm1, %v3316_v51, -inf }
0x143d   :  { %3324 = vmax.xlane.f32.xlu0 %v3323_v23 }
0x144a   :  { %3418 = vrot.lane.b32.xlu1 %v6244_v38, %s5748_s0 }
0x144e   :  { %3496 = vrot.lane.b32.xlu1 %v6219_v28, %s5749_s1 }
0x1453   :  { %3342 = vrot.lane.b32.xlu0 %v6246_v41, %s5748_s0 }
0x14c6   :  { %v3322_v53 = vpop.xlane.xlu1 %3321 }
0x14c7   :  { %v3326_v22 = vsub.f32 %v3238_v47, %v3322_v53  ;;  %v3857_v47 = vld [vmem:[#allocation8 + $0x30] sm:$0xff] }
0x14c8   :  { %v5409_v49 = vpack.c.bf16 %v3858_v48, %v3857_v47  ;;  %v4112_v47 = vld [vmem:[#allocation11 + $0xe8] sm:$0xff] }
0x14c9   :  { %v3328_v54 = vmul.f32 1.442695, %v3326_v22 }
0x14ca   :  { %v3325_v55 = vpop.xlane.xlu0 %3324  ;;  %v3419_v56 = vpop.permute.xlu1 %3418 }
0x14cb   :  { %5551 = vpow2.f32 %v3328_v54  ;;  %v3327_v57 = vsub.f32 %v3316_v51, %v3325_v55  ;;  %5036 = vmatpush3.msra.mxu1 %v3419_v56 }
0x14cc   :  { %5045 = vmatprep.subr.mxu1 %v5745_v27 }
0x14cd   :  { %v3330_v58 = vmul.f32 1.442695, %v3327_v57 }
0x14ce   :  { %v3343_v59 = vpop.permute.xlu0 %3342  ;;  %v3497_v63 = vpop.permute.xlu1 %3496 }
0x14cf   :  { %5553 = vpow2.f32 %v3330_v58  ;;  %5031 = vmatpush3.msra.mxu0 %v3343_v59 }
0x14d0   :  { %5040 = vmatprep.subr.mxu0 %v5745_v27 }
0x14d5   :  { %v5552_v28 = vpop.eup %5551 }
0x14d6   :  { %v3332_v60 = vsel %vm484_vm1, %v5552_v28, 0.0 }
0x14d7   :  { %3333 = vadd.xlane.f32.xlu0 %v3332_v60 }
0x14d9   :  { %v5554_v61 = vpop.eup %5553 }
0x14da   :  { %v3335_v62 = vsel %vm484_vm1, %v5554_v61, 0.0 }
0x14db   :  { %3336 = vadd.xlane.f32.xlu1 %v3335_v62 }
0x14ec   :  { %3494 = vrot.lane.b32.xlu1 %v6223_v29, %s5749_s1 }
0x14ed   :  { %3574 = vrot.lane.b32.xlu0 %v6226_v30, %s5749_s1 }
0x14f1   :  { %3572 = vrot.lane.b32.xlu0 %v6234_v31, %s5749_s1 }
0x1564   :  { %v3334_v34 = vpop.xlane.xlu0 %3333 }
0x1565   :  { %5555 = vrcp.f32 %v3334_v34 }
0x1568   :  { %v3337_v3 = vpop.xlane.xlu1 %3336  ;;  %v3575_v11 = vpop.permute.xlu0 %3574 }
0x1569   :  { %5557 = vrcp.f32 %v3337_v3  ;;  %v3999_v3 = vld [vmem:[#allocation10 + $0x90] sm:$0xff] }
0x156c   :  { %v3495_v30 = vpop.permute.xlu1 %3494  ;;  %v3573_v31 = vpop.permute.xlu0 %3572 }
0x156f   :  { %v5556_v4 = vpop.eup %5555 }
0x1570   :  { %v3340_v8 = vmul.f32 %v5556_v4, %v5552_v28  ;;  %v4000_v4 = vld [vmem:[#allocation10 + $0x98] sm:$0xff] }
0x1572   :  { %5033 = vmatmul.mubr.msk.f32.vlgmr.msra.gmra.mrb[32].mxu0 %vm484_vm1, %v3340_v8  ;;  %v5417_v8 = vpack.c.bf16 %v4000_v4, %v3999_v3 }
0x1573   :  { %v5558_v10 = vpop.eup %5557  ;;  %5041 = vmatpush3.xpose.msk.msra.mxu0 %vm484_vm1, %v3497_v63  ;;  %5042 = vmatprep.mubr.msk.f32.mxu0 %vm5746_vm0, %v5745_v27  ;;  %v3997_v63 = vld [vmem:[#allocation10 + $0x80] sm:$0xff] }
0x1574   :  { %v3341_v29 = vmul.f32 %v5558_v10, %v5554_v61  ;;  %5050 = vmatprep.subr.mxu0 %v5745_v27  ;;  %v4001_v10 = vld [vmem:[#allocation10 + $0xa0] sm:$0xff] }
0x1576   :  { %5038 = vmatmul.mubr.msk.f32.vlgmr.msra.gmra.mrb[38].mxu1 %vm484_vm1, %v3341_v29  ;;  %5043 = vmatmul.mubr.msk.f32.vlgmr.msra.gmra.mrb[34].mxu0 %vm484_vm1, %v3495_v30  ;;  %v4003_v29 = vld [vmem:[#allocation10 + $0xb0] sm:$0xff]  ;;  %v4004_v30 = vld [vmem:[#allocation10 + $0xb8] sm:$0xff] }
0x1577   :  { %5046 = vmatpush3.xpose.msk.msra.mxu1 %vm484_vm1, %v3575_v11  ;;  %5047 = vmatprep.mubr.msk.f32.mxu1 %vm5746_vm0, %v5745_v27  ;;  %v4002_v11 = vld [vmem:[#allocation10 + $0xa8] sm:$0xff] }
0x1578   :  { %5055 = vmatprep.subr.mxu1 %v5745_v27  ;;  %5052 = vmatprep.mubr.msk.f32.mxu0 %vm5746_vm0, %v5745_v27 }
0x157a   :  { %5048 = vmatmul.mubr.msk.f32.vlgmr.msra.gmra.mrb[40].mxu1 %vm484_vm1, %v3573_v31  ;;  %v5425_v31 = vpack.c.bf16 %v4004_v30, %v4003_v29 }
0x157b   :  { %5057 = vmatprep.mubr.msk.f32.mxu1 %vm5746_vm0, %v5745_v27 }
0x1645   :  { %v3414_v12 = vpop.f32.mrb[32].mxu0 }
0x1646   :  { %v5034_v13 = vpop.f32.mrb[33].mxu0 }
0x1647   :  { %v4006_v13 = vld [vmem:[#allocation10 + $0xc8] sm:$0xff] }
0x1649   :  { %v3490_v35 = vpop.f32.mrb[38].mxu1  ;;  %v3568_v6 = vpop.f32.mrb[34].mxu0 }
0x164a   :  { %v5039_v9 = vpop.f32.mrb[39].mxu1  ;;  %v5044_v7 = vpop.f32.mrb[35].mxu0  ;;  %v3650_v36 = vsel %vm484_vm1, %v3568_v6, -inf }
0x164b   :  { %3651 = vmax.xlane.f32.xlu1 %v3650_v36  ;;  %v4008_v9 = vld [vmem:[#allocation10 + $0xd8] sm:$0xff]  ;;  %v4009_v36 = vld [vmem:[#allocation10 + $0xe0] sm:$0xff] }
0x164d   :  { %v3646_v37 = vpop.f32.mrb[40].mxu1 }
0x164e   :  { %v5049_v14 = vpop.f32.mrb[41].mxu1  ;;  %v3653_v15 = vsel %vm484_vm1, %v3646_v37, -inf }
0x164f   :  { %3654 = vmax.xlane.f32.xlu0 %v3653_v15  ;;  %v4011_v15 = vld [vmem:[#allocation10 + $0xf0] sm:$0xff] }
0x16d8   :  { %v3652_v16 = vpop.xlane.xlu1 %3651 }
0x16d9   :  { %v3656_v17 = vsub.f32 %v3568_v6, %v3652_v16  ;;  %v4012_v16 = vld [vmem:[#allocation10 + $0xf8] sm:$0xff] }
0x16db   :  { %v3658_v18 = vmul.f32 1.442695, %v3656_v17  ;;  %v5441_v17 = vpack.c.bf16 %v4012_v16, %v4011_v15  ;;  %v4114_v15 = vld [vmem:[#allocation11 + $0xf8] sm:$0xff] }
0x16dc   :  { %v3655_v19 = vpop.xlane.xlu0 %3654 }
0x16dd   :  { %5559 = vpow2.f32 %v3658_v18  ;;  %v3657_v27 = vsub.f32 %v3646_v37, %v3655_v19  ;;  %v4010_v37 = vld [vmem:[#allocation10 + $0xe8] sm:$0xff]  ;;  %v4099_v18 = vld [vmem:[#allocation11 + $0x80] sm:$0xff] }
0x16de   :  { %v5437_v14 = vpack.c.bf16 %v4010_v37, %v4009_v36  ;;  %v4100_v19 = vld [vmem:[#allocation11 + $0x88] sm:$0xff] }
0x16df   :  { %v3660_v20 = vmul.f32 1.442695, %v3657_v27  ;;  %v4101_v27 = vld [vmem:[#allocation11 + $0x90] sm:$0xff] }
0x16e1   :  { %5561 = vpow2.f32 %v3660_v20  ;;  %v5445_v20 = vpack.c.bf16 %v4100_v19, %v4099_v18 }
0x16e7   :  { %v5560_v21 = vpop.eup %5559 }
0x16e8   :  { %v3662_v24 = vsel %vm484_vm1, %v5560_v21, 0.0 }
0x16e9   :  { %3663 = vadd.xlane.f32.xlu0 %v3662_v24 }
0x16eb   :  { %v5562_v25 = vpop.eup %5561 }
0x16ec   :  { %v3665_v26 = vsel %vm484_vm1, %v5562_v25, 0.0 }
0x16ed   :  { %3666 = vadd.xlane.f32.xlu1 %v3665_v26  ;;  %v4104_v26 = vld [vmem:[#allocation11 + $0xa8] sm:$0xff] }
0x16fe   :  { %3748 = vrot.lane.b32.xlu1 %v6244_v38, %s5749_s1 }
0x16ff   :  { %3672 = vrot.lane.b32.xlu0 %v6246_v41, %s5749_s1 }
0x1702   :  { %3826 = vrot.lane.b32.xlu1 %v6318_v44, %s5738_s28  ;;  %v3855_v44 = vld [vmem:[#allocation8 + $0x20] sm:$0xff] }
0x1703   :  { %3828 = vrot.lane.b32.xlu0 %v6320_v46, %s5738_s28  ;;  %v5405_v46 = vpack.c.bf16 %v3856_v45, %v3855_v44  ;;  %v4110_v44 = vld [vmem:[#allocation11 + $0xd8] sm:$0xff] }
0x1706   :  { %3834 = vrot.lane.b32.xlu1 %v3414_v12, %s5750_s22  ;;  %v4005_v12 = vld [vmem:[#allocation10 + $0xc0] sm:$0xff] }
0x1707   :  { %3836 = vrot.lane.b32.xlu0 %v3490_v35, %s5750_s22  ;;  %v4007_v35 = vld [vmem:[#allocation10 + $0xd0] sm:$0xff]  ;;  %v5429_v6 = vpack.c.bf16 %v4006_v13, %v4005_v12 }
0x1708   :  { %v5433_v7 = vpack.c.bf16 %v4008_v9, %v4007_v35  ;;  %v4343_v12 = vld [vmem:[%s6433_s11 + $0x1] ss:$0 sm:$0xff] }
0x1776   :  { %v3664_v32 = vpop.xlane.xlu0 %3663 }
0x1777   :  { %5563 = vrcp.f32 %v3664_v32 }
0x177a   :  { %v3673_v33 = vpop.permute.xlu0 %3672  ;;  %v3667_v39 = vpop.xlane.xlu1 %3666 }
0x177b   :  { %5565 = vrcp.f32 %v3667_v39  ;;  %5051 = vmatpush3.msra.mxu0 %v3673_v33  ;;  %v4105_v33 = vld [vmem:[#allocation11 + $0xb0] sm:$0xff]  ;;  %v4106_v39 = vld [vmem:[#allocation11 + $0xb8] sm:$0xff] }
0x177c   :  { %5406 = vmatprep.subr.bf16.mxu0 %v5405_v46 }
0x177e   :  { %v3749_v38 = vpop.permute.xlu1 %3748  ;;  %v3829_v22 = vpop.permute.xlu0 %3828 }
0x177f   :  { %5056 = vmatpush3.msra.mxu1 %v3749_v38  ;;  %v3849_v28 = vsel %vm484_vm1, %v6282_v5, %v3829_v22  ;;  %v5421_v5 = vpack.c.bf16 %v4002_v11, %v4001_v10  ;;  %v5457_v38 = vpack.c.bf16 %v4106_v39, %v4105_v33 }
0x1781   :  { %v5564_v43 = vpop.eup %5563 }
0x1782   :  { %v3670_v41 = vmul.f32 %v5564_v43, %v5560_v21  ;;  %v3827_v53 = vpop.permute.xlu1 %3826  ;;  %v3837_v56 = vpop.permute.xlu0 %3836  ;;  %v4102_v21 = vld [vmem:[#allocation11 + $0x98] sm:$0xff]  ;;  %v4107_v43 = vld [vmem:[#allocation11 + $0xc0] sm:$0xff] }
0x1783   :  { %v3848_v55 = vsel %vm484_vm1, %v6280_v0, %v3827_v53  ;;  %v3851_v60 = vsel %vm1823_vm3, %v3849_v28, %v3837_v56  ;;  %v3998_v0 = vld [vmem:[#allocation10 + $0x88] sm:$0xff]  ;;  %v5449_v24 = vpack.c.bf16 %v4102_v21, %v4101_v27 }
0x1784   :  { %5053 = vmatmul.mubr.msk.f32.vlgmr.msra.gmra.mrb[36].mxu0 %vm484_vm1, %v3670_v41  ;;  %v5413_v34 = vpack.c.bf16 %v3998_v0, %v3997_v63  ;;  %v4108_v41 = vld [vmem:[#allocation11 + $0xc8] sm:$0xff] }
0x1785   :  { %v5566_v40 = vpop.eup %5565  ;;  %5408 = vmatpush3.bf16.msra.mxu0 %v5405_v46  ;;  %v4111_v46 = vld [vmem:[#allocation11 + $0xe0] sm:$0xff] }
0x1786   :  { %v3671_v42 = vmul.f32 %v5566_v40, %v5562_v25  ;;  %5410 = vmatprep.subr.bf16.mxu0 %v5409_v49  ;;  %v3835_v54 = vpop.permute.xlu1 %3834  ;;  %5414 = vmatprep.subr.bf16.mxu1 %v5413_v34  ;;  %v4103_v25 = vld [vmem:[#allocation11 + $0xa0] sm:$0xff]  ;;  %v5461_v40 = vpack.c.bf16 %v4108_v41, %v4107_v43  ;;  %v5469_v48 = vpack.c.bf16 %v4112_v47, %v4111_v46 }
0x1787   :  { %v3850_v57 = vsel %vm1823_vm3, %v3848_v55, %v3835_v54  ;;  %v5453_v32 = vpack.c.bf16 %v4104_v26, %v4103_v25  ;;  %v4348_v25 = vld [vmem:[%s6438_s16 + $0x1] ss:$0 sm:$0xff] }
0x1788   :  { %5058 = vmatmul.mubr.msk.f32.vlgmr.msra.gmra.mrb[42].mxu1 %vm484_vm1, %v3671_v42  ;;  %v4109_v42 = vld [vmem:[#allocation11 + $0xd0] sm:$0xff] }
0x1789   :  { %5412 = vmatpush3.bf16.msra.mxu0 %v5409_v49  ;;  %5416 = vmatpush3.bf16.msra.mxu1 %v5413_v34  ;;  %v5465_v45 = vpack.c.bf16 %v4110_v44, %v4109_v42  ;;  %v4338_v49 = vld [vmem:[%s6432_s10 + $0x1] ss:$0 sm:$0xff] }
0x178a   :  { %5418 = vmatprep.subr.bf16.mxu1 %v5417_v8  ;;  %5446 = vmatprep.subr.bf16.mxu0 %v5445_v20 }
0x178d   :  { %5420 = vmatpush3.bf16.msra.mxu1 %v5417_v8 }
0x178e   :  { %5422 = vmatprep.subr.bf16.mxu1 %v5421_v5 }
0x1791   :  { %5424 = vmatpush3.bf16.msra.mxu1 %v5421_v5 }
0x1792   :  { %5426 = vmatprep.subr.bf16.mxu1 %v5425_v31 }
0x1795   :  { %5428 = vmatpush3.bf16.msra.mxu1 %v5425_v31 }
0x1796   :  { %5430 = vmatprep.subr.bf16.mxu1 %v5429_v6 }
0x1799   :  { %5432 = vmatpush3.bf16.msra.mxu1 %v5429_v6  ;;  %v4344_v6 = vld [vmem:[%s6434_s12 + $0x1] ss:$0 sm:$0xff] }
0x179a   :  { %5434 = vmatprep.subr.bf16.mxu1 %v5433_v7 }
0x179d   :  { %5436 = vmatpush3.bf16.msra.mxu1 %v5433_v7 }
0x179e   :  { %5438 = vmatprep.subr.bf16.mxu1 %v5437_v14 }
0x17a1   :  { %5440 = vmatpush3.bf16.msra.mxu1 %v5437_v14  ;;  %v4113_v14 = vld [vmem:[#allocation11 + $0xf0] sm:$0xff] }
0x17a2   :  { %5442 = vmatprep.subr.bf16.mxu1 %v5441_v17  ;;  %v5473_v16 = vpack.c.bf16 %v4114_v15, %v4113_v14 }
0x17a5   :  { %5444 = vmatpush3.bf16.msra.mxu1 %v5441_v17  ;;  %v4346_v17 = vld [vmem:[%s6436_s14 + $0x1] ss:$0 sm:$0xff] }
0x1857   :  { %v3744_v50 = vpop.f32.mrb[36].mxu0 }
0x1858   :  { %3842 = vrot.lane.b32.xlu1 %v3744_v50, %s5751_s7  ;;  %v5054_v51 = vpop.f32.mrb[37].mxu0 }
0x185b   :  { %v3820_v52 = vpop.f32.mrb[42].mxu1 }
0x185c   :  { %3844 = vrot.lane.b32.xlu0 %v3820_v52, %s5751_s7  ;;  %v5059_v23 = vpop.f32.mrb[43].mxu1 }
0x18ca   :  { %v3843_v58 = vpop.permute.xlu1 %3842 }
0x18cb   :  { %v3852_v59 = vsel %vm1826_vm2, %v3850_v57, %v3843_v58 }
0x18cc   :  { %5068 = vmatprep.mubr.msk.f32.mxu0 %vm1840_vm4, %v3852_v59 }
0x18ce   :  { %v3845_v61 = vpop.permute.xlu0 %3844 }
0x18cf   :  { %v3853_v62 = vsel %vm1826_vm2, %v3851_v60, %v3845_v61 }
0x18d0   :  { %5069 = vmatmul.mubr.msk.f32.vlgmr.msra.gmra.mrb[38].mxu0 %vm1840_vm4, %v3853_v62 }
0x18d1   :  { %5448 = vmatpush3.bf16.msra.mxu0 %v5445_v20 }
0x18d2   :  { %5450 = vmatprep.subr.bf16.mxu0 %v5449_v24 }
0x18d5   :  { %5452 = vmatpush3.bf16.msra.mxu0 %v5449_v24 }
0x18d6   :  { %5454 = vmatprep.subr.bf16.mxu0 %v5453_v32 }
0x18d9   :  { %5456 = vmatpush3.bf16.msra.mxu0 %v5453_v32 }
0x18da   :  { %5458 = vmatprep.subr.bf16.mxu0 %v5457_v38 }
0x18dd   :  { %5460 = vmatpush3.bf16.msra.mxu0 %v5457_v38 }
0x18de   :  { %5462 = vmatprep.subr.bf16.mxu0 %v5461_v40 }
0x18e1   :  { %5464 = vmatpush3.bf16.msra.mxu0 %v5461_v40 }
0x18e2   :  { %5466 = vmatprep.subr.bf16.mxu0 %v5465_v45 }
0x18e5   :  { %5468 = vmatpush3.bf16.msra.mxu0 %v5465_v45 }
0x18e6   :  { %5470 = vmatprep.subr.bf16.mxu0 %v5469_v48 }
0x18e9   :  { %5472 = vmatpush3.bf16.msra.mxu0 %v5469_v48 }
0x18ea   :  { %5474 = vmatprep.subr.bf16.mxu0 %v5473_v16 }
0x18ed   :  { %5476 = vmatpush3.bf16.msra.mxu0 %v5473_v16 }
0x19a3   :  { %v5070_v50 = vpop.f32.mrb[38].mxu0 }
0x19a4   :  { %v3945_v51 = vadd.f32 %v5070_v50, %v4338_v49  ;;  %v3939_v52 = vpop.f32.mrb[39].mxu0 }
0x19a5   :  { %v3940_v23 = vadd.f32 %v4338_v49, %v3939_v52 }
0x19a6   :  { %v3949_v53 = vadd.f32 %v3945_v51, %v6200_v2 }
0x19a7   :  { %v3948_v22 = vadd.f32 %v3940_v23, %v6198_v1 }
0x19a8   :  { %v3963_v54 = vmul.f32 %v3949_v53, %v3949_v53 }
0x19a9   :  { %v3954_v55 = vadd.f32 %v3949_v53, %v3948_v22  ;;  %v3962_v56 = vmul.f32 %v3948_v22, %v3948_v22 }
0x19ab   :  { %v3955_v57 = vrot.slane %v3954_v55, 4  ;;  %v3964_v58 = vadd.f32 %v3963_v54, %v3962_v56 }
0x19ad   :  { %v3956_v59 = vadd.f32 %v3955_v57, %v3954_v55  ;;  %v3965_v28 = vrot.slane %v3964_v58, 4 }
0x19af   :  { %v3957_v60 = vrot.slane %v3956_v59, 2  ;;  %v3966_v61 = vadd.f32 %v3965_v28, %v3964_v58 }
0x19b1   :  { %v3958_v62 = vadd.f32 %v3957_v60, %v3956_v59  ;;  %v3967_v63 = vrot.slane %v3966_v61, 2 }
0x19b3   :  { %v3959_v0 = vrot.slane %v3958_v62, 1  ;;  %v3968_v34 = vadd.f32 %v3967_v63, %v3966_v61 }
0x19b5   :  { %v3960_v3 = vadd.f32 %v3959_v0, %v3958_v62  ;;  %v3969_v4 = vrot.slane %v3968_v34, 1  ;;  %v4351_v62 = vld [vmem:[%s6439_s17 + $0x1] ss:$0 sm:$0xff] }
0x19b7   :  { %v3961_v8 = vmul.f32 0.0625, %v3960_v3  ;;  %v3970_v10 = vadd.f32 %v3969_v4, %v3968_v34  ;;  %v4352_v34 = vld [vmem:[%s6440_s18 + $0x1] ss:$0 sm:$0xff] }
0x19b9   :  { %v3971_v2 = vmul.f32 0.0625, %v3970_v10  ;;  %v3972_v11 = vmul.f32 %v3961_v8, %v3961_v8  ;;  %v3974_v1 = vsub.f32 %v3948_v22, %v3961_v8  ;;  %v3975_v5 = vsub.f32 %v3949_v53, %v3961_v8 }
0x19bb   :  { %v3973_v29 = vsub.f32 %v3971_v2, %v3972_v11 }
0x19bd   :  { %v3976_v30 = vadd.f32 1e-05, %v3973_v29 }
0x19bf   :  { %5567 = vrsqrt.f32 %v3976_v30 }
0x19c9   :  { %v5568_v31 = vpop.eup %5567 }
0x19ca   :  { %v3978_v13 = vmul.f32 %v5568_v31, %v3974_v1  ;;  %v3979_v35 = vmul.f32 %v5568_v31, %v3975_v5 }
0x19cc   :  { %v3986_v9 = vmul.f32 %v4343_v12, %v3978_v13  ;;  %v3987_v7 = vmul.f32 %v4343_v12, %v3979_v35 }
0x19ce   :  { %v3994_v36 = vadd.f32 %v4344_v6, %v3986_v9  ;;  %v3995_v37 = vadd.f32 %v4344_v6, %v3987_v7 }
0x19d0   :  { %5103 = vmatprep.mubr.f32.mxu1 %v3994_v36 }
0x19d1   :  { %5104 = vmatmul.mubr.f32.vlgmr.msra.gmra.mrb[44].mxu1 %v3995_v37 }
0x1aa4   :  { %v5105_v18 = vpop.f32.mrb[44].mxu1 }
0x1aa5   :  { %v4093_v19 = vadd.f32 %v5105_v18, %v4346_v17  ;;  %v4087_v27 = vpop.f32.mrb[45].mxu1 }
0x1aa6   :  { %v4088_v20 = vadd.f32 %v4346_v17, %v4087_v27 }
0x1aa7   :  { %v4097_v24 = vmax.f32 %v4093_v19, 0.0 }
0x1aa8   :  { %v4096_v21 = vmax.f32 %v4088_v20, 0.0 }
0x1aaa   :  { %5138 = vmatprep.mubr.f32.mxu0 %v4096_v21 }
0x1aab   :  { %5139 = vmatmul.mubr.f32.vlgmr.msra.gmra.mrb[40].mxu0 %v4097_v24 }
0x1b7e   :  { %v5140_v26 = vpop.f32.mrb[40].mxu0 }
0x1b7f   :  { %v4195_v32 = vadd.f32 %v5140_v26, %v4348_v25  ;;  %v4189_v33 = vpop.f32.mrb[41].mxu0 }
0x1b80   :  { %v4190_v39 = vadd.f32 %v4348_v25, %v4189_v33 }
0x1b81   :  { %v4199_v38 = vadd.f32 %v4195_v32, %v3995_v37 }
0x1b82   :  { %v4198_v43 = vadd.f32 %v4190_v39, %v3994_v36 }
0x1b83   :  { %v4213_v41 = vmul.f32 %v4199_v38, %v4199_v38 }
0x1b84   :  { %v4204_v40 = vadd.f32 %v4199_v38, %v4198_v43  ;;  %v4212_v42 = vmul.f32 %v4198_v43, %v4198_v43 }
0x1b86   :  { %v4205_v44 = vrot.slane %v4204_v40, 4  ;;  %v4214_v45 = vadd.f32 %v4213_v41, %v4212_v42 }
0x1b88   :  { %v4206_v46 = vadd.f32 %v4205_v44, %v4204_v40  ;;  %v4215_v47 = vrot.slane %v4214_v45, 4 }
0x1b8a   :  { %v4207_v48 = vrot.slane %v4206_v46, 2  ;;  %v4216_v49 = vadd.f32 %v4215_v47, %v4214_v45 }
0x1b8c   :  { %v4208_v50 = vadd.f32 %v4207_v48, %v4206_v46  ;;  %v4217_v51 = vrot.slane %v4216_v49, 2 }
0x1b8e   :  { %v4209_v52 = vrot.slane %v4208_v50, 1  ;;  %v4218_v23 = vadd.f32 %v4217_v51, %v4216_v49 }
0x1b90   :  { %v4210_v53 = vadd.f32 %v4209_v52, %v4208_v50  ;;  %v4219_v22 = vrot.slane %v4218_v23, 1 }
0x1b92   :  { %v4211_v54 = vmul.f32 0.0625, %v4210_v53  ;;  %v4220_v55 = vadd.f32 %v4219_v22, %v4218_v23 }
0x1b94   :  { %v4221_v56 = vmul.f32 0.0625, %v4220_v55  ;;  %v4222_v57 = vmul.f32 %v4211_v54, %v4211_v54  ;;  %v4224_v58 = vsub.f32 %v4198_v43, %v4211_v54  ;;  %v4225_v59 = vsub.f32 %v4199_v38, %v4211_v54 }
0x1b96   :  { %v4223_v28 = vsub.f32 %v4221_v56, %v4222_v57 }
0x1b98   :  { %v4226_v60 = vadd.f32 1e-05, %v4223_v28 }
0x1b9a   :  { %5569 = vrsqrt.f32 %v4226_v60 }
0x1ba4   :  { %v5570_v61 = vpop.eup %5569 }
0x1ba5   :  { %v4228_v63 = vmul.f32 %v5570_v61, %v4224_v58  ;;  %v4229_v0 = vmul.f32 %v5570_v61, %v4225_v59 }
0x1ba7   :  { %v4236_v3 = vmul.f32 %v4351_v62, %v4228_v63  ;;  %v4237_v4 = vmul.f32 %v4351_v62, %v4229_v0 }
0x1ba9   :  { %v4244_v8 = vadd.f32 %v4352_v34, %v4236_v3  ;;  %v4245_v10 = vadd.f32 %v4352_v34, %v4237_v4 }
0x1bab   :  { %4246 = vst [vmem:[#allocation13] sm:$0xff] %v4244_v8  ;;  %4247 = vst [vmem:[#allocation13 + $0x8] sm:$0xff] %v4245_v10 }
0x1bac   :  { %5714 = shalt.err (!%p5711_p10)
}
0x1bad   :  { %s6455_s26 = sld [smem:[#allocation23_spill]] }
0x1bb3   :  { %s5715_s18 = scalar_lea.hbm %s6455_s26, 256 }
0x1bb4   :  { %p5716_p11 = scmp.ne.s32.totalorder %s6455_s26, %s5715_s18  ;;  %p5719_p12 = scmp.lt.u32.totalorder %s5715_s18, %s6455_s26 }
0x1bb6   :  { %p5721_p13 = pnand %p5719_p12, %p5716_p11 }
0x1bb8   :  { %5724 = shalt.err (!%p5721_p13)
}
0x1bb9   :  { %4259 = dma.vmem_to_hbm [thread:$0]  %s4254_s9, 256, %s6455_s26, [#allocation4], %s5737_s27, %s5737_s27, %s5738_s28  }
0x1bba   :  { %5733 = dma.done.wait [#allocation4], 256  }
0x1bbb   :  { %5734 = vsyncadd [#allocation4], 4294967040 }
0x1bbc   :  { %4263 = vsyncpa [#allocation3], 1 }
0x1bbd   :  { %4264 = vsyncpa [#allocation6], 1 }
0x1bbe   :  { %4265 = vsyncpa [#allocation9], 1 }
0x1bbf   :  { %4266 = vsyncpa [#allocation12], 1 }
0x1bc0   :  { %4267 = vsyncpa [#allocation4], 1 }

</bundles_post_ra>
